<compile_context>
chip_gen: v5e
topology: v5e:2x2
jax: 0.10.0
libtpu: 0.0.40
codegen_flags: <defaults>
</compile_context>

<pallas_src>
import functools

import jax
import jax.numpy as jnp
from jax.experimental import pallas as pl
from jax.experimental.pallas import tpu as pltpu

EPSILON = float(jnp.finfo(jnp.float32).eps)  # audiozen EPSILON = np.finfo(np.float32).eps
_HIST = 128                                  # lane-tile of causal history carried across time tiles


def _conformer_conv_kernel(x_ref, w1_ref, w2_ref, p_ref, o_ref, gprev_ref, *, K):
    # p_ref columns: 0 gamma, 1 beta, 2 GLU-value bias, 3 GLU-gate bias,
    #                4 depthwise bias, 5 pw2 bias, 6..6+K depthwise taps.
    ti = pl.program_id(1)                     # time-tile index (sequential axis)
    _, F, Tt = x_ref.shape

    gamma = p_ref[:, 0:1]                     # (F, 1)
    beta = p_ref[:, 1:2]                      # (F, 1)
    inv_f = 1.0 / F

    def layer_norm(z):                        # one-pass stats over the feature (sublane) axis
        s1 = jnp.sum(z, axis=0, keepdims=True)            # (1, Tt)
        s2 = jnp.sum(z * z, axis=0, keepdims=True)        # (1, Tt)
        mu = s1 * inv_f
        var = jnp.maximum(s2 * inv_f - mu * mu, 0.0)
        return (z - mu) * jax.lax.rsqrt(var + EPSILON) * gamma + beta

    # ---- LayerNorm #1 (x is not kept live; re-read before the residual) ----
    h = layer_norm(x_ref[0].astype(jnp.float32))           # (F, Tt)

    # ---- fused pointwise conv1 + GLU over channels ----
    h1 = jnp.dot(w1_ref[...], h, preferred_element_type=jnp.float32)   # (2F, Tt)
    a = h1[:F] + p_ref[:, 2:3]
    gate = h1[F:] + p_ref[:, 3:4]
    g = a * jax.nn.sigmoid(gate)              # (F, Tt)

    # ---- causal depthwise conv (cross-tile carry: last 128 columns of g) ----
    @pl.when(ti == 0)
    def _():                                  # zero history at the start of every sequence
        gprev_ref[...] = jnp.zeros_like(gprev_ref)

    hist = gprev_ref[...]                     # (F, 128) — previous tile's g[:, Tt-128:]
    if Tt > _HIST:
        # place the history in the last 128 lanes; earlier lanes are never selected (d < 128)
        prev_full = jnp.concatenate(
            [jnp.zeros((F, Tt - _HIST), jnp.float32), hist], axis=1)
    else:
        prev_full = hist
    lane = jax.lax.broadcasted_iota(jnp.int32, (F, Tt), 1)

    def tap(d):                               # PyTorch cross-correlation: delay d -> tap K-1-d
        k = K - 1 - d
        return p_ref[:, 6 + k:7 + k]          # (F, 1)

    y = g * tap(0)                            # current-frame tap
    for d in range(1, K):                     # d = delay into the past
        # splice history into the tail, rotate by d lanes:
        #   out[:, t] = g[:, t-d]              for t >= d
        #   out[:, t] = prev_g[:, Tt + t - d]  for t <  d  (causal history)
        mixed = jnp.where(lane >= Tt - d, prev_full, g)
        y = y + pltpu.roll(mixed, shift=d, axis=1) * tap(d)
    y = y + p_ref[:, 4:5]                     # depthwise bias
    gprev_ref[...] = g[:, Tt - _HIST:]        # carry for the next time tile (lane-aligned slice)

    # ---- LayerNorm #2 (same affine params) + SiLU ----
    h2 = layer_norm(y)
    h2 = h2 * jax.nn.sigmoid(h2)

    # ---- pointwise conv2 + residual ----
    out = jnp.dot(w2_ref[...], h2, preferred_element_type=jnp.float32) + p_ref[:, 5:6]
    # TODO(synk): dropout omitted (inference-mode identity).
    o_ref[0] = (out + x_ref[0].astype(jnp.float32)).astype(o_ref.dtype)


def _round_up(x, m):
    return (x + m - 1) // m * m


def causal_conformer_conv_block(xs, params, *, max_tile_t=1024):
    """xs: [B, F, T] (PyTorch layout). Returns [B, F, T]."""
    B, F, T = xs.shape
    K = params["dw_w"].shape[-1]
    assert 3 <= K <= _HIST, "kernel_size must be in [3, 128] for the 128-lane history carry"

    # Lane-aligned time tile: use the full 128-padded sequence when it fits,
    # otherwise the largest 128-multiple tile <= max_tile_t dividing it (no extra padding).
    T128 = _round_up(T, 128)
    if T128 <= max_tile_t:
        tile_t = T128
    else:
        tile_t = max_tile_t
        for cand in range(max_tile_t, 127, -128):
            if T128 % cand == 0:
                tile_t = cand
                break
    T_pad = _round_up(T, tile_t)
    nT = T_pad // tile_t
    x_in = xs if T_pad == T else jnp.pad(xs, ((0, 0), (0, 0), (0, T_pad - T)))

    f32 = jnp.float32
    w1 = params["pw1_w"].astype(f32)                       # (2F, F) conv1d weight (out, in)
    w2 = params["pw2_w"].astype(f32)                       # (F, F)
    b1 = params["pw1_b"].astype(f32)                       # (2F,)
    packed = jnp.concatenate(                              # (F, 6 + K) per-channel params
        [params["ln_gamma"].astype(f32)[:, None],
         params["ln_beta"].astype(f32)[:, None],
         b1[:F, None], b1[F:, None],                       # GLU value / gate bias
         params["dw_b"].astype(f32)[:, None],
         params["pw2_b"].astype(f32)[:, None],
         params["dw_w"].astype(f32)],                      # (F, K) depthwise taps
        axis=1)

    def const(shape):
        return pl.BlockSpec(shape, lambda b, t: (0,) * len(shape))

    out = pl.pallas_call(
        functools.partial(_conformer_conv_kernel, K=K),
        out_shape=jax.ShapeDtypeStruct((B, F, T_pad), xs.dtype),
        grid_spec=pltpu.PrefetchScalarGridSpec(
            num_scalar_prefetch=0,
            # NOTE: the time axis must stay innermost and "arbitrary" — the causal
            # carry in gprev_ref relies on sequential time tiles per batch.
            grid=(B, nT),
            in_specs=[
                pl.BlockSpec((1, F, tile_t), lambda b, t: (b, 0, t)),  # x
                const((2 * F, F)),                                     # fused pw1 weight
                const((F, F)),                                         # pw2 weight
                const((F, 6 + K)),                                     # packed per-channel params
            ],
            out_specs=pl.BlockSpec((1, F, tile_t), lambda b, t: (b, 0, t)),
            scratch_shapes=[pltpu.VMEM((F, _HIST), f32)],              # causal history carry
        ),
        compiler_params=pltpu.CompilerParams(
            dimension_semantics=("parallel", "arbitrary")),
    )(x_in, w1, w2, packed)

    return out if T_pad == T else out[:, :, :T]


def _reference(xs, params):
    """Pure-JAX reference mirroring the PyTorch forward."""
    B, F, T = xs.shape
    gamma, beta = params["ln_gamma"], params["ln_beta"]
    K = params["dw_w"].shape[-1]

    def ln(z):  # z: [..., F]
        mu = jnp.mean(z, -1, keepdims=True)
        var = jnp.mean((z - mu) ** 2, -1, keepdims=True)
        return (z - mu) / jnp.sqrt(var + EPSILON) * gamma + beta

    x = jnp.transpose(xs, (0, 2, 1))                         # [B, T, F]
    h = ln(x)
    h1 = h @ params["pw1_w"].T + params["pw1_b"]             # [B, T, 2F]
    g = h1[..., :F] * jax.nn.sigmoid(h1[..., F:])
    gp = jnp.pad(g, ((0, 0), (K - 1, 0), (0, 0)))            # causal left pad
    y = sum(gp[:, k:k + T, :] * params["dw_w"][:, k] for k in range(K)) + params["dw_b"]
    h2 = ln(y)
    h2 = h2 * jax.nn.sigmoid(h2)
    out = h2 @ params["pw2_w"].T + params["pw2_b"] + x
    return jnp.transpose(out, (0, 2, 1))


if __name__ == "__main__":
    B, F, T, K = 2, 32, 512, 8                 # feat_dim=32, kernel_size=8 (>=3)

    key = jax.random.PRNGKey(0)
    ks = jax.random.split(key, 9)
    params = {
        "ln_gamma": 1.0 + 0.1 * jax.random.normal(ks[0], (F,), jnp.float32),
        "ln_beta": 0.1 * jax.random.normal(ks[1], (F,), jnp.float32),
        "pw1_w": 0.1 * jax.random.normal(ks[2], (2 * F, F), jnp.float32),   # conv1d (out, in)
        "pw1_b": 0.1 * jax.random.normal(ks[3], (2 * F,), jnp.float32),
        "dw_w": 0.1 * jax.random.normal(ks[4], (F, K), jnp.float32),        # depthwise (F, K)
        "dw_b": 0.1 * jax.random.normal(ks[5], (F,), jnp.float32),
        "pw2_w": 0.1 * jax.random.normal(ks[6], (F, F), jnp.float32),
        "pw2_b": 0.1 * jax.random.normal(ks[7], (F,), jnp.float32),
    }
    xs = jax.random.normal(ks[8], (B, F, T), jnp.float32)    # PyTorch layout [B, F, T]

    ref = _reference(xs, params)

    # single time tile (T fits in one tile -> no carry across tiles)
    out = jax.block_until_ready(causal_conformer_conv_block(xs, params))
    assert out.shape == (B, F, T)
    err = float(jnp.max(jnp.abs(out - ref)))
    assert jnp.allclose(out, ref, atol=5e-4, rtol=5e-4), f"mismatch (single-tile, max abs err {err})"

    # multi-tile path: forces tile_t=128 so the causal history carry is exercised
    out_mt = jax.block_until_ready(causal_conformer_conv_block(xs, params, max_tile_t=128))
    err_mt = float(jnp.max(jnp.abs(out_mt - ref)))
    assert jnp.allclose(out_mt, ref, atol=5e-4, rtol=5e-4), f"mismatch (multi-tile, max abs err {err_mt})"

    print("KERNEL_OK")
</pallas_src>

<mosaic_0001>
module attributes {stable_mosaic.version = 11 : i64} {
  func.func @_conformer_conv_kernel(%arg0: i32, %arg1: i32, %arg2: memref<1x32x512xf32, #tpu.memory_space<vmem>>, %arg3: memref<64x32xf32, #tpu.memory_space<vmem>>, %arg4: memref<32x32xf32, #tpu.memory_space<vmem>>, %arg5: memref<32x14xf32, #tpu.memory_space<vmem>>, %arg6: memref<1x32x512xf32, #tpu.memory_space<vmem>>, %arg7: memref<32x128xf32, #tpu.memory_space<vmem>>) attributes {dimension_semantics = [#tpu.dimension_semantics<parallel>, #tpu.dimension_semantics<arbitrary>], iteration_bounds = array<i64: 2, 1>, scalar_prefetch = 0 : i64, scratch_operands = 1 : i64, tpu.core_type = #tpu.core_type<tc>, window_params = [{transform_indices = @transform_0, window_bounds = array<i64: 1, 32, 512>}, {pipeline_mode = #tpu.pipeline_mode<synchronous>, transform_indices = @transform_1, window_bounds = array<i64: 64, 32>}, {pipeline_mode = #tpu.pipeline_mode<synchronous>, transform_indices = @transform_2, window_bounds = array<i64: 32, 32>}, {pipeline_mode = #tpu.pipeline_mode<synchronous>, transform_indices = @transform_3, window_bounds = array<i64: 32, 14>}, {transform_indices = @transform_4, window_bounds = array<i64: 1, 32, 512>}]} {
    %c0 = arith.constant 0 : index
    %c0_0 = arith.constant 0 : index
    %0 = vector.load %arg5[%c0, %c0_0] : memref<32x14xf32, #tpu.memory_space<vmem>>, vector<32x1xf32>
    %c0_1 = arith.constant 0 : index
    %c1 = arith.constant 1 : index
    %1 = vector.load %arg5[%c0_1, %c1] : memref<32x14xf32, #tpu.memory_space<vmem>>, vector<32x1xf32>
    %c0_2 = arith.constant 0 : index
    %c0_3 = arith.constant 0 : index
    %c0_4 = arith.constant 0 : index
    %2 = vector.load %arg2[%c0_2, %c0_3, %c0_4] : memref<1x32x512xf32, #tpu.memory_space<vmem>>, vector<1x32x512xf32>
    %3 = vector.shape_cast %2 : vector<1x32x512xf32> to vector<32x512xf32>
    %cst = arith.constant dense<0.000000e+00> : vector<512xf32>
    %4 = vector.multi_reduction <add>, %3, %cst [0] : vector<32x512xf32> to vector<512xf32>
    %5 = vector.shape_cast %4 : vector<512xf32> to vector<1x512xf32>
    %6 = arith.mulf %3, %3 : vector<32x512xf32>
    %cst_5 = arith.constant dense<0.000000e+00> : vector<512xf32>
    %7 = vector.multi_reduction <add>, %6, %cst_5 [0] : vector<32x512xf32> to vector<512xf32>
    %8 = vector.shape_cast %7 : vector<512xf32> to vector<1x512xf32>
    %cst_6 = arith.constant 3.125000e-02 : f32
    %9 = vector.broadcast %cst_6 : f32 to vector<1x512xf32>
    %10 = arith.mulf %5, %9 : vector<1x512xf32>
    %cst_7 = arith.constant 3.125000e-02 : f32
    %11 = vector.broadcast %cst_7 : f32 to vector<1x512xf32>
    %12 = arith.mulf %8, %11 : vector<1x512xf32>
    %13 = arith.mulf %10, %10 : vector<1x512xf32>
    %14 = arith.subf %12, %13 : vector<1x512xf32>
    %cst_8 = arith.constant 0.000000e+00 : f32
    %15 = vector.broadcast %cst_8 : f32 to vector<1x512xf32>
    %16 = arith.maximumf %14, %15 : vector<1x512xf32>
    %17 = vector.broadcast %10 : vector<1x512xf32> to vector<32x512xf32>
    %18 = arith.subf %3, %17 : vector<32x512xf32>
    %cst_9 = arith.constant 1.1920929E-7 : f32
    %19 = vector.broadcast %cst_9 : f32 to vector<1x512xf32>
    %20 = arith.addf %16, %19 : vector<1x512xf32>
    %21 = math.rsqrt %20 : vector<1x512xf32>
    %22 = vector.broadcast %21 : vector<1x512xf32> to vector<32x512xf32>
    %23 = arith.mulf %18, %22 : vector<32x512xf32>
    %24 = vector.broadcast %0 : vector<32x1xf32> to vector<32x512xf32>
    %25 = arith.mulf %23, %24 : vector<32x512xf32>
    %26 = vector.broadcast %1 : vector<32x1xf32> to vector<32x512xf32>
    %27 = arith.addf %25, %26 : vector<32x512xf32>
    %c0_10 = arith.constant 0 : index
    %c0_11 = arith.constant 0 : index
    %28 = vector.load %arg3[%c0_10, %c0_11] : memref<64x32xf32, #tpu.memory_space<vmem>>, vector<64x32xf32>
    %cst_12 = arith.constant dense<0.000000e+00> : vector<64x512xf32>
    %29 = tpu.matmul %28, %27, %cst_12 {dimension_numbers = #tpu.dot_dimension_numbers<[1], [0], [0], [1], [0, 0, 1, 1], [], []>} : vector<64x32xf32>, vector<32x512xf32>, vector<64x512xf32> -> vector<64x512xf32>
    %30 = vector.extract_strided_slice %29 {offsets = [0, 0], sizes = [32, 512], strides = [1, 1]} : vector<64x512xf32> to vector<32x512xf32>
    %c0_13 = arith.constant 0 : index
    %c2 = arith.constant 2 : index
    %31 = vector.load %arg5[%c0_13, %c2] : memref<32x14xf32, #tpu.memory_space<vmem>>, vector<32x1xf32>
    %32 = vector.broadcast %31 : vector<32x1xf32> to vector<32x512xf32>
    %33 = arith.addf %30, %32 : vector<32x512xf32>
    %34 = vector.extract_strided_slice %29 {offsets = [32, 0], sizes = [32, 512], strides = [1, 1]} : vector<64x512xf32> to vector<32x512xf32>
    %c0_14 = arith.constant 0 : index
    %c3 = arith.constant 3 : index
    %35 = vector.load %arg5[%c0_14, %c3] : memref<32x14xf32, #tpu.memory_space<vmem>>, vector<32x1xf32>
    %36 = vector.broadcast %35 : vector<32x1xf32> to vector<32x512xf32>
    %37 = arith.addf %34, %36 : vector<32x512xf32>
    %38 = arith.negf %37 : vector<32x512xf32>
    %39 = math.exp %38 : vector<32x512xf32>
    %cst_15 = arith.constant 1.000000e+00 : f32
    %40 = vector.broadcast %cst_15 : f32 to vector<32x512xf32>
    %41 = arith.addf %40, %39 : vector<32x512xf32>
    %42 = arith.divf %40, %41 : vector<32x512xf32>
    %43 = arith.mulf %33, %42 : vector<32x512xf32>
    %c0_i32 = arith.constant 0 : i32
    %44 = arith.cmpi eq, %arg1, %c0_i32 : i32
    %45 = arith.extui %44 : i1 to i32
    %c0_i32_16 = arith.constant 0 : i32
    %46 = arith.cmpi ne, %45, %c0_i32_16 : i32
    scf.if %46 {
      %cst_48 = arith.constant 0.000000e+00 : f32
      %156 = vector.broadcast %cst_48 : f32 to vector<32x128xf32>
      %c0_49 = arith.constant 0 : index
      %c0_50 = arith.constant 0 : index
      %157 = vector.load %arg7[%c0_49, %c0_50] : memref<32x128xf32, #tpu.memory_space<vmem>>, vector<32x128xf32>
      tpu.vector_store %arg7[%c0_49, %c0_50], %156 {strides = array<i32>} : memref<32x128xf32, #tpu.memory_space<vmem>>, vector<32x128xf32>,
    } else {
    }
    %c0_17 = arith.constant 0 : index
    %c0_18 = arith.constant 0 : index
    %47 = vector.load %arg7[%c0_17, %c0_18] : memref<32x128xf32, #tpu.memory_space<vmem>>, vector<32x128xf32>
    %cst_19 = arith.constant 0.000000e+00 : f32
    %48 = vector.broadcast %cst_19 : f32 to vector<32x384xf32>
    %49 = tpu.concatenate %48, %47 in 1 : vector<32x384xf32>, vector<32x128xf32> -> vector<32x512xf32>
    %50 = tpu.iota {dimensions = array<i32: 1>} : vector<32x512xi32>
    %c0_20 = arith.constant 0 : index
    %c13 = arith.constant 13 : index
    %51 = vector.load %arg5[%c0_20, %c13] : memref<32x14xf32, #tpu.memory_space<vmem>>, vector<32x1xf32>
    %52 = vector.broadcast %51 : vector<32x1xf32> to vector<32x512xf32>
    %53 = arith.mulf %43, %52 : vector<32x512xf32>
    %c511_i32 = arith.constant 511 : i32
    %54 = vector.broadcast %c511_i32 : i32 to vector<32x512xi32>
    %55 = arith.cmpi sge, %50, %54 : vector<32x512xi32>
    %56 = arith.select %55, %49, %43 : vector<32x512xi1>, vector<32x512xf32>
    %c1_i32 = arith.constant 1 : i32
    %57 = tpu.dynamic_rotate %56 by %c1_i32 dim 1 : vector<32x512xf32>, i32 -> vector<32x512xf32>
    %c0_21 = arith.constant 0 : index
    %c12 = arith.constant 12 : index
    %58 = vector.load %arg5[%c0_21, %c12] : memref<32x14xf32, #tpu.memory_space<vmem>>, vector<32x1xf32>
    %59 = vector.broadcast %58 : vector<32x1xf32> to vector<32x512xf32>
    %60 = arith.mulf %57, %59 : vector<32x512xf32>
    %61 = arith.addf %53, %60 : vector<32x512xf32>
    %c510_i32 = arith.constant 510 : i32
    %62 = vector.broadcast %c510_i32 : i32 to vector<32x512xi32>
    %63 = arith.cmpi sge, %50, %62 : vector<32x512xi32>
    %64 = arith.select %63, %49, %43 : vector<32x512xi1>, vector<32x512xf32>
    %c2_i32 = arith.constant 2 : i32
    %65 = tpu.dynamic_rotate %64 by %c2_i32 dim 1 : vector<32x512xf32>, i32 -> vector<32x512xf32>
    %c0_22 = arith.constant 0 : index
    %c11 = arith.constant 11 : index
    %66 = vector.load %arg5[%c0_22, %c11] : memref<32x14xf32, #tpu.memory_space<vmem>>, vector<32x1xf32>
    %67 = vector.broadcast %66 : vector<32x1xf32> to vector<32x512xf32>
    %68 = arith.mulf %65, %67 : vector<32x512xf32>
    %69 = arith.addf %61, %68 : vector<32x512xf32>
    %c509_i32 = arith.constant 509 : i32
    %70 = vector.broadcast %c509_i32 : i32 to vector<32x512xi32>
    %71 = arith.cmpi sge, %50, %70 : vector<32x512xi32>
    %72 = arith.select %71, %49, %43 : vector<32x512xi1>, vector<32x512xf32>
    %c3_i32 = arith.constant 3 : i32
    %73 = tpu.dynamic_rotate %72 by %c3_i32 dim 1 : vector<32x512xf32>, i32 -> vector<32x512xf32>
    %c0_23 = arith.constant 0 : index
    %c10 = arith.constant 10 : index
    %74 = vector.load %arg5[%c0_23, %c10] : memref<32x14xf32, #tpu.memory_space<vmem>>, vector<32x1xf32>
    %75 = vector.broadcast %74 : vector<32x1xf32> to vector<32x512xf32>
    %76 = arith.mulf %73, %75 : vector<32x512xf32>
    %77 = arith.addf %69, %76 : vector<32x512xf32>
    %c508_i32 = arith.constant 508 : i32
    %78 = vector.broadcast %c508_i32 : i32 to vector<32x512xi32>
    %79 = arith.cmpi sge, %50, %78 : vector<32x512xi32>
    %80 = arith.select %79, %49, %43 : vector<32x512xi1>, vector<32x512xf32>
    %c4_i32 = arith.constant 4 : i32
    %81 = tpu.dynamic_rotate %80 by %c4_i32 dim 1 : vector<32x512xf32>, i32 -> vector<32x512xf32>
    %c0_24 = arith.constant 0 : index
    %c9 = arith.constant 9 : index
    %82 = vector.load %arg5[%c0_24, %c9] : memref<32x14xf32, #tpu.memory_space<vmem>>, vector<32x1xf32>
    %83 = vector.broadcast %82 : vector<32x1xf32> to vector<32x512xf32>
    %84 = arith.mulf %81, %83 : vector<32x512xf32>
    %85 = arith.addf %77, %84 : vector<32x512xf32>
    %c507_i32 = arith.constant 507 : i32
    %86 = vector.broadcast %c507_i32 : i32 to vector<32x512xi32>
    %87 = arith.cmpi sge, %50, %86 : vector<32x512xi32>
    %88 = arith.select %87, %49, %43 : vector<32x512xi1>, vector<32x512xf32>
    %c5_i32 = arith.constant 5 : i32
    %89 = tpu.dynamic_rotate %88 by %c5_i32 dim 1 : vector<32x512xf32>, i32 -> vector<32x512xf32>
    %c0_25 = arith.constant 0 : index
    %c8 = arith.constant 8 : index
    %90 = vector.load %arg5[%c0_25, %c8] : memref<32x14xf32, #tpu.memory_space<vmem>>, vector<32x1xf32>
    %91 = vector.broadcast %90 : vector<32x1xf32> to vector<32x512xf32>
    %92 = arith.mulf %89, %91 : vector<32x512xf32>
    %93 = arith.addf %85, %92 : vector<32x512xf32>
    %c506_i32 = arith.constant 506 : i32
    %94 = vector.broadcast %c506_i32 : i32 to vector<32x512xi32>
    %95 = arith.cmpi sge, %50, %94 : vector<32x512xi32>
    %96 = arith.select %95, %49, %43 : vector<32x512xi1>, vector<32x512xf32>
    %c6_i32 = arith.constant 6 : i32
    %97 = tpu.dynamic_rotate %96 by %c6_i32 dim 1 : vector<32x512xf32>, i32 -> vector<32x512xf32>
    %c0_26 = arith.constant 0 : index
    %c7 = arith.constant 7 : index
    %98 = vector.load %arg5[%c0_26, %c7] : memref<32x14xf32, #tpu.memory_space<vmem>>, vector<32x1xf32>
    %99 = vector.broadcast %98 : vector<32x1xf32> to vector<32x512xf32>
    %100 = arith.mulf %97, %99 : vector<32x512xf32>
    %101 = arith.addf %93, %100 : vector<32x512xf32>
    %c505_i32 = arith.constant 505 : i32
    %102 = vector.broadcast %c505_i32 : i32 to vector<32x512xi32>
    %103 = arith.cmpi sge, %50, %102 : vector<32x512xi32>
    %104 = arith.select %103, %49, %43 : vector<32x512xi1>, vector<32x512xf32>
    %c7_i32 = arith.constant 7 : i32
    %105 = tpu.dynamic_rotate %104 by %c7_i32 dim 1 : vector<32x512xf32>, i32 -> vector<32x512xf32>
    %c0_27 = arith.constant 0 : index
    %c6 = arith.constant 6 : index
    %106 = vector.load %arg5[%c0_27, %c6] : memref<32x14xf32, #tpu.memory_space<vmem>>, vector<32x1xf32>
    %107 = vector.broadcast %106 : vector<32x1xf32> to vector<32x512xf32>
    %108 = arith.mulf %105, %107 : vector<32x512xf32>
    %109 = arith.addf %101, %108 : vector<32x512xf32>
    %c0_28 = arith.constant 0 : index
    %c4 = arith.constant 4 : index
    %110 = vector.load %arg5[%c0_28, %c4] : memref<32x14xf32, #tpu.memory_space<vmem>>, vector<32x1xf32>
    %111 = vector.broadcast %110 : vector<32x1xf32> to vector<32x512xf32>
    %112 = arith.addf %109, %111 : vector<32x512xf32>
    %113 = vector.extract_strided_slice %43 {offsets = [0, 384], sizes = [32, 128], strides = [1, 1]} : vector<32x512xf32> to vector<32x128xf32>
    %c0_29 = arith.constant 0 : index
    %c0_30 = arith.constant 0 : index
    %114 = vector.load %arg7[%c0_29, %c0_30] : memref<32x128xf32, #tpu.memory_space<vmem>>, vector<32x128xf32>
    tpu.vector_store %arg7[%c0_29, %c0_30], %113 {strides = array<i32>} : memref<32x128xf32, #tpu.memory_space<vmem>>, vector<32x128xf32>,
    %cst_31 = arith.constant dense<0.000000e+00> : vector<512xf32>
    %115 = vector.multi_reduction <add>, %112, %cst_31 [0] : vector<32x512xf32> to vector<512xf32>
    %116 = vector.shape_cast %115 : vector<512xf32> to vector<1x512xf32>
    %117 = arith.mulf %112, %112 : vector<32x512xf32>
    %cst_32 = arith.constant dense<0.000000e+00> : vector<512xf32>
    %118 = vector.multi_reduction <add>, %117, %cst_32 [0] : vector<32x512xf32> to vector<512xf32>
    %119 = vector.shape_cast %118 : vector<512xf32> to vector<1x512xf32>
    %cst_33 = arith.constant 3.125000e-02 : f32
    %120 = vector.broadcast %cst_33 : f32 to vector<1x512xf32>
    %121 = arith.mulf %116, %120 : vector<1x512xf32>
    %cst_34 = arith.constant 3.125000e-02 : f32
    %122 = vector.broadcast %cst_34 : f32 to vector<1x512xf32>
    %123 = arith.mulf %119, %122 : vector<1x512xf32>
    %124 = arith.mulf %121, %121 : vector<1x512xf32>
    %125 = arith.subf %123, %124 : vector<1x512xf32>
    %cst_35 = arith.constant 0.000000e+00 : f32
    %126 = vector.broadcast %cst_35 : f32 to vector<1x512xf32>
    %127 = arith.maximumf %125, %126 : vector<1x512xf32>
    %128 = vector.broadcast %121 : vector<1x512xf32> to vector<32x512xf32>
    %129 = arith.subf %112, %128 : vector<32x512xf32>
    %cst_36 = arith.constant 1.1920929E-7 : f32
    %130 = vector.broadcast %cst_36 : f32 to vector<1x512xf32>
    %131 = arith.addf %127, %130 : vector<1x512xf32>
    %132 = math.rsqrt %131 : vector<1x512xf32>
    %133 = vector.broadcast %132 : vector<1x512xf32> to vector<32x512xf32>
    %134 = arith.mulf %129, %133 : vector<32x512xf32>
    %135 = vector.broadcast %0 : vector<32x1xf32> to vector<32x512xf32>
    %136 = arith.mulf %134, %135 : vector<32x512xf32>
    %137 = vector.broadcast %1 : vector<32x1xf32> to vector<32x512xf32>
    %138 = arith.addf %136, %137 : vector<32x512xf32>
    %139 = arith.negf %138 : vector<32x512xf32>
    %140 = math.exp %139 : vector<32x512xf32>
    %cst_37 = arith.constant 1.000000e+00 : f32
    %141 = vector.broadcast %cst_37 : f32 to vector<32x512xf32>
    %142 = arith.addf %141, %140 : vector<32x512xf32>
    %143 = arith.divf %141, %142 : vector<32x512xf32>
    %144 = arith.mulf %138, %143 : vector<32x512xf32>
    %c0_38 = arith.constant 0 : index
    %c0_39 = arith.constant 0 : index
    %145 = vector.load %arg4[%c0_38, %c0_39] : memref<32x32xf32, #tpu.memory_space<vmem>>, vector<32x32xf32>
    %cst_40 = arith.constant dense<0.000000e+00> : vector<32x512xf32>
    %146 = tpu.matmul %145, %144, %cst_40 {dimension_numbers = #tpu.dot_dimension_numbers<[1], [0], [0], [1], [0, 0, 1, 1], [], []>} : vector<32x32xf32>, vector<32x512xf32>, vector<32x512xf32> -> vector<32x512xf32>
    %c0_41 = arith.constant 0 : index
    %c5 = arith.constant 5 : index
    %147 = vector.load %arg5[%c0_41, %c5] : memref<32x14xf32, #tpu.memory_space<vmem>>, vector<32x1xf32>
    %148 = vector.broadcast %147 : vector<32x1xf32> to vector<32x512xf32>
    %149 = arith.addf %146, %148 : vector<32x512xf32>
    %c0_42 = arith.constant 0 : index
    %c0_43 = arith.constant 0 : index
    %c0_44 = arith.constant 0 : index
    %150 = vector.load %arg2[%c0_42, %c0_43, %c0_44] : memref<1x32x512xf32, #tpu.memory_space<vmem>>, vector<1x32x512xf32>
    %151 = vector.shape_cast %150 : vector<1x32x512xf32> to vector<32x512xf32>
    %152 = arith.addf %149, %151 : vector<32x512xf32>
    %c0_45 = arith.constant 0 : index
    %c0_46 = arith.constant 0 : index
    %c0_47 = arith.constant 0 : index
    %153 = vector.load %arg6[%c0_45, %c0_46, %c0_47] : memref<1x32x512xf32, #tpu.memory_space<vmem>>, vector<1x32x512xf32>
    %154 = vector.shape_cast %153 : vector<1x32x512xf32> to vector<32x512xf32>
    %155 = vector.shape_cast %152 : vector<32x512xf32> to vector<1x32x512xf32>
    tpu.vector_store %arg6[%c0_45, %c0_46, %c0_47], %155 {strides = array<i32>} : memref<1x32x512xf32, #tpu.memory_space<vmem>>, vector<1x32x512xf32>,
    return
  }
  func.func @transform_0(%arg0: i32, %arg1: i32) -> (i32, i32, i32) {
    %c0_i32 = arith.constant 0 : i32
    %c0_i32_0 = arith.constant 0 : i32
    return %arg0, %c0_i32, %arg1 : i32, i32, i32
  }
  func.func @transform_1(%arg0: i32, %arg1: i32) -> (i32, i32) {
    %c0_i32 = arith.constant 0 : i32
    %c0_i32_0 = arith.constant 0 : i32
    %c0_i32_1 = arith.constant 0 : i32
    return %c0_i32, %c0_i32_0 : i32, i32
  }
  func.func @transform_2(%arg0: i32, %arg1: i32) -> (i32, i32) {
    %c0_i32 = arith.constant 0 : i32
    %c0_i32_0 = arith.constant 0 : i32
    %c0_i32_1 = arith.constant 0 : i32
    return %c0_i32, %c0_i32_0 : i32, i32
  }
  func.func @transform_3(%arg0: i32, %arg1: i32) -> (i32, i32) {
    %c0_i32 = arith.constant 0 : i32
    %c0_i32_0 = arith.constant 0 : i32
    %c0_i32_1 = arith.constant 0 : i32
    return %c0_i32, %c0_i32_0 : i32, i32
  }
  func.func @transform_4(%arg0: i32, %arg1: i32) -> (i32, i32, i32) {
    %c0_i32 = arith.constant 0 : i32
    %c0_i32_0 = arith.constant 0 : i32
    return %arg0, %c0_i32, %arg1 : i32, i32, i32
  }
}

</mosaic_0001>

<bundles_post_ra>
// kernel: tpu_custom_call.1
= control target key start
LH: loop header
LB: loop body
LE: loop exit
PB: predicated region body
PF: predicated region fallthrough
CT: control target
= control target key end

     0   :  { %9 = vsyncpa [#allocation4], 0  ;;  %s5825_s0 = inlined_call_operand.hbm [shape: f32[2,32,512], index: 0, kind: input, shape index: {}]   ;;  %s5826_s1 = inlined_call_operand.vmem [shape: f32[64,32], index: 1, kind: input, shape index: {}]   ;;  %s5827_s2 = inlined_call_operand.vmem [shape: f32[32,32], index: 2, kind: input, shape index: {}]   ;;  %s5828_s3 = inlined_call_operand.vmem [shape: f32[32,14], index: 3, kind: input, shape index: {}]   ;;  %s5829_s4 = inlined_call_operand.hbm [shape: f32[2,32,512], index: 4, kind: output, shape index: {}]  }
   0x1   :  { %11 = vsyncpa [#allocation4 + $0x1], 0 }
   0x2   :  { %12 = vsyncpa [#allocation5], 0 }
   0x3   :  { %14 = vsyncpa [#allocation5 + $0x1], 0  ;;  %s3383_s15 = smov 0   ;;  %s3385_s16 = smov 0  }
   0x4   :  { %s3387_s17 = smov 0   ;;  %s3389_s18 = smov 0  }
   0x5   :  { %s3391_s19 = smov 0   ;;  %s3393_s20 = smov 0  }
   0x6 LB: > { %s2848_s21 = sadd.s32 4294967295, %s3331_s20   ;;  %s2849_s22 = sadd.s32 4294967294, %s3331_s20   ;;  %s3331_s20 = sphi %s3393_s20, %s20_s20   ;;  %s3327_s19 = sphi %s3391_s19, %s5983_s19   ;;  %s3323_s18 = sphi %s3389_s18, %s5982_s18   ;;  %s3319_s17 = sphi %s3387_s17, %s5981_s17   ;;  %s3315_s16 = sphi %s3385_s16, %s5980_s16   ;;  %s3311_s15 = sphi %s3383_s15, %s5979_s15  }
   0x7   : > { %s32_s23 = sadd.s32 1, %s3327_s19  ;;  %s41_s24 = sadd.s32 1, %s3319_s17 }
   0x8   : > { %p34_p0 = scmp.ge.s32.totalorder %s32_s23, 2  ;;  %p48_p1 = scmp.ne.s32.totalorder %s3319_s17, %s3315_s16 }
   0x9   : > { %p49_p2 = scmp.eq.s32.totalorder %s3331_s20, 0  ;;  %p54_p3 = scmp.ne.s32.totalorder %s3315_s16, %s3311_s15 }
   0xa   : > { %s5985_s23 = smov (%p34_p0, %s32_s23), 0  ;;  %p55_p5 = scmp.eq.s32.totalorder %s2848_s21, 0 }
   0xb   : > { %p3424_p4 = por %p49_p2, %p48_p1  ;;  %s36_s26 = ssub.s32 %s3327_s19, %s5985_s23 }
   0xc   : > { %p143_p6 = scmp.eq.s32.totalorder %s2848_s21, 1  ;;  %p39_p7 = scmp.eq.s32.totalorder %s36_s26, 0 }
   0xd   : > { %p3430_p8 = por %p55_p5, %p54_p3  ;;  %p149_p10 = scmp.eq.s32.totalorder %s2849_s22, 1 }
   0xe   : > { %p3434_p9 = por %p143_p6, %p48_p1  ;;  %p2851_p12 = scmp.ge.s32.totalorder %s3331_s20, 2 }
   0xf   : > { %s3439_s29 = scalar_select %p39_p7, %s3319_s17, %s41_s24  }
  0x10   : > { %p3441_p11 = por %p149_p10, %p54_p3  ;;  %p2957_p13 = scmp.lt.s32.totalorder %s3331_s20, 2 }
  0x11   : > { %s178_s5 = sand.u32 1, %s3319_s17   ;;  %s2943_s7 = sshll.u32 %s3327_s19, 7 }
  0x12   : > { %s2852_s6 = sshll.u32 %s178_s5, 7  ;;  %s189_s10 = scalar_lea.hbm %s5825_s0, %s2943_s7 }
  0x13   : > { %s182_s11 = scalar_lea.vmem [#allocation3], %s2852_s6  ;;  %s190_s13 = sshll.u32 %s189_s10, 4  ;;  %s191_s13 = int_to_ptr.hbm [resolvable:$true] %s190_s13 }
  0x14   : > { %s192_s12 = sshll.u32 %s182_s11, 4  ;;  %p2950_p0 = pnand %p2957_p13, %p3424_p4  ;;  %s193_s12 = int_to_ptr.vmem [resolvable:$true] %s192_s12 }
  0x15   : > { %p2855_p1 = scmp.ge.s32.totalorder %s3331_s20, 1  ;;  %s179_s14 = scalar_lea.sflag [#allocation4], %s178_s5 }
  0x16   : > { %s3333_s21 = smov 512   ;;  %s3334_s22 = smov 32  }
  0x17   : > { %2952 = dma.hbm_to_vmem [thread:$0]  (!%p2950_p0), %s191_s13, 2048, %s193_s12, %s179_s14, %s3333_s21, %s3333_s21, %s3334_s22  }
  0x18   : > { %p200_p2 = scmp.lt.s32.totalorder %s3331_s20, 3 }
  0x1a   : > { %p201_p3 = pnand %p2855_p1, %p200_p2 }
  0x1c   : > { %204 = sbr.rel (%p201_p3) target bundleno = 1120 (0x460), region = 36 }
  0x21   : > { %s3457_s24 = sand.u32 1, %s3315_s16  }
  0x22   : > { %s2856_s26 = sshll.u32 %s3457_s24, 7  ;;  %s207_s6 = scalar_lea.sflag [#allocation4], %s3457_s24 }
  0x23   : > { %s3463_s25 = scalar_lea.vmem [#allocation3], %s2856_s26 }
  0x24   : > { %3302 = dma.done.wait (%p3430_p8), %s207_s6, 2048  }
  0x25   : > { %3304 = vsyncadd (%p3430_p8), %s207_s6, 4294965248  ;;  %v3335_v0 = vmov 0   ;;  %v3336_v1 = vmov 1   ;;  %v3472_v2 = vld [vmem:[%s5828_s3 + $0x10] sm:$0xff]  ;;  %v3477_v3 = vld [vmem:[%s5828_s3] sm:$0xff]  ;;  %vm518_vm12 = vcmask 261120  }
  0x26   : > { %3033 = vset.pattern.permute.xlu1 %v3335_v0  ;;  %3032 = vset.pattern.permute.xlu0 %v3335_v0  ;;  %v3485_v4 = vld [vmem:[%s5828_s3 + $0x18] sm:$0xff]  ;;  %v3490_v5 = vld [vmem:[%s5828_s3 + $0x8] sm:$0xff]  ;;  %v3498_v6 = vld [vmem:[%s3463_s25] sm:$0xff]  ;;  %s3346_s22 = smov 1   ;;  %s3347_s6 = smov 5  }
  0x27   : > { %3034 = vset.pattern.permute.xlu2 %v3336_v1  ;;  %454 = vperm.xlu1 %3033, %v3472_v2   ;;  %v3501_v7 = vld [vmem:[%s3463_s25 + $0x20] sm:$0xff]  ;;  %v3504_v8 = vld [vmem:[%s3463_s25 + $0x8] sm:$0xff]  ;;  %v294_v10 = vmul.f32 %v3498_v6, %v3498_v6  ;;  %v3518_v14 = vld [vmem:[%s3463_s25 + $0x10] sm:$0xff]  ;;  %s3348_s5 = smov 2   ;;  %s3349_s7 = smov 3  }
  0x28   : > { %444 = vperm.xlu0 %3032, %v3477_v3   ;;  %479 = vperm.xlu2 %3034, %v3477_v3   ;;  %v258_v9 = vadd.f32 %v3501_v7, %v3498_v6  ;;  %v298_v11 = vmul.f32 %v3501_v7, %v3501_v7  ;;  %v3513_v12 = vld [vmem:[%s3463_s25 + $0x28] sm:$0xff]  ;;  %v295_v13 = vmul.f32 %v3504_v8, %v3504_v8  ;;  %v3521_v15 = vld [vmem:[%s3463_s25 + $0x30] sm:$0xff]  ;;  %v3524_v16 = vld [vmem:[%s3463_s25 + $0x40] sm:$0xff]  ;;  %s3350_s8 = smov 4   ;;  %s3351_s9 = smov 7  }
  0x29   : > { %v3527_v17 = vld [vmem:[%s3463_s25 + $0x48] sm:$0xff]  ;;  %v267_v18 = vadd.f32 %v3513_v12, %v3504_v8  ;;  %v299_v19 = vmul.f32 %v3513_v12, %v3513_v12  ;;  %v276_v20 = vadd.f32 %v3521_v15, %v3518_v14  ;;  %v302_v22 = vmul.f32 %v3524_v16, %v3524_v16  ;;  %v3541_v25 = vld [vmem:[%s3463_s25 + $0x60] sm:$0xff]  ;;  %v3547_v29 = vld [vmem:[%s3463_s25 + $0x50] sm:$0xff]  ;;  %s3352_s27 = smov 6   ;;  %s2744_s14 = scalar_lea.sflag [#allocation5], %s3457_s24 }
  0x2a   : > { %v259_v21 = vadd.f32 %v258_v9, %v3524_v16  ;;  %v310_v23 = vadd.f32 %v298_v11, %v294_v10  ;;  %v296_v24 = vmul.f32 %v3518_v14, %v3518_v14  ;;  %v303_v27 = vmul.f32 %v3527_v17, %v3527_v17  ;;  %v3552_v31 = vld [vmem:[%s3463_s25 + $0x68] sm:$0xff]  ;;  %v3555_v32 = vld [vmem:[%s3463_s25 + $0x18] sm:$0xff]  ;;  %v3573_v44 = vld [vmem:[%s3463_s25 + $0x70] sm:$0xff] }
  0x2b   : > { %v268_v26 = vadd.f32 %v267_v18, %v3527_v17  ;;  %v319_v28 = vadd.f32 %v299_v19, %v295_v13  ;;  %v300_v30 = vmul.f32 %v3521_v15, %v3521_v15  ;;  %v3558_v33 = vld [vmem:[%s3463_s25 + $0x38] sm:$0xff]  ;;  %v306_v35 = vmul.f32 %v3541_v25, %v3541_v25 }
  0x2c   : > { %v260_v34 = vadd.f32 %v259_v21, %v3541_v25  ;;  %v311_v36 = vadd.f32 %v310_v23, %v302_v22  ;;  %v277_v37 = vadd.f32 %v276_v20, %v3547_v29  ;;  %v304_v38 = vmul.f32 %v3547_v29, %v3547_v29  ;;  %v3567_v40 = vld [vmem:[%s3463_s25 + $0x58] sm:$0xff] }
  0x2d   : > { %v328_v39 = vadd.f32 %v300_v30, %v296_v24  ;;  %v269_v41 = vadd.f32 %v268_v26, %v3552_v31  ;;  %v307_v42 = vmul.f32 %v3552_v31, %v3552_v31  ;;  %v320_v43 = vadd.f32 %v319_v28, %v303_v27  ;;  %v3578_v48 = vld [vmem:[%s3463_s25 + $0x78] sm:$0xff] }
  0x2e   : > { %v285_v45 = vadd.f32 %v3558_v33, %v3555_v32  ;;  %v261_v46 = vrot.slane %v260_v34, 4  ;;  %v312_v47 = vadd.f32 %v311_v36, %v306_v35  ;;  %v278_v50 = vadd.f32 %v277_v37, %v3573_v44 }
  0x2f   : > { %459 = vperm.xlu1 %3033, %v3485_v4   ;;  %v308_v51 = vmul.f32 %v3573_v44, %v3573_v44  ;;  %v329_v52 = vadd.f32 %v328_v39, %v304_v38  ;;  %v270_v53 = vrot.slane %v269_v41, 4  ;;  %v321_v54 = vadd.f32 %v320_v43, %v307_v42 }
  0x30   : > { %449 = vperm.xlu0 %3032, %v3490_v5   ;;  %483 = vperm.xlu2 %3034, %v3490_v5   ;;  %v286_v49 = vadd.f32 %v285_v45, %v3567_v40  ;;  %v297_v56 = vmul.f32 %v3555_v32, %v3555_v32  ;;  %v301_v57 = vmul.f32 %v3558_v33, %v3558_v33  ;;  %v313_v59 = vrot.slane %v312_v47, 4 }
  0x31   : > { %v262_v58 = vadd.f32 %v261_v46, %v260_v34  ;;  %v279_v60 = vrot.slane %v278_v50, 4  ;;  %v330_v61 = vadd.f32 %v329_v52, %v308_v51  ;;  %v305_v62 = vmul.f32 %v3567_v40, %v3567_v40 }
  0x32   : > { %v287_v55 = vadd.f32 %v286_v49, %v3578_v48  ;;  %v271_v63 = vadd.f32 %v270_v53, %v269_v41  ;;  %v322_v0 = vrot.slane %v321_v54, 4  ;;  %v309_v9 = vmul.f32 %v3578_v48, %v3578_v48 }
  0x33   : > { %v337_v10 = vadd.f32 %v301_v57, %v297_v56  ;;  %v263_v11 = vrot.slane %v262_v58, 2  ;;  %v314_v13 = vadd.f32 %v313_v59, %v312_v47  ;;  %v280_v18 = vadd.f32 %v279_v60, %v278_v50 }
  0x34   : > { %v331_v19 = vrot.slane %v330_v61, 4  ;;  %v272_v21 = vrot.slane %v271_v63, 2  ;;  %v323_v22 = vadd.f32 %v322_v0, %v321_v54 }
  0x35   : > { %v338_v20 = vadd.f32 %v337_v10, %v305_v62  ;;  %v264_v26 = vadd.f32 %v263_v11, %v262_v58  ;;  %v315_v27 = vrot.slane %v314_v13, 2  ;;  %v281_v28 = vrot.slane %v280_v18, 2 }
  0x36   : > { %v332_v30 = vadd.f32 %v331_v19, %v330_v61  ;;  %v273_v35 = vadd.f32 %v272_v21, %v271_v63  ;;  %v324_v36 = vrot.slane %v323_v22, 2 }
  0x37   : > { %3036 = vset.pattern.permute.xlu1 %v3336_v1  ;;  %v339_v24 = vadd.f32 %v338_v20, %v309_v9  ;;  %v265_v39 = vrot.slane %v264_v26, 1  ;;  %v316_v41 = vadd.f32 %v315_v27, %v314_v13  ;;  %v282_v42 = vadd.f32 %v281_v28, %v280_v18 }
  0x38   : > { %3035 = vset.pattern.permute.xlu0 %v3336_v1  ;;  %491 = vperm.xlu1 %3036, %v3485_v4   ;;  %v288_v1 = vrot.slane %v287_v55, 4  ;;  %v333_v43 = vrot.slane %v332_v30, 2  ;;  %v274_v45 = vrot.slane %v273_v35, 1  ;;  %v325_v46 = vadd.f32 %v324_v36, %v323_v22 }
  0x39   : > { %487 = vperm.xlu0 %3035, %v3472_v2   ;;  %v340_v34 = vrot.slane %v339_v24, 4  ;;  %v266_v50 = vadd.f32 %v265_v39, %v264_v26  ;;  %v317_v51 = vrot.slane %v316_v41, 1  ;;  %v283_v52 = vrot.slane %v282_v42, 1 }
  0x3a   : > { %v289_v23 = vadd.f32 %v288_v1, %v287_v55  ;;  %v334_v53 = vadd.f32 %v333_v43, %v332_v30  ;;  %v275_v54 = vadd.f32 %v274_v45, %v273_v35  ;;  %v326_v55 = vrot.slane %v325_v46, 1 }
  0x3b   : > { %v341_v38 = vadd.f32 %v340_v34, %v339_v24  ;;  %v318_v58 = vadd.f32 %v317_v51, %v316_v41  ;;  %v3593_v59 = vmul.f32 0.03125, %v266_v50  ;;  %v284_v60 = vadd.f32 %v283_v52, %v282_v42 }
  0x3c   : > { %v290_v37 = vrot.slane %v289_v23, 2  ;;  %v335_v61 = vrot.slane %v334_v53, 1  ;;  %v327_v62 = vadd.f32 %v326_v55, %v325_v46  ;;  %v3595_v63 = vmul.f32 0.03125, %v275_v54 }
  0x3d   : > { %v342_v49 = vrot.slane %v341_v38, 2  ;;  %v350_v9 = vmul.f32 0.03125, %v318_v58  ;;  %v354_v10 = vmul.f32 %v3593_v59, %v3593_v59  ;;  %v3599_v13 = vmul.f32 0.03125, %v284_v60 }
  0x3e   : > { %v291_v47 = vadd.f32 %v290_v37, %v289_v23  ;;  %v336_v11 = vadd.f32 %v335_v61, %v334_v53  ;;  %v351_v18 = vmul.f32 0.03125, %v327_v62  ;;  %v355_v19 = vmul.f32 %v3595_v63, %v3595_v63 }
  0x3f   : > { %v343_v57 = vadd.f32 %v342_v49, %v341_v38  ;;  %v358_v22 = vsub.f32 %v350_v9, %v354_v10  ;;  %v356_v24 = vmul.f32 %v3599_v13, %v3599_v13 }
  0x40   : > { %v292_v56 = vrot.slane %v291_v47, 1  ;;  %v352_v23 = vmul.f32 0.03125, %v336_v11  ;;  %v359_v26 = vsub.f32 %v351_v18, %v355_v19 }
  0x41   : > { %v344_v1 = vrot.slane %v343_v57, 1  ;;  %v362_v30 = vmax.f32 %v358_v22, 0.0  ;;  %v374_v22 = vsub.f32 %v3524_v16, %v3593_v59  ;;  %v366_v16 = vsub.f32 %v3498_v6, %v3593_v59 }
  0x42   : > { %v293_v0 = vadd.f32 %v292_v56, %v291_v47  ;;  %v360_v34 = vsub.f32 %v352_v23, %v356_v24  ;;  %v363_v35 = vmax.f32 %v359_v26, 0.0  ;;  %v375_v26 = vsub.f32 %v3527_v17, %v3595_v63 }
  0x43   : > { %v345_v20 = vadd.f32 %v344_v1, %v343_v57  ;;  %v382_v37 = vadd.f32 1.1920929e-07, %v362_v30 }
  0x44   : > { %v3603_v21 = vmul.f32 0.03125, %v293_v0  ;;  %v364_v38 = vmax.f32 %v360_v34, 0.0  ;;  %v383_v39 = vadd.f32 1.1920929e-07, %v363_v35  ;;  %v376_v34 = vsub.f32 %v3547_v29, %v3599_v13 }
  0x45   : > { %v353_v27 = vmul.f32 0.03125, %v345_v20  ;;  %3071 = vrsqrt.f32 %v382_v37  ;;  %vm392_vm0 = vweird.f32 %v382_v37  ;;  %v378_v35 = vsub.f32 %v3541_v25, %v3593_v59 }
  0x46   : > { %v357_v28 = vmul.f32 %v3603_v21, %v3603_v21  ;;  %v384_v42 = vadd.f32 1.1920929e-07, %v364_v38  ;;  %3073 = vrsqrt.f32 %v383_v39  ;;  %vm402_vm3 = vweird.f32 %v383_v39 }
  0x47   : > { %v379_v29 = vsub.f32 %v3552_v31, %v3595_v63  ;;  %v380_v25 = vsub.f32 %v3573_v44, %v3599_v13  ;;  %v381_v6 = vsub.f32 %v3578_v48, %v3603_v21  ;;  %v372_v44 = vsub.f32 %v3521_v15, %v3599_v13 }
  0x48   : > { %v361_v36 = vsub.f32 %v353_v27, %v357_v28  ;;  %3075 = vrsqrt.f32 %v384_v42  ;;  %vm412_vm5 = vweird.f32 %v384_v42  ;;  %v369_v48 = vsub.f32 %v3555_v32, %v3603_v21 }
  0x4a   : > { %v365_v41 = vmax.f32 %v361_v36, 0.0  ;;  %v367_v36 = vsub.f32 %v3504_v8, %v3595_v63 }
  0x4b   : > { %v3072_v45 = vpop.eup %3071 }
  0x4c   : > { %v385_v43 = vadd.f32 1.1920929e-07, %v365_v41  ;;  %v3074_v46 = vpop.eup %3073  ;;  %v387_v47 = vmul.f32 %v3072_v45, %v382_v37  ;;  %vm393_vm1 = vweird.f32 %v3072_v45  ;;  %v368_v37 = vsub.f32 %v3518_v14, %v3599_v13 }
  0x4d   : > { %v397_v50 = vmul.f32 %v3074_v46, %v383_v39  ;;  %vm394_vm2 = vmor %vm392_vm0, %vm393_vm1  ;;  %vm403_vm4 = vweird.f32 %v3074_v46  ;;  %v377_v14 = vsub.f32 %v3567_v40, %v3603_v21  ;;  %v3337_v13 = vmov 2  }
  0x4e   : > { %3077 = vrsqrt.f32 %v385_v43  ;;  %v3076_v49 = vpop.eup %3075  ;;  %v388_v52 = vmul.f32 %v3072_v45, %v387_v47  ;;  %vm404_vm7 = vmor %vm402_vm3, %vm403_vm4  ;;  %vm422_vm8 = vweird.f32 %v385_v43  ;;  %3038 = vset.pattern.permute.xlu1 %v3337_v13  ;;  %3037 = vset.pattern.permute.xlu2 %v3337_v13 }
  0x4f   : > { %v407_v53 = vmul.f32 %v3076_v49, %v384_v42  ;;  %v398_v54 = vmul.f32 %v3074_v46, %v397_v50  ;;  %vm413_vm6 = vweird.f32 %v3076_v49  ;;  %v370_v42 = vsub.f32 %v3501_v7, %v3593_v59  ;;  %712 = vperm.xlu1 %3038, %v3490_v5   ;;  %3039 = vset.pattern.permute.xlu0 %v3337_v13 }
  0x50   : > { %v389_v56 = vmul.f32 0.5, %v388_v52  ;;  %vm414_vm10 = vmor %vm412_vm5, %vm413_vm6  ;;  %708 = vperm.xlu2 %3037, %v3477_v3   ;;  %720 = vperm.xlu0 %3039, %v3485_v4  }
  0x51   : > { %v408_v57 = vmul.f32 %v3076_v49, %v407_v53  ;;  %v399_v58 = vmul.f32 0.5, %v398_v54 }
  0x52   : > { %v390_v61 = vsub.f32 1.5, %v389_v56 }
  0x53   : > { %v409_v62 = vmul.f32 0.5, %v408_v57  ;;  %v400_v0 = vsub.f32 1.5, %v399_v58 }
  0x54   : > { %v3078_v51 = vpop.eup %3077  ;;  %v391_v9 = vmul.f32 %v3072_v45, %v390_v61 }
  0x55   : > { %v417_v55 = vmul.f32 %v3078_v51, %v385_v43  ;;  %v410_v18 = vsub.f32 1.5, %v409_v62  ;;  %v401_v19 = vmul.f32 %v3074_v46, %v400_v0  ;;  %vm423_vm9 = vweird.f32 %v3078_v51 }
  0x56   : > { %v395_v23 = vsel %vm394_vm2, %v3072_v45, %v391_v9  ;;  %vm424_vm11 = vmor %vm422_vm8, %vm423_vm9  ;;  %v371_v43 = vsub.f32 %v3513_v12, %v3595_v63  ;;  %v373_v45 = vsub.f32 %v3558_v33, %v3603_v21 }
  0x57   : > { %v418_v60 = vmul.f32 %v3078_v51, %v417_v55  ;;  %v411_v24 = vmul.f32 %v3076_v49, %v410_v18  ;;  %v405_v27 = vsel %vm404_vm7, %v3074_v46, %v401_v19  ;;  %v434_v30 = vmul.f32 %v395_v23, %v374_v22 }
  0x58   : > { %v435_v8 = vmul.f32 %v405_v27, %v375_v26  ;;  %v438_v46 = vmul.f32 %v395_v23, %v378_v35  ;;  %v427_v40 = vmul.f32 %v405_v27, %v367_v36  ;;  %v439_v50 = vmul.f32 %v405_v27, %v379_v29  ;;  %716 = vperm.xlu2 %3037, %v3472_v2  }
  0x59   : > { %v419_v1 = vmul.f32 0.5, %v418_v60  ;;  %v415_v39 = vsel %vm414_vm10, %v3076_v49, %v411_v24  ;;  %v426_v49 = vmul.f32 %v395_v23, %v366_v16  ;;  %v430_v12 = vmul.f32 %v395_v23, %v370_v42 }
  0x5a   : > { %v436_v47 = vmul.f32 %v415_v39, %v376_v34  ;;  %v440_v52 = vmul.f32 %v415_v39, %v380_v25  ;;  %v428_v59 = vmul.f32 %v415_v39, %v368_v37  ;;  %v431_v63 = vmul.f32 %v405_v27, %v371_v43  ;;  %v510_v43 = vld [vmem:[%s5826_s1] sm:$0xff] }
  0x5b   : > { %v420_v20 = vsub.f32 1.5, %v419_v1 }
  0x5d   : > { %v421_v28 = vmul.f32 %v3078_v51, %v420_v20 }
  0x5f   : > { %v425_v31 = vsel %vm424_vm11, %v3078_v51, %v421_v28  ;;  %v432_v51 = vmul.f32 %v415_v39, %v372_v44  ;;  %v511_v44 = vld [vmem:[%s5826_s1 + $0x8] sm:$0xff] }
  0x60   : > { %v441_v7 = vmul.f32 %v425_v31, %v381_v6  ;;  %v437_v53 = vmul.f32 %v425_v31, %v377_v14  ;;  %v433_v54 = vmul.f32 %v425_v31, %v373_v45  ;;  %v429_v15 = vmul.f32 %v425_v31, %v369_v48  ;;  %v512_v45 = vld [vmem:[%s5826_s1 + $0x10] sm:$0xff]  ;;  %v513_v48 = vld [vmem:[%s5826_s1 + $0x18] sm:$0xff] }
  0x61   : > { %v3338_v31 = vmov 3  }
  0x62   : > { %3040 = vset.pattern.permute.xlu1 %v3338_v31  ;;  %3041 = vset.pattern.permute.xlu2 %v3338_v31 }
  0x63   : > { %740 = vperm.xlu1 %3040, %v3477_v3   ;;  %744 = vperm.xlu2 %3041, %v3490_v5  }
  0x6b   : > { %748 = vperm.xlu1 %3040, %v3472_v2   ;;  %752 = vperm.xlu2 %3041, %v3485_v4  }
  0x82   : > { %v3637_v41 = vpop.permute.xlu2 %479 }
  0x83   : > { %5869 = vst [vmem:[#allocation13_spill] sm:$0xff] %v3637_v41 }
  0x8a   : > { %v3672_v22 = vpop.permute.xlu2 %483 }
  0x8b   : > { %5872 = vst [vmem:[#allocation16_spill] sm:$0xff] %v3672_v22 }
  0x99   : > { %v3609_v10 = vpop.permute.xlu1 %454 }
  0x9a   : > { %5865 = vst [vmem:[#allocation9_spill] sm:$0xff] %v3609_v10  ;;  %v3611_v11 = vpop.permute.xlu0 %444  ;;  %v470_v32 = vmul.f32 %v3609_v10, %v434_v30  ;;  %v471_v21 = vmul.f32 %v3609_v10, %v435_v8  ;;  %v472_v61 = vmul.f32 %v3609_v10, %v436_v47  ;;  %v473_v62 = vmul.f32 %v3609_v10, %v437_v53  ;;  %v514_v47 = vld [vmem:[%s5826_s1 + $0x20] sm:$0xff] }
  0x9b   : > { %5866 = vst [vmem:[#allocation10_spill] sm:$0xff] %v3611_v11  ;;  %v462_v26 = vmul.f32 %v3611_v11, %v426_v49  ;;  %v463_v27 = vmul.f32 %v3611_v11, %v427_v40  ;;  %v464_v34 = vmul.f32 %v3611_v11, %v428_v59  ;;  %v465_v36 = vmul.f32 %v3611_v11, %v429_v15  ;;  %v515_v40 = vld [vmem:[%s5826_s1 + $0x28] sm:$0xff] }
  0x9c   : > { %v3340_v49 = vmov 12   ;;  %v3342_v59 = vmov 10   ;;  %v3343_v53 = vmov 9  }
  0x9d   : > { %v494_v6 = vadd.f32 %v3637_v41, %v462_v26  ;;  %v495_v8 = vadd.f32 %v3637_v41, %v463_v27  ;;  %v496_v14 = vadd.f32 %v3637_v41, %v464_v34  ;;  %v497_v42 = vadd.f32 %v3637_v41, %v465_v36 }
  0xa1   : > { %v3627_v17 = vpop.permute.xlu1 %459 }
  0xa2   : > { %5867 = vst [vmem:[#allocation11_spill] sm:$0xff] %v3627_v17  ;;  %v3629_v38 = vpop.permute.xlu0 %449  ;;  %v474_v33 = vmul.f32 %v3627_v17, %v438_v46  ;;  %v475_v55 = vmul.f32 %v3627_v17, %v439_v50  ;;  %v476_v56 = vmul.f32 %v3627_v17, %v440_v52  ;;  %v477_v57 = vmul.f32 %v3627_v17, %v441_v7  ;;  %v516_v52 = vld [vmem:[%s5826_s1 + $0x30] sm:$0xff]  ;;  %v517_v7 = vld [vmem:[%s5826_s1 + $0x38] sm:$0xff] }
  0xa3   : > { %5868 = vst [vmem:[#allocation12_spill] sm:$0xff] %v3629_v38  ;;  %v466_v0 = vmul.f32 %v3629_v38, %v430_v12  ;;  %v467_v1 = vmul.f32 %v3629_v38, %v431_v63  ;;  %v468_v23 = vmul.f32 %v3629_v38, %v432_v51  ;;  %v469_v24 = vmul.f32 %v3629_v38, %v433_v54 }
  0xa4   : > { %v3339_v46 = vmov 13   ;;  %v3341_v50 = vmov 11  }
  0xa5   : > { %v498_v37 = vadd.f32 %v3672_v22, %v466_v0  ;;  %v499_v29 = vadd.f32 %v3672_v22, %v467_v1  ;;  %v500_v25 = vadd.f32 %v3672_v22, %v468_v23  ;;  %v501_v39 = vadd.f32 %v3672_v22, %v469_v24  ;;  %3042 = vset.pattern.permute.xlu0 %v3339_v46 }
  0xa6   : > { %3043 = vset.pattern.permute.xlu1 %v3339_v46  ;;  %1114 = vperm.xlu0 %3042, %v3477_v3  }
  0xa7   : > { %1119 = vperm.xlu1 %3043, %v3490_v5   ;;  %3044 = vset.pattern.permute.xlu2 %v3339_v46  ;;  %v3345_v46 = vmov 7  }
  0xa8   : > { %1124 = vperm.xlu2 %3044, %v3472_v2  }
  0xaa   : > { %v3660_v58 = vpop.permute.xlu1 %491 }
  0xab   : > { %5870 = vst [vmem:[#allocation14_spill] sm:$0xff] %v3660_v58  ;;  %v3662_v60 = vpop.permute.xlu0 %487  ;;  %v506_v9 = vadd.f32 %v3660_v58, %v474_v33  ;;  %v507_v18 = vadd.f32 %v3660_v58, %v475_v55  ;;  %v508_v19 = vadd.f32 %v3660_v58, %v476_v56  ;;  %v509_v20 = vadd.f32 %v3660_v58, %v477_v57 }
  0xac   : > { %5871 = vst [vmem:[#allocation15_spill] sm:$0xff] %v3662_v60  ;;  %v502_v28 = vadd.f32 %v3662_v60, %v470_v32  ;;  %v503_v30 = vadd.f32 %v3662_v60, %v471_v21  ;;  %v504_v35 = vadd.f32 %v3662_v60, %v472_v61  ;;  %v505_v16 = vadd.f32 %v3662_v60, %v473_v62 }
  0xad   : > { %555 = vmatpush.msra.mxu0 %v506_v9  ;;  %596 = vmatpush.msra.mxu1 %v507_v18 }
  0xae   : > { %637 = vmatpush.msra.mxu2 %v508_v19  ;;  %678 = vmatpush.msra.mxu3 %v509_v20  ;;  %v3344_v19 = vmov 8  }
  0xaf   : > { %556 = vmatpush.msra.mxu0 %v502_v28  ;;  %597 = vmatpush.msra.mxu1 %v503_v30 }
  0xb0   : > { %638 = vmatpush.msra.mxu2 %v504_v35  ;;  %679 = vmatpush.msra.mxu3 %v505_v16 }
  0xb1   : > { %557 = vmatpush.msra.mxu0 %v498_v37  ;;  %598 = vmatpush.msra.mxu1 %v499_v29  ;;  %v3812_v37 = vpop.permute.xlu2 %708 }
  0xb2   : > { %639 = vmatpush.msra.mxu2 %v500_v25  ;;  %680 = vmatpush.msra.mxu3 %v501_v39 }
  0xb3   : > { %558 = vmatpush.msra.mxu0 %v494_v6  ;;  %599 = vmatpush.msra.mxu1 %v495_v8 }
  0xb4   : > { %640 = vmatpush.msra.mxu2 %v496_v14  ;;  %681 = vmatpush.msra.mxu3 %v497_v42 }
  0xb5   : > { %2858 = vmatmul.msk.f32.vlgmr.msra.gmra.mxu0 %vm518_vm12, %v510_v43  ;;  %2866 = vmatmul.msk.f32.vlgmr.msra.gmra.mxu1 %vm518_vm12, %v510_v43 }
  0xb6   : > { %2874 = vmatmul.msk.f32.vlgmr.msra.gmra.mxu2 %vm518_vm12, %v510_v43  ;;  %2882 = vmatmul.msk.f32.vlgmr.msra.gmra.mxu3 %vm518_vm12, %v510_v43 }
  0xb7   : > { %1129 = vperm.xlu1 %3043, %v3485_v4   ;;  %3045 = vset.pattern.permute.xlu0 %v3340_v49 }
  0xb8   : > { %1218 = vperm.xlu0 %3045, %v3477_v3   ;;  %3047 = vset.pattern.permute.xlu2 %v3340_v49 }
  0xb9   : > { %1226 = vperm.xlu2 %3047, %v3472_v2   ;;  %v3815_v31 = vpop.permute.xlu2 %716 }
  0xbd   : > { %2859 = vmatmul.msk.f32.gmra.mxu0 %vm518_vm12, %v511_v44  ;;  %2867 = vmatmul.msk.f32.gmra.mxu1 %vm518_vm12, %v511_v44 }
  0xbe   : > { %2875 = vmatmul.msk.f32.gmra.mxu2 %vm518_vm12, %v511_v44  ;;  %2883 = vmatmul.msk.f32.gmra.mxu3 %vm518_vm12, %v511_v44 }
  0xbf   : > { %3046 = vset.pattern.permute.xlu1 %v3340_v49 }
  0xc0   : > { %1222 = vperm.xlu1 %3046, %v3490_v5   ;;  %3048 = vset.pattern.permute.xlu0 %v3341_v50 }
  0xc1   : > { %1335 = vperm.xlu0 %3048, %v3477_v3   ;;  %3050 = vset.pattern.permute.xlu2 %v3341_v50  ;;  %v3792_v56 = vpop.permute.xlu1 %712 }
  0xc2   : > { %1343 = vperm.xlu2 %3050, %v3472_v2   ;;  %v721_v57 = vpop.permute.xlu0 %720 }
  0xc5   : > { %2860 = vmatmul.msk.f32.gmra.mxu0 %vm518_vm12, %v512_v45  ;;  %2868 = vmatmul.msk.f32.gmra.mxu1 %vm518_vm12, %v512_v45 }
  0xc6   : > { %2876 = vmatmul.msk.f32.gmra.mxu2 %vm518_vm12, %v512_v45  ;;  %2884 = vmatmul.msk.f32.gmra.mxu3 %vm518_vm12, %v512_v45 }
  0xc8   : > { %1230 = vperm.xlu1 %3046, %v3485_v4  }
  0xc9   : > { %3051 = vset.pattern.permute.xlu0 %v3342_v59 }
  0xca   : > { %3053 = vset.pattern.permute.xlu2 %v3342_v59  ;;  %1452 = vperm.xlu0 %3051, %v3477_v3  }
  0xcb   : > { %1460 = vperm.xlu2 %3053, %v3472_v2  }
  0xcd   : > { %2861 = vmatmul.msk.f32.gmra.mxu0 %vm518_vm12, %v513_v48  ;;  %2869 = vmatmul.msk.f32.gmra.mxu1 %vm518_vm12, %v513_v48 }
  0xce   : > { %2877 = vmatmul.msk.f32.gmra.mxu2 %vm518_vm12, %v513_v48  ;;  %2885 = vmatmul.msk.f32.gmra.mxu3 %vm518_vm12, %v513_v48 }
  0xd0   : > { %3049 = vset.pattern.permute.xlu1 %v3341_v50  ;;  %v3822_v50 = vpop.permute.xlu2 %744 }
  0xd1   : > { %1339 = vperm.xlu1 %3049, %v3490_v5  }
  0xd2   : > { %3057 = vset.pattern.permute.xlu0 %v3344_v19 }
  0xd3   : > { %3055 = vset.pattern.permute.xlu2 %v3343_v53  ;;  %1690 = vperm.xlu0 %3057, %v3490_v5  }
  0xd4   : > { %1573 = vperm.xlu2 %3055, %v3490_v5  }
  0xd5   : > { %2862 = vmatmul.msk.f32.gmra.mxu0 %vm518_vm12, %v514_v47  ;;  %2870 = vmatmul.msk.f32.gmra.mxu1 %vm518_vm12, %v514_v47  ;;  %v741_v20 = vpop.permute.xlu1 %740 }
  0xd6   : > { %2878 = vmatmul.msk.f32.gmra.mxu2 %vm518_vm12, %v514_v47  ;;  %2886 = vmatmul.msk.f32.gmra.mxu3 %vm518_vm12, %v514_v47 }
  0xd9   : > { %1347 = vperm.xlu1 %3049, %v3485_v4  }
  0xdb   : > { %3058 = vset.pattern.permute.xlu0 %v3343_v53 }
  0xdc   : > { %3056 = vset.pattern.permute.xlu2 %v3344_v19  ;;  %1581 = vperm.xlu0 %3058, %v3485_v4  }
  0xdd   : > { %2863 = vmatmul.msk.f32.gmra.mxu0 %vm518_vm12, %v515_v40  ;;  %2871 = vmatmul.msk.f32.gmra.mxu1 %vm518_vm12, %v515_v40 }
  0xde   : > { %2879 = vmatmul.msk.f32.gmra.mxu2 %vm518_vm12, %v515_v40  ;;  %2887 = vmatmul.msk.f32.gmra.mxu3 %vm518_vm12, %v515_v40 }
  0xdf   : > { %1686 = vperm.xlu2 %3056, %v3477_v3  }
  0xe1   : > { %3052 = vset.pattern.permute.xlu1 %v3342_v59 }
  0xe2   : > { %1456 = vperm.xlu1 %3052, %v3490_v5  }
  0xe4   : > { %3063 = vset.pattern.permute.xlu0 %v3345_v46 }
  0xe5   : > { %2864 = vmatmul.msk.f32.gmra.mxu0 %vm518_vm12, %v516_v52  ;;  %2872 = vmatmul.msk.f32.gmra.mxu1 %vm518_vm12, %v516_v52 }
  0xe6   : > { %2880 = vmatmul.msk.f32.gmra.mxu2 %vm518_vm12, %v516_v52  ;;  %2888 = vmatmul.msk.f32.gmra.mxu3 %vm518_vm12, %v516_v52 }
  0xe7   : > { %3060 = vset.pattern.permute.xlu2 %v3345_v46 }
  0xe8   : > { %1803 = vperm.xlu2 %3060, %v3477_v3  }
  0xea   : > { %1464 = vperm.xlu1 %3052, %v3485_v4  }
  0xed   : > { %2865 = vmatmul.msk.f32.gmra.mxu0 %vm518_vm12, %v517_v7  ;;  %2873 = vmatmul.msk.f32.gmra.mxu1 %vm518_vm12, %v517_v7 }
  0xee   : > { %2881 = vmatmul.msk.f32.gmra.mxu2 %vm518_vm12, %v517_v7  ;;  %2889 = vmatmul.msk.f32.gmra.mxu3 %vm518_vm12, %v517_v7 }
  0xf0   : > { %3062 = vset.pattern.permute.xlu2 %v3344_v19 }
  0xf2   : > { %3054 = vset.pattern.permute.xlu1 %v3343_v53 }
  0xf3   : > { %1569 = vperm.xlu1 %3054, %v3477_v3  }
  0xfb   : > { %1577 = vperm.xlu1 %3054, %v3472_v2  }
 0x103   : > { %3059 = vset.pattern.permute.xlu1 %v3344_v19 }
 0x104   : > { %1694 = vperm.xlu1 %3059, %v3472_v2  }
 0x10c   : > { %3061 = vset.pattern.permute.xlu1 %v3345_v46 }
 0x10d   : > { %1807 = vperm.xlu1 %3061, %v3490_v5  }
 0x132   : > { %v3771_v12 = vpop.f32.mrf.mxu0  ;;  %v3773_v63 = vpop.f32.mrf.mxu1 }
 0x139   : > { %v3776_v51 = vpop.f32.mrf.mxu2  ;;  %v3778_v54 = vpop.f32.mrf.mxu3 }
 0x13a   : > { %v3780_v15 = vpop.f32.mrf.mxu0  ;;  %v3782_v13 = vpop.f32.mrf.mxu1 }
 0x141   : > { %v3784_v33 = vpop.f32.mrf.mxu2  ;;  %v3786_v32 = vpop.f32.mrf.mxu3 }
 0x142   : > { %v3788_v21 = vpop.f32.mrf.mxu0  ;;  %v3790_v55 = vpop.f32.mrf.mxu1 }
 0x149   : > { %v3794_v61 = vpop.f32.mrf.mxu2  ;;  %v3796_v62 = vpop.f32.mrf.mxu3 }
 0x14a   : > { %v569_v0 = vpop.f32.mrf.mxu0  ;;  %v610_v1 = vpop.f32.mrf.mxu1 }
 0x14b   : > { %v3798_v9 = vadd.f32 %v721_v57, %v569_v0  ;;  %v3800_v18 = vadd.f32 %v721_v57, %v610_v1 }
 0x151   : > { %v651_v23 = vpop.f32.mrf.mxu2  ;;  %v692_v24 = vpop.f32.mrf.mxu3 }
 0x152   : > { %v3808_v26 = vadd.f32 %v721_v57, %v651_v23  ;;  %v3810_v27 = vadd.f32 %v721_v57, %v692_v24  ;;  %v572_v28 = vpop.f32.mrf.mxu0  ;;  %v613_v30 = vpop.f32.mrf.mxu1  ;;  %v723_v57 = vadd.f32 %v3812_v37, %v3771_v12 }
 0x153   : > { %v755_v34 = vadd.f32 %v741_v20, %v572_v28  ;;  %v756_v35 = vadd.f32 %v741_v20, %v613_v30 }
 0x155   : > { %v2890_v16 = vmul.f32 -1.442695, %v755_v34  ;;  %v2891_v36 = vmul.f32 -1.442695, %v756_v35  ;;  %v724_v35 = vadd.f32 %v3812_v37, %v3773_v63 }
 0x157   : > { %3079 = vpow2.f32 %v2890_v16 }
 0x158   : > { %3081 = vpow2.f32 %v2891_v36 }
 0x159   : > { %v654_v2 = vpop.f32.mrf.mxu2  ;;  %v695_v29 = vpop.f32.mrf.mxu3 }
 0x15a   : > { %v757_v25 = vadd.f32 %v741_v20, %v654_v2  ;;  %v758_v39 = vadd.f32 %v741_v20, %v695_v29  ;;  %v575_v52 = vpop.f32.mrf.mxu0  ;;  %v616_v3 = vpop.f32.mrf.mxu1 }
 0x15b   : > { %v759_v5 = vadd.f32 %v3822_v50, %v575_v52  ;;  %v760_v12 = vadd.f32 %v3822_v50, %v616_v3 }
 0x15c   : > { %v2892_v6 = vmul.f32 -1.442695, %v757_v25  ;;  %v2893_v8 = vmul.f32 -1.442695, %v758_v39 }
 0x15d   : > { %v3080_v14 = vpop.eup %3079  ;;  %v2895_v52 = vmul.f32 -1.442695, %v760_v12 }
 0x15e   : > { %v3082_v42 = vpop.eup %3081  ;;  %v819_v43 = vadd.f32 1.0, %v3080_v14  ;;  %3083 = vpow2.f32 %v2892_v6 }
 0x15f   : > { %v820_v44 = vadd.f32 1.0, %v3082_v42  ;;  %3085 = vpow2.f32 %v2893_v8  ;;  %v2894_v8 = vmul.f32 -1.442695, %v759_v5  ;;  %v3856_v5 = vpop.permute.xlu1 %748 }
 0x160   : > { %3087 = vrcp.f32 %v819_v43  ;;  %v846_v0 = vand.u32 2147483648, %v819_v43  ;;  %v844_v23 = vand.u32 2147483647, %v819_v43  ;;  %vm840_vm15 = vweird.f32 %v819_v43 }
 0x161   : > { %3089 = vrcp.f32 %v820_v44  ;;  %v861_v24 = vand.u32 2147483648, %v820_v44  ;;  %v859_v30 = vand.u32 2147483647, %v820_v44  ;;  %vm855_vm1 = vweird.f32 %v820_v44  ;;  %v698_v25 = vpop.f32.mrf.mxu3 }
 0x162   : > { %v847_v36 = vor.u32 1.1754944e-38, %v846_v0  ;;  %vm845_vm2 = vcmp.eq.f32.partialorder %v844_v23, 8.507059e+37 }
 0x163   : > { %v862_v6 = vor.u32 1.1754944e-38, %v861_v24  ;;  %vm860_vm4 = vcmp.eq.f32.partialorder %v859_v30, 8.507059e+37 }
 0x164   : > { %v3084_v45 = vpop.eup %3083 }
 0x165   : > { %v3086_v48 = vpop.eup %3085  ;;  %v3817_v4 = vadd.f32 1.0, %v3084_v45 }
 0x166   : > { %v3088_v47 = vpop.eup %3087  ;;  %v3824_v59 = vadd.f32 1.0, %v3086_v48  ;;  %v762_v48 = vadd.f32 %v3822_v50, %v698_v25 }
 0x167   : > { %v3090_v49 = vpop.eup %3089  ;;  %v836_v40 = vmul.f32 %v3088_v47, %v819_v43  ;;  %3091 = vrcp.f32 %v3817_v4  ;;  %vm841_vm13 = vweird.f32 %v3088_v47  ;;  %vm870_vm6 = vweird.f32 %v3817_v4 }
 0x168   : > { %v851_v7 = vmul.f32 %v3090_v49, %v820_v44  ;;  %vm856_vm14 = vweird.f32 %v3090_v49  ;;  %3093 = vrcp.f32 %v3824_v59  ;;  %vm842_vm0 = vmor %vm840_vm15, %vm841_vm13  ;;  %v876_v44 = vand.u32 2147483648, %v3817_v4 }
 0x169   : > { %v837_v53 = vsub.f32 1.0, %v836_v40  ;;  %vm857_vm3 = vmor %vm855_vm1, %vm856_vm14  ;;  %v874_v40 = vand.u32 2147483647, %v3817_v4  ;;  %3095 = vpow2.f32 %v2894_v8  ;;  %v701_v24 = vpop.f32.mrf.mxu3  ;;  %vm885_vm10 = vweird.f32 %v3824_v59 }
 0x16a   : > { %v852_v1 = vsub.f32 1.0, %v851_v7  ;;  %v877_v7 = vor.u32 1.1754944e-38, %v876_v44  ;;  %3097 = vpow2.f32 %v2895_v52  ;;  %v766_v12 = vadd.f32 %v3856_v5, %v701_v24 }
 0x16b   : > { %v838_v20 = vmul.f32 %v3088_v47, %v837_v53  ;;  %vm875_vm8 = vcmp.eq.f32.partialorder %v874_v40, 8.507059e+37 }
 0x16c   : > { %v853_v28 = vmul.f32 %v3090_v49, %v852_v1  ;;  %v2901_v8 = vmul.f32 -1.442695, %v766_v12 }
 0x16d   : > { %v3092_v34 = vpop.eup %3091  ;;  %v839_v16 = vadd.f32 %v3088_v47, %v838_v20 }
 0x16e   : > { %v854_v2 = vadd.f32 %v3090_v49, %v853_v28  ;;  %v866_v29 = vmul.f32 %v3092_v34, %v3817_v4  ;;  %v3840_v46 = vpop.eup %3093  ;;  %vm871_vm5 = vweird.f32 %v3092_v34  ;;  %v725_v4 = vadd.f32 %v3812_v37, %v3776_v51 }
 0x16f   : > { %v843_v39 = vsel %vm842_vm0, %v3088_v47, %v839_v16  ;;  %vm872_vm7 = vmor %vm870_vm6, %vm871_vm5  ;;  %v881_v53 = vmul.f32 %v3840_v46, %v3824_v59  ;;  %v3096_v20 = vpop.eup %3095  ;;  %vm886_vm9 = vweird.f32 %v3840_v46 }
 0x170   : > { %v848_v63 = vsel %vm845_vm2, %v847_v36, %v843_v39  ;;  %v858_v14 = vsel %vm857_vm3, %v3090_v49, %v854_v2  ;;  %v867_v42 = vsub.f32 1.0, %v866_v29  ;;  %v3098_v28 = vpop.eup %3097  ;;  %v3867_v30 = vadd.f32 1.0, %v3096_v20  ;;  %v3875_v36 = vpop.permute.xlu2 %752  ;;  %vm887_vm11 = vmor %vm885_vm10, %vm886_vm9 }
 0x171   : > { %v3836_v43 = vmul.f32 %v848_v63, %v723_v57  ;;  %v863_v45 = vsel %vm860_vm4, %v862_v6, %v858_v14  ;;  %v2897_v57 = vmul.f32 -1.442695, %v762_v48  ;;  %v882_v3 = vsub.f32 1.0, %v881_v53  ;;  %v3877_v2 = vpop.permute.xlu1 %1119  ;;  %v657_v6 = vpop.f32.mrf.mxu2 }
 0x172   : > { %v3842_v19 = vmul.f32 %v863_v45, %v724_v35  ;;  %v868_v47 = vmul.f32 %v3092_v34, %v867_v42  ;;  %v3869_v35 = vadd.f32 1.0, %v3098_v28  ;;  %v891_v29 = vand.u32 2147483648, %v3824_v59  ;;  %v704_v63 = vpop.f32.mrf.mxu3 }
 0x173   : > { %1168 = vrot.lane.b32.xlu2 %v3836_v43, %s3346_s22  ;;  %3099 = vpow2.f32 %v2897_v57  ;;  %v883_v51 = vmul.f32 %v3840_v46, %v882_v3  ;;  %v889_v39 = vand.u32 2147483647, %v3824_v59  ;;  %v761_v59 = vadd.f32 %v3822_v50, %v657_v6  ;;  %v3909_v57 = vpop.permute.xlu0 %1114 }
 0x174   : > { %v869_v49 = vadd.f32 %v3092_v34, %v868_v47  ;;  %1644 = vrot.lane.b32.xlu1 %v3842_v19, %s3347_s6  ;;  %1176 = vrot.lane.b32.xlu0 %v3842_v19, %s3346_s22  ;;  %3101 = vrcp.f32 %v3867_v30  ;;  %v892_v42 = vor.u32 1.1754944e-38, %v891_v29  ;;  %v770_v44 = vadd.f32 %v3875_v36, %v704_v63 }
 0x175   : > { %v884_v16 = vadd.f32 %v3840_v46, %v883_v51  ;;  %3103 = vrcp.f32 %v3869_v35  ;;  %vm890_vm13 = vcmp.eq.f32.partialorder %v889_v39, 8.507059e+37  ;;  %v726_v47 = vadd.f32 %v3812_v37, %v3778_v54 }
 0x176   : > { %v873_v0 = vsel %vm872_vm7, %v3092_v34, %v869_v49  ;;  %v2896_v50 = vmul.f32 -1.442695, %v761_v59  ;;  %v2905_v53 = vmul.f32 -1.442695, %v770_v44  ;;  %v1103_v29 = vlaneseq }
 0x177   : > { %v878_v1 = vsel %vm875_vm8, %v877_v7, %v873_v0  ;;  %v888_v14 = vsel %vm887_vm11, %v3840_v46, %v884_v16  ;;  %v904_v16 = vand.u32 2147483647, %v3867_v30  ;;  %vm900_vm14 = vweird.f32 %v3867_v30 }
 0x178   : > { %v3858_v23 = vmul.f32 %v878_v1, %v725_v4  ;;  %v893_v48 = vsel %vm890_vm13, %v892_v42, %v888_v14  ;;  %v3899_v40 = vpop.permute.xlu2 %1124  ;;  %v3923_v4 = vmul.f32 %v3909_v57, %v3842_v19  ;;  %v906_v6 = vand.u32 2147483648, %v3867_v30 }
 0x179   : > { %v3100_v34 = vpop.eup %3099  ;;  %5873 = vst [vmem:[#allocation17_spill] sm:$0xff] %v3899_v40  ;;  %v3901_v46 = vpop.permute.xlu1 %1129  ;;  %v3907_v7 = vmul.f32 %v893_v48, %v726_v47  ;;  %vm3954_vm1 = vcmp.eq.f32.partialorder %v904_v16, 8.507059e+37  ;;  %v3960_v47 = vand.u32 127, %v1103_v29  ;;  %vm915_vm2 = vweird.f32 %v3869_v35 }
 0x17a   : > { %v3880_v25 = vadd.f32 1.0, %v3100_v34  ;;  %v3894_v45 = vpop.eup %3101  ;;  %5874 = vst [vmem:[#allocation18_spill] sm:$0xff] %v3901_v46  ;;  %v727_v44 = vadd.f32 %v3792_v56, %v3780_v15 }
 0x17b   : > { %1285 = vrot.lane.b32.xlu2 %v3836_v43, %s3348_s5  ;;  %v896_v52 = vmul.f32 %v3894_v45, %v3867_v30  ;;  %v3905_v49 = vpop.eup %3103  ;;  %v3929_v20 = vmul.f32 %v3909_v57, %v3907_v7  ;;  %vm901_vm15 = vweird.f32 %v3894_v45  ;;  %v4196_v38 = vpop.permute.xlu0 %1218 }
 0x17c   : > { %1184 = vrot.lane.b32.xlu1 %v3858_v23, %s3346_s22  ;;  %1293 = vrot.lane.b32.xlu0 %v3842_v19, %s3348_s5  ;;  %3105 = vrcp.f32 %v3880_v25  ;;  %v911_v24 = vmul.f32 %v3905_v49, %v3869_v35  ;;  %vm3950_vm0 = vmor %vm900_vm14, %vm901_vm15  ;;  %vm945_vm3 = vweird.f32 %v3880_v25  ;;  %vm916_vm5 = vweird.f32 %v3905_v49 }
 0x17d   : > { %3107 = vpow2.f32 %v2901_v8  ;;  %v897_v0 = vsub.f32 1.0, %v896_v52  ;;  %v907_v52 = vor.u32 1.1754944e-38, %v906_v6  ;;  %vm4004_vm8 = vmor %vm915_vm2, %vm916_vm5 }
 0x17e   : > { %3109 = vpow2.f32 %v2896_v50  ;;  %v912_v8 = vsub.f32 1.0, %v911_v24  ;;  %v949_v24 = vand.u32 2147483647, %v3880_v25 }
 0x17f   : > { %3111 = vpow2.f32 %v2905_v53  ;;  %v898_v34 = vmul.f32 %v3894_v45, %v897_v0 }
 0x180   : > { %v3936_v51 = vpop.permute.xlu2 %1226  ;;  %vm950_vm11 = vcmp.eq.f32.partialorder %v949_v24, 8.507059e+37 }
 0x181   : > { %v3934_v28 = vpop.permute.xlu1 %1222  ;;  %5875 = vst [vmem:[#allocation19_spill] sm:$0xff] %v3936_v51  ;;  %v899_v42 = vadd.f32 %v3894_v45, %v898_v34  ;;  %v951_v34 = vand.u32 2147483648, %v3880_v25 }
 0x182   : > { %v3913_v54 = vpop.eup %3105 }
 0x183   : > { %1402 = vrot.lane.b32.xlu2 %v3836_v43, %s3349_s7  ;;  %v3108_v37 = vpop.eup %3107  ;;  %v941_v3 = vmul.f32 %v3913_v54, %v3880_v25  ;;  %vm946_vm4 = vweird.f32 %v3913_v54 }
 0x184   : > { %1301 = vrot.lane.b32.xlu1 %v3858_v23, %s3348_s5  ;;  %1410 = vrot.lane.b32.xlu0 %v3842_v19, %s3349_s7  ;;  %v3919_v1 = vadd.f32 1.0, %v3108_v37  ;;  %v3110_v39 = vpop.eup %3109  ;;  %vm3993_vm7 = vmor %vm945_vm3, %vm946_vm4 }
 0x185   : > { %v942_v12 = vsub.f32 1.0, %v941_v3  ;;  %v3112_v63 = vpop.eup %3111  ;;  %v3964_v50 = vadd.f32 1.0, %v3110_v39  ;;  %v903_v3 = vsel %vm3950_vm0, %v3894_v45, %v899_v42  ;;  %v3980_v39 = vadd.s32 384, %v3960_v47 }
 0x186   : > { %3113 = vrcp.f32 %v3919_v1  ;;  %v3968_v37 = vadd.f32 1.0, %v3112_v63  ;;  %v921_v63 = vand.u32 2147483648, %v3869_v35  ;;  %v1011_v59 = vand.u32 2147483648, %v3919_v1 }
 0x187   : > { %v943_v30 = vmul.f32 %v3913_v54, %v942_v12  ;;  %v578_v12 = vpop.f32.mrf.mxu0  ;;  %vm1005_vm9 = vweird.f32 %v3919_v1  ;;  %v1009_v25 = vand.u32 2147483647, %v3919_v1  ;;  %vm1736_vm13 = vcmp.ge.s32.totalorder %v3980_v39, 506 }
 0x188   : > { %v3984_v6 = vpop.permute.xlu2 %1343  ;;  %3115 = vrcp.f32 %v3968_v37  ;;  %v763_v41 = vadd.f32 %v3856_v5, %v578_v12  ;;  %vm1151_vm0 = vcmp.ge.s32.totalorder %v3980_v39, 511  ;;  %v734_v42 = vadd.f32 %v3815_v31, %v3796_v62 }
 0x189   : > { %v3970_v0 = vpop.permute.xlu1 %1230  ;;  %v944_v16 = vadd.f32 %v3913_v54, %v943_v30  ;;  %5881 = vst [vmem:[#allocation21_spill] sm:$0xff] %v3984_v6  ;;  %3117 = vrcp.f32 %v3964_v50  ;;  %vm1010_vm15 = vcmp.eq.f32.partialorder %v1009_v25, 8.507059e+37  ;;  %v1071_v25 = vand.u32 2147483648, %v3968_v37 }
 0x18a   : > { %5880 = vst [vmem:[#allocation20_spill] sm:$0xff] %v3970_v0  ;;  %vm1268_vm4 = vcmp.ge.s32.totalorder %v3980_v39, 510  ;;  %v936_v10 = vand.u32 2147483648, %v3964_v50  ;;  %v934_v17 = vand.u32 2147483647, %v3964_v50 }
 0x18b   : > { %1519 = vrot.lane.b32.xlu2 %v3836_v43, %s3350_s8 }
 0x18c   : > { %1418 = vrot.lane.b32.xlu1 %v3858_v23, %s3349_s7  ;;  %1527 = vrot.lane.b32.xlu0 %v3842_v19, %s3350_s8  ;;  %v3114_v14 = vpop.eup %3113 }
 0x18d   : > { %v1001_v48 = vmul.f32 %v3114_v14, %v3919_v1  ;;  %vm1006_vm6 = vweird.f32 %v3114_v14 }
 0x18e   : > { %vm4016_vm10 = vmor %vm1005_vm9, %vm1006_vm6  ;;  %vm1385_vm6 = vcmp.ge.s32.totalorder %v3980_v39, 509  ;;  %vm1853_vm9 = vcmp.ge.s32.totalorder %v3980_v39, 505 }
 0x18f   : > { %v1002_v53 = vsub.f32 1.0, %v1001_v48  ;;  %v1389_v22 = vsel %vm1385_vm6, 0.0, %v3907_v7 }
 0x191   : > { %v1003_v29 = vmul.f32 %v3114_v14, %v1002_v53  ;;  %v952_v53 = vor.u32 1.1754944e-38, %v951_v34  ;;  %v1740_v34 = vsel %vm1736_vm13, 0.0, %v3907_v7 }
 0x193   : > { %1878 = vrot.lane.b32.xlu2 %v3842_v19, %s3351_s9  ;;  %v1004_v48 = vadd.f32 %v3114_v14, %v1003_v29  ;;  %v948_v29 = vsel %vm3993_vm7, %v3913_v54, %v944_v16  ;;  %v4035_v54 = vpop.permute.xlu1 %1339  ;;  %v3116_v16 = vpop.eup %3115  ;;  %vm1502_vm7 = vcmp.ge.s32.totalorder %v3980_v39, 508 }
 0x194   : > { %1535 = vrot.lane.b32.xlu1 %v3858_v23, %s3350_s8  ;;  %1761 = vrot.lane.b32.xlu0 %v3842_v19, %s3352_s27  ;;  %v913_v19 = vmul.f32 %v3905_v49, %v912_v8  ;;  %v919_v8 = vand.u32 2147483647, %v3869_v35  ;;  %v953_v24 = vsel %vm950_vm11, %v952_v53, %v948_v29  ;;  %v1061_v30 = vmul.f32 %v3116_v16, %v3968_v37 }
 0x195   : > { %v1008_v1 = vsel %vm4016_vm10, %v3114_v14, %v1004_v48  ;;  %v1069_v48 = vand.u32 2147483647, %v3968_v37  ;;  %vm1066_vm2 = vweird.f32 %v3116_v16  ;;  %vm930_vm10 = vweird.f32 %v3964_v50 }
 0x196   : > { %v914_v45 = vadd.f32 %v3905_v49, %v913_v19  ;;  %v908_v19 = vsel %vm3954_vm1, %v907_v52, %v903_v3  ;;  %v922_v52 = vor.u32 1.1754944e-38, %v921_v63  ;;  %v1012_v3 = vor.u32 1.1754944e-38, %v1011_v59 }
 0x197   : > { %vm920_vm14 = vcmp.eq.f32.partialorder %v919_v8, 8.507059e+37  ;;  %v4037_v14 = vmul.f32 %v908_v19, %v727_v44  ;;  %v730_v63 = vadd.f32 %v3792_v56, %v3786_v32  ;;  %v4047_v8 = vpop.eup %3117  ;;  %v4061_v19 = vpop.permute.xlu2 %1460  ;;  %v1062_v53 = vsub.f32 1.0, %v1061_v30 }
 0x198   : > { %v918_v12 = vsel %vm4004_vm8, %v3905_v49, %v914_v45  ;;  %v1013_v15 = vsel %vm1010_vm15, %v1012_v3, %v1008_v1  ;;  %v2898_v49 = vmul.f32 -1.442695, %v763_v41  ;;  %v1155_v45 = vsel %vm1151_vm0, 0.0, %v3907_v7  ;;  %5889 = vst [vmem:[#allocation23_spill] sm:$0xff] %v4061_v19 }
 0x199   : > { %v923_v59 = vsel %vm920_vm14, %v922_v52, %v918_v12  ;;  %v728_v41 = vadd.f32 %v3792_v56, %v3782_v13  ;;  %v4057_v32 = vmul.f32 %v953_v24, %v730_v63  ;;  %v4059_v62 = vmul.f32 %v1013_v15, %v734_v42 }
 0x19a   : > { %vm1065_vm1 = vweird.f32 %v3968_v37  ;;  %v926_v29 = vmul.f32 %v4047_v8, %v3964_v50  ;;  %3119 = vpow2.f32 %v2898_v49  ;;  %v1063_v1 = vmul.f32 %v3116_v16, %v1062_v53 }
 0x19b   : > { %1769 = vrot.lane.b32.xlu2 %v3858_v23, %s3352_s27  ;;  %5888 = vst [vmem:[#allocation22_spill] sm:$0xff] %v4059_v62  ;;  %v4064_v35 = vmul.f32 %v923_v59, %v728_v41  ;;  %vm4068_vm3 = vcmp.eq.f32.partialorder %v1069_v48, 8.507059e+37  ;;  %v1072_v13 = vor.u32 1.1754944e-38, %v1071_v25  ;;  %vm4073_vm5 = vmor %vm1065_vm1, %vm1066_vm2  ;;  %v4079_v37 = vpop.permute.xlu1 %1347  ;;  %v4086_v3 = vsel %vm1736_vm13, 0.0, %v4057_v32 }
 0x19c   : > { %1652 = vrot.lane.b32.xlu0 %v3858_v23, %s3347_s6  ;;  %1777 = vrot.lane.b32.xlu1 %v1740_v34, %s3352_s27  ;;  %5894 = vst [vmem:[#allocation24_spill] sm:$0xff] %v4079_v37  ;;  %v4091_v34 = vsel %vm1151_vm0, 0.0, %v4059_v62  ;;  %v1064_v12 = vadd.f32 %v3116_v16, %v1063_v1  ;;  %vm1619_vm8 = vcmp.ge.s32.totalorder %v3980_v39, 507  ;;  %v4097_v24 = vsel %vm1268_vm4, 0.0, %v4059_v62 }
 0x19d   : > { %v4102_v15 = vsel %vm1385_vm6, 0.0, %v4059_v62  ;;  %v1272_v63 = vsel %vm1268_vm4, 0.0, %v3907_v7  ;;  %v4110_v42 = vsel %vm1736_vm13, 0.0, %v4059_v62  ;;  %v4115_v49 = vsel %vm1502_vm7, 0.0, %v4059_v62 }
 0x19e   : > { %v1068_v59 = vsel %vm4073_vm5, %v3116_v16, %v1064_v12  ;;  %v4133_v25 = vsel %vm1853_vm9, 0.0, %v4057_v32  ;;  %v4138_v16 = vsel %vm1853_vm9, 0.0, %v3907_v7  ;;  %v927_v53 = vsub.f32 1.0, %v926_v29 }
 0x19f   : > { %v1073_v48 = vsel %vm4068_vm3, %v1072_v13, %v1068_v59  ;;  %5895 = vst [vmem:[#allocation25_spill] sm:$0xff] %v4133_v25  ;;  %v4143_v1 = vpop.permute.xlu2 %1573  ;;  %v4148_v44 = vsel %vm1853_vm9, 0.0, %v4059_v62  ;;  %vm931_vm11 = vweird.f32 %v4047_v8  ;;  %v1506_v37 = vsel %vm1502_vm7, 0.0, %v3907_v7 }
 0x1a0   : > { %v3120_v30 = vpop.eup %3119  ;;  %5896 = vst [vmem:[#allocation26_spill] sm:$0xff] %v4138_v16  ;;  %v4141_v41 = vmul.f32 %v1073_v48, %v3810_v27  ;;  %v928_v60 = vmul.f32 %v4047_v8, %v927_v53  ;;  %v937_v53 = vor.u32 1.1754944e-38, %v936_v10  ;;  %vm935_vm14 = vcmp.eq.f32.partialorder %v934_v17, 8.507059e+37 }
 0x1a1   : > { %5898 = vst [vmem:[#allocation28_spill] sm:$0xff] %v4148_v44  ;;  %v827_v11 = vadd.f32 1.0, %v3120_v30  ;;  %v4217_v44 = vpop.permute.xlu0 %1335  ;;  %v729_v10 = vadd.f32 %v3792_v56, %v3784_v33  ;;  %vm1200_vm3 = vcmp.lt.s32.totalorder %v3960_v47, 1  ;;  %v733_v39 = vadd.f32 %v3815_v31, %v3794_v61 }
 0x1a2   : > { %5897 = vst [vmem:[#allocation27_spill] sm:$0xff] %v4141_v41  ;;  %v4153_v13 = vsel %vm1502_vm7, 0.0, %v4141_v41  ;;  %v4158_v52 = vsel %vm1619_vm8, 0.0, %v4141_v41  ;;  %v4163_v27 = vsel %vm1151_vm0, 0.0, %v4141_v41  ;;  %v4168_v29 = vsel %vm1268_vm4, 0.0, %v4141_v41 }
 0x1a3   : > { %1192 = vrot.lane.b32.xlu2 %v1155_v45, %s3346_s22  ;;  %v4120_v45 = vsel %vm1619_vm8, 0.0, %v4059_v62  ;;  %5899 = vst [vmem:[#allocation29_spill] sm:$0xff] %v4163_v27  ;;  %v4172_v12 = vpop.permute.xlu1 %1456  ;;  %v4182_v59 = vsel %vm1853_vm9, 0.0, %v4141_v41  ;;  %v4187_v48 = vsel %vm1736_vm13, 0.0, %v4141_v41  ;;  %v929_v58 = vadd.f32 %v4047_v8, %v928_v60  ;;  %vm932_vm13 = vmor %vm930_vm10, %vm931_vm11 }
 0x1a4   : > { %1170 = vrot.lane.b32.xlu0 %v4037_v14, %s3346_s22  ;;  %1178 = vrot.lane.b32.xlu1 %v4064_v35, %s3346_s22  ;;  %5900 = vst [vmem:[#allocation30_spill] sm:$0xff] %v4168_v29  ;;  %3121 = vrcp.f32 %v827_v11  ;;  %vm960_vm1 = vweird.f32 %v827_v11 }
 0x1a5   : > { %5902 = vst [vmem:[#allocation32_spill] sm:$0xff] %v4182_v59  ;;  %v933_v46 = vsel %vm932_vm13, %v4047_v8, %v929_v58  ;;  %vm1434_vm13 = vcmp.lt.s32.totalorder %v3960_v47, 3 }
 0x1a6   : > { %5903 = vst [vmem:[#allocation33_spill] sm:$0xff] %v4187_v48 }
 0x1aa   : > { %v3122_v60 = vpop.eup %3121 }
 0x1ab   : > { %1309 = vrot.lane.b32.xlu2 %v1272_v63, %s3348_s5  ;;  %v4177_v63 = vsel %vm1385_vm6, 0.0, %v4141_v41  ;;  %v4207_v30 = vpop.permute.xlu1 %1464  ;;  %v660_v41 = vpop.f32.mrf.mxu2  ;;  %v956_v0 = vmul.f32 %v3122_v60, %v827_v11  ;;  %vm961_vm15 = vweird.f32 %v3122_v60 }
 0x1ac   : > { %1287 = vrot.lane.b32.xlu0 %v4037_v14, %s3348_s5  ;;  %1295 = vrot.lane.b32.xlu1 %v4064_v35, %s3348_s5  ;;  %5901 = vst [vmem:[#allocation31_spill] sm:$0xff] %v4177_v63  ;;  %v765_v50 = vadd.f32 %v3856_v5, %v660_v41  ;;  %v1623_v41 = vsel %vm1619_vm8, 0.0, %v3907_v7  ;;  %vm962_vm2 = vmor %vm960_vm1, %vm961_vm15  ;;  %vm1551_vm15 = vcmp.lt.s32.totalorder %v3960_v47, 4  ;;  %vm1785_vm1 = vcmp.lt.s32.totalorder %v3960_v47, 6 }
 0x1ad   : > { %5904 = vst [vmem:[#allocation34_spill] sm:$0xff] %v4207_v30  ;;  %v938_v30 = vsel %vm935_vm14, %v937_v53, %v933_v46  ;;  %v957_v33 = vsub.f32 1.0, %v956_v0  ;;  %v4236_v46 = vpop.permute.xlu0 %1452 }
 0x1ae   : > { %v4225_v17 = vmul.f32 %v938_v30, %v729_v10  ;;  %v2900_v8 = vmul.f32 -1.442695, %v765_v50  ;;  %v1159_v50 = vsel %vm1151_vm0, 0.0, %v4057_v32 }
 0x1af   : > { %v958_v30 = vmul.f32 %v3122_v60, %v957_v33 }
 0x1b0   : > { %3123 = vpow2.f32 %v2900_v8  ;;  %v966_v8 = vand.u32 2147483648, %v827_v11 }
 0x1b3   : > { %1426 = vrot.lane.b32.xlu2 %v1389_v22, %s3349_s7  ;;  %v4205_v22 = vpop.permute.xlu2 %1686  ;;  %v4223_v58 = vpop.permute.xlu1 %1569 }
 0x1b4   : > { %1404 = vrot.lane.b32.xlu0 %v4037_v14, %s3349_s7  ;;  %1412 = vrot.lane.b32.xlu1 %v4064_v35, %s3349_s7  ;;  %v663_v63 = vpop.f32.mrf.mxu2 }
 0x1b5   : > { %v4256_v62 = vpop.permute.xlu0 %1690  ;;  %v769_v51 = vadd.f32 %v3875_v36, %v663_v63 }
 0x1b6   : > { %v3124_v10 = vpop.eup %3123 }
 0x1bb   : > { %1543 = vrot.lane.b32.xlu2 %v1506_v37, %s3350_s8  ;;  %v619_v37 = vpop.f32.mrf.mxu1  ;;  %v4230_v48 = vpop.permute.xlu2 %1803 }
 0x1bc   : > { %1521 = vrot.lane.b32.xlu0 %v4037_v14, %s3350_s8  ;;  %1529 = vrot.lane.b32.xlu1 %v4064_v35, %s3350_s8  ;;  %v764_v56 = vadd.f32 %v3856_v5, %v619_v37  ;;  %v4240_v53 = vpop.permute.xlu1 %1577  ;;  %v959_v5 = vadd.f32 %v3122_v60, %v958_v30  ;;  %v964_v37 = vand.u32 2147483647, %v827_v11  ;;  %v1276_v30 = vsel %vm1268_vm4, 0.0, %v4057_v32 }
 0x1bd   : > { %5905 = vst [vmem:[#allocation35_spill] sm:$0xff] %v4240_v53 }
 0x1be   : > { %v2899_v7 = vmul.f32 -1.442695, %v764_v56  ;;  %v963_v33 = vsel %vm962_vm2, %v3122_v60, %v959_v5  ;;  %v967_v56 = vor.u32 1.1754944e-38, %v966_v8  ;;  %vm965_vm0 = vcmp.eq.f32.partialorder %v964_v37, 8.507059e+37 }
 0x1bf   : > { %v731_v60 = vadd.f32 %v3815_v31, %v3788_v21  ;;  %v1393_v37 = vsel %vm1385_vm6, 0.0, %v4057_v32  ;;  %vm1668_vm2 = vcmp.lt.s32.totalorder %v3960_v47, 5 }
 0x1c0   : > { %3125 = vpow2.f32 %v2899_v7  ;;  %v968_v7 = vsel %vm965_vm0, %v967_v56, %v963_v33  ;;  %v4285_v56 = vpop.permute.xlu0 %1581 }
 0x1c1   : > { %5907 = vst [vmem:[#allocation37_spill] sm:$0xff] %v4285_v56 }
 0x1c3   : > { %1660 = vrot.lane.b32.xlu2 %v1623_v41, %s3347_s6  ;;  %v4250_v41 = vadd.f32 1.0, %v3124_v10  ;;  %v4269_v10 = vmul.f32 %v968_v7, %v731_v60  ;;  %v1510_v60 = vsel %vm1502_vm7, 0.0, %v4057_v32  ;;  %v622_v27 = vpop.f32.mrf.mxu1  ;;  %vm1317_vm7 = vcmp.lt.s32.totalorder %v3960_v47, 2 }
 0x1c4   : > { %1771 = vrot.lane.b32.xlu0 %v4225_v17, %s3352_s27  ;;  %1763 = vrot.lane.b32.xlu1 %v4064_v35, %s3352_s27  ;;  %v4254_v59 = vpop.permute.xlu1 %1694  ;;  %v768_v63 = vadd.f32 %v3875_v36, %v622_v27 }
 0x1c5   : > { %5906 = vst [vmem:[#allocation36_spill] sm:$0xff] %v4254_v59  ;;  %3127 = vrcp.f32 %v4250_v41  ;;  %v996_v40 = vand.u32 2147483648, %v4250_v41  ;;  %vm990_vm5 = vweird.f32 %v4250_v41 }
 0x1c6   : > { %v3126_v11 = vpop.eup %3125 }
 0x1c7   : > { %v4271_v5 = vadd.f32 1.0, %v3126_v11 }
 0x1c9   : > { %3129 = vrcp.f32 %v4271_v5  ;;  %vm975_vm10 = vweird.f32 %v4271_v5 }
 0x1cb   : > { %1646 = vrot.lane.b32.xlu2 %v4064_v35, %s3347_s6  ;;  %v3128_v8 = vpop.eup %3127 }
 0x1cc   : > { %1194 = vrot.lane.b32.xlu0 %v1159_v50, %s3346_s22  ;;  %1654 = vrot.lane.b32.xlu1 %v4225_v17, %s3347_s6  ;;  %v986_v33 = vmul.f32 %v3128_v8, %v4250_v41  ;;  %v4283_v21 = vpop.permute.xlu1 %1807  ;;  %vm991_vm4 = vweird.f32 %v3128_v8 }
 0x1cd   : > { %v4248_v0 = vpop.permute.xlu2 %1168  ;;  %vm4317_vm6 = vmor %vm990_vm5, %vm991_vm4 }
 0x1ce   : > { %v987_v11 = vsub.f32 1.0, %v986_v33 }
 0x1cf   : > { %v4289_v7 = vpop.eup %3129 }
 0x1d0   : > { %v971_v59 = vmul.f32 %v4289_v7, %v4271_v5  ;;  %vm976_vm9 = vweird.f32 %v4289_v7 }
 0x1d1   : > { %vm977_vm11 = vmor %vm975_vm10, %vm976_vm9 }
 0x1d2   : > { %v972_v29 = vsub.f32 1.0, %v971_v59 }
 0x1d3   : > { %1186 = vrot.lane.b32.xlu2 %v4225_v17, %s3346_s22 }
 0x1d4   : > { %1311 = vrot.lane.b32.xlu0 %v1276_v30, %s3348_s5  ;;  %1172 = vrot.lane.b32.xlu1 %v4269_v10, %s3346_s22 }
 0x1d5   : > { %v4267_v50 = vpop.permute.xlu2 %1285 }
 0x1db   : > { %1303 = vrot.lane.b32.xlu2 %v4225_v17, %s3348_s5 }
 0x1dc   : > { %1428 = vrot.lane.b32.xlu0 %v1393_v37, %s3349_s7  ;;  %1289 = vrot.lane.b32.xlu1 %v4269_v10, %s3348_s5  ;;  %v988_v37 = vmul.f32 %v3128_v8, %v987_v11 }
 0x1dd   : > { %v4287_v30 = vpop.permute.xlu2 %1402 }
 0x1de   : > { %v989_v6 = vadd.f32 %v3128_v8, %v988_v37  ;;  %v973_v37 = vmul.f32 %v4289_v7, %v972_v29  ;;  %v2904_v29 = vmul.f32 -1.442695, %v769_v51 }
 0x1e0   : > { %v993_v16 = vsel %vm4317_vm6, %v3128_v8, %v989_v6  ;;  %v974_v27 = vadd.f32 %v4289_v7, %v973_v37  ;;  %3131 = vpow2.f32 %v2904_v29 }
 0x1e3   : > { %1420 = vrot.lane.b32.xlu2 %v4225_v17, %s3349_s7 }
 0x1e4   : > { %1545 = vrot.lane.b32.xlu0 %v1510_v60, %s3350_s8  ;;  %1406 = vrot.lane.b32.xlu1 %v4269_v10, %s3349_s7  ;;  %v994_v60 = vand.u32 2147483647, %v4250_v41 }
 0x1e5   : > { %v4302_v33 = vpop.permute.xlu2 %1519 }
 0x1e6   : > { %v4304_v56 = vpop.permute.xlu1 %1644  ;;  %v1177_v53 = vpop.permute.xlu0 %1176 }
 0x1e7   : > { %v1209_v19 = vsel %vm1200_vm3, %v4248_v0, %v1177_v53 }
 0x1e8   : > { %v1234_v11 = vmul.f32 %v4196_v38, %v1209_v19  ;;  %v1627_v19 = vsel %vm1619_vm8, 0.0, %v4057_v32  ;;  %vm995_vm8 = vcmp.eq.f32.partialorder %v994_v60, 8.507059e+37  ;;  %v981_v60 = vand.u32 2147483648, %v4271_v5 }
 0x1ea   : > { %v1250_v25 = vadd.f32 %v1234_v11, %v3923_v4  ;;  %v997_v4 = vor.u32 1.1754944e-38, %v996_v40 }
 0x1eb   : > { %1537 = vrot.lane.b32.xlu2 %v4225_v17, %s3350_s8 }
 0x1ec   : > { %1662 = vrot.lane.b32.xlu0 %v1627_v19, %s3347_s6  ;;  %v998_v6 = vsel %vm995_vm8, %v997_v4, %v993_v16  ;;  %v1134_v19 = vmul.f32 %v3909_v57, %v3858_v23  ;;  %v979_v16 = vand.u32 2147483647, %v4271_v5  ;;  %1523 = vrot.lane.b32.xlu1 %v4269_v10, %s3350_s8  ;;  %v982_v5 = vor.u32 1.1754944e-38, %v981_v60 }
 0x1ed   : > { %v4332_v41 = vpop.permute.xlu2 %1878  ;;  %v4352_v4 = vmul.f32 %v998_v6, %v733_v39 }
 0x1ee   : > { %5910 = vst [vmem:[#allocation38_spill] sm:$0xff] %v4332_v41  ;;  %v1185_v11 = vpop.permute.xlu1 %1184  ;;  %v1294_v59 = vpop.permute.xlu0 %1293  ;;  %vm980_vm14 = vcmp.eq.f32.partialorder %v979_v16, 8.507059e+37 }
 0x1ef   : > { %v1205_v8 = vsel %vm1200_vm3, %v1177_v53, %v1185_v11  ;;  %v1326_v40 = vsel %vm1317_vm7, %v4267_v50, %v1294_v59  ;;  %v2903_v53 = vmul.f32 -1.442695, %v768_v63 }
 0x1f0   : > { %v1235_v61 = vmul.f32 %v4196_v38, %v1205_v8  ;;  %v1351_v51 = vmul.f32 %v4217_v44, %v1326_v40  ;;  %v978_v8 = vsel %vm977_vm11, %v4289_v7, %v974_v27  ;;  %v3132_v7 = vpop.eup %3131  ;;  %v732_v40 = vadd.f32 %v3815_v31, %v3790_v55 }
 0x1f1   : > { %3133 = vpow2.f32 %v2903_v53  ;;  %v983_v29 = vsel %vm980_vm14, %v982_v5, %v978_v8  ;;  %v4377_v53 = vadd.f32 1.0, %v3132_v7  ;;  %v1132_v8 = vmul.f32 %v3909_v57, %v3836_v43 }
 0x1f2   : > { %v1251_v37 = vadd.f32 %v1235_v61, %v1134_v19  ;;  %v1367_v41 = vadd.f32 %v1351_v51, %v1250_v25  ;;  %v4375_v61 = vmul.f32 %v983_v29, %v732_v40  ;;  %v581_v51 = vpop.f32.mrf.mxu0 }
 0x1f3   : > { %1779 = vrot.lane.b32.xlu2 %v4086_v3, %s3352_s27  ;;  %v767_v55 = vadd.f32 %v3875_v36, %v581_v51  ;;  %3135 = vrcp.f32 %v4377_v53  ;;  %vm1050_vm0 = vweird.f32 %v4377_v53 }
 0x1f4   : > { %1188 = vrot.lane.b32.xlu0 %v4352_v4, %s3346_s22  ;;  %1656 = vrot.lane.b32.xlu1 %v4352_v4, %s3347_s6 }
 0x1f5   : > { %v4362_v63 = vpop.permute.xlu2 %1769 }
 0x1f6   : > { %v1302_v39 = vpop.permute.xlu1 %1301  ;;  %v1411_v25 = vpop.permute.xlu0 %1410 }
 0x1f7   : > { %v1322_v6 = vsel %vm1317_vm7, %v1294_v59, %v1302_v39  ;;  %v1443_v3 = vsel %vm1434_vm13, %v4287_v30, %v1411_v25  ;;  %v3134_v60 = vpop.eup %3133 }
 0x1f8   : > { %v1352_v27 = vmul.f32 %v4217_v44, %v1322_v6  ;;  %v1468_v19 = vmul.f32 %v4236_v46, %v1443_v3  ;;  %v4385_v31 = vadd.f32 1.0, %v3134_v60 }
 0x1fa   : > { %v1368_v16 = vadd.f32 %v1352_v27, %v1251_v37  ;;  %v1484_v59 = vadd.f32 %v1468_v19, %v1367_v41  ;;  %v2902_v27 = vmul.f32 -1.442695, %v767_v55  ;;  %3137 = vrcp.f32 %v4385_v31 }
 0x1fb   : > { %1180 = vrot.lane.b32.xlu2 %v4375_v61, %s3346_s22  ;;  %vm1035_vm5 = vweird.f32 %v4385_v31 }
 0x1fc   : > { %1305 = vrot.lane.b32.xlu0 %v4352_v4, %s3348_s5  ;;  %1196 = vrot.lane.b32.xlu1 %v4091_v34, %s3346_s22  ;;  %3139 = vpow2.f32 %v2902_v27 }
 0x1fd   : > { %v1193_v41 = vpop.permute.xlu2 %1192 }
 0x1fe   : > { %v1419_v37 = vpop.permute.xlu1 %1418  ;;  %v1201_v29 = vsel %vm1200_vm3, %v1185_v11, %v1193_v41  ;;  %v1213_v36 = vsel %vm1200_vm3, %v1193_v41, %v4248_v0  ;;  %v1528_v6 = vpop.permute.xlu0 %1527 }
 0x1ff   : > { %v1439_v5 = vsel %vm1434_vm13, %v1411_v25, %v1419_v37  ;;  %v1233_v7 = vmul.f32 %v4196_v38, %v1213_v36  ;;  %v1236_v57 = vmul.f32 %v4196_v38, %v1201_v29  ;;  %v1560_v40 = vsel %vm1551_vm15, %v4302_v33, %v1528_v6  ;;  %v4414_v38 = vpop.eup %3135 }
 0x200   : > { %v1469_v3 = vmul.f32 %v4236_v46, %v1439_v5  ;;  %v1585_v11 = vmul.f32 %v4223_v58, %v1560_v40  ;;  %v1046_v36 = vmul.f32 %v4414_v38, %v4377_v53  ;;  %vm1051_vm4 = vweird.f32 %v4414_v38 }
 0x201   : > { %v1249_v25 = vadd.f32 %v1233_v7, %v1132_v8  ;;  %v1252_v19 = vadd.f32 %v1236_v57, %v3929_v20  ;;  %v4425_v8 = vpop.eup %3137  ;;  %vm4480_vm8 = vmor %vm1050_vm0, %vm1051_vm4 }
 0x202   : > { %v1485_v0 = vadd.f32 %v1469_v3, %v1368_v16  ;;  %v4408_v51 = vadd.f32 %v1585_v11, %v1484_v59  ;;  %v1031_v7 = vmul.f32 %v4425_v8, %v4385_v31  ;;  %vm1036_vm6 = vweird.f32 %v4425_v8 }
 0x203   : > { %1297 = vrot.lane.b32.xlu2 %v4375_v61, %s3348_s5  ;;  %vm4498_vm9 = vmor %vm1035_vm5, %vm1036_vm6 }
 0x204   : > { %1422 = vrot.lane.b32.xlu0 %v4352_v4, %s3349_s7  ;;  %1313 = vrot.lane.b32.xlu1 %v4097_v24, %s3348_s5  ;;  %v1032_v40 = vsub.f32 1.0, %v1031_v7  ;;  %v1039_v7 = vand.u32 2147483647, %v4385_v31 }
 0x205   : > { %v1310_v60 = vpop.permute.xlu2 %1309 }
 0x206   : > { %v1536_v34 = vpop.permute.xlu1 %1535  ;;  %v1318_v16 = vsel %vm1317_vm7, %v1302_v39, %v1310_v60  ;;  %v1330_v20 = vsel %vm1317_vm7, %v1310_v60, %v4267_v50  ;;  %v4423_v59 = vpop.permute.xlu0 %1761  ;;  %vm1040_vm11 = vcmp.eq.f32.partialorder %v1039_v7, 8.507059e+37 }
 0x207   : > { %v1556_v55 = vsel %vm1551_vm15, %v1528_v6, %v1536_v34  ;;  %v1350_v5 = vmul.f32 %v4217_v44, %v1330_v20  ;;  %v1353_v29 = vmul.f32 %v4217_v44, %v1318_v16  ;;  %v3140_v50 = vpop.eup %3139  ;;  %v1047_v44 = vsub.f32 1.0, %v1046_v36 }
 0x208   : > { %v1586_v41 = vmul.f32 %v4223_v58, %v1556_v55  ;;  %v4442_v57 = vadd.f32 1.0, %v3140_v50  ;;  %v1056_v36 = vand.u32 2147483648, %v4377_v53 }
 0x209   : > { %v1366_v6 = vadd.f32 %v1350_v5, %v1249_v25  ;;  %v1369_v3 = vadd.f32 %v1353_v29, %v1252_v19  ;;  %v1790_v25 = vsel %vm1785_vm1, %v4423_v59, %v4362_v63  ;;  %v1033_v29 = vmul.f32 %v4425_v8, %v1032_v40 }
 0x20a   : > { %v1602_v39 = vadd.f32 %v1586_v41, %v1485_v0  ;;  %3141 = vrcp.f32 %v4442_v57  ;;  %vm1020_vm14 = vweird.f32 %v4442_v57 }
 0x20b   : > { %1414 = vrot.lane.b32.xlu2 %v4375_v61, %s3349_s7 }
 0x20c   : > { %1539 = vrot.lane.b32.xlu0 %v4352_v4, %s3350_s8  ;;  %1430 = vrot.lane.b32.xlu1 %v4102_v15, %s3349_s7 }
 0x20d   : > { %v1427_v24 = vpop.permute.xlu2 %1426 }
 0x20e   : > { %v1435_v27 = vsel %vm1434_vm13, %v1419_v37, %v1427_v24  ;;  %v1447_v11 = vsel %vm1434_vm13, %v1427_v24, %v4287_v30  ;;  %v1653_v0 = vpop.permute.xlu0 %1652  ;;  %v1048_v37 = vmul.f32 %v4414_v38, %v1047_v44  ;;  %v4466_v41 = vpop.permute.xlu1 %1777  ;;  %v1041_v44 = vand.u32 2147483648, %v4385_v31 }
 0x20f   : > { %v1467_v19 = vmul.f32 %v4236_v46, %v1447_v11  ;;  %v1470_v60 = vmul.f32 %v4236_v46, %v1435_v27  ;;  %v1673_v55 = vsel %vm1668_vm2, %v4304_v56, %v1653_v0  ;;  %v1820_v46 = vmul.f32 %v4230_v48, %v1790_v25 }
 0x210   : > { %v1703_v30 = vmul.f32 %v4205_v22, %v1673_v55  ;;  %v1049_v15 = vadd.f32 %v4414_v38, %v1048_v37  ;;  %v4493_v27 = vpop.eup %3141  ;;  %v1034_v11 = vadd.f32 %v4425_v8, %v1033_v29  ;;  %v1057_v25 = vor.u32 1.1754944e-38, %v1056_v36 }
 0x211   : > { %v1483_v16 = vadd.f32 %v1467_v19, %v1366_v6  ;;  %v1486_v20 = vadd.f32 %v1470_v60, %v1369_v3  ;;  %v1054_v6 = vand.u32 2147483647, %v4377_v53  ;;  %v1016_v37 = vmul.f32 %v4493_v27, %v4442_v57 }
 0x212   : > { %v1719_v5 = vadd.f32 %v1703_v30, %v1602_v39  ;;  %v1042_v30 = vor.u32 1.1754944e-38, %v1041_v44  ;;  %vm1021_vm0 = vweird.f32 %v4493_v27 }
 0x213   : > { %1531 = vrot.lane.b32.xlu2 %v4375_v61, %s3350_s8  ;;  %vm1055_vm10 = vcmp.eq.f32.partialorder %v1054_v6, 8.507059e+37  ;;  %vm1022_vm4 = vmor %vm1020_vm14, %vm1021_vm0 }
 0x214   : > { %1773 = vrot.lane.b32.xlu0 %v4352_v4, %s3352_s27  ;;  %v4476_v3 = vadd.f32 %v1820_v46, %v1719_v5  ;;  %1781 = vrot.lane.b32.xlu1 %v4110_v42, %s3352_s27  ;;  %v1038_v46 = vsel %vm4498_vm9, %v4425_v8, %v1034_v11  ;;  %v1786_v8 = vsel %vm1785_vm1, %v4362_v63, %v4466_v41 }
 0x215   : > { %v1544_v50 = vpop.permute.xlu2 %1543  ;;  %v1821_v39 = vmul.f32 %v4230_v48, %v1786_v8 }
 0x216   : > { %v1552_v24 = vsel %vm1551_vm15, %v1536_v34, %v1544_v50  ;;  %v1564_v53 = vsel %vm1551_vm15, %v1544_v50, %v4302_v33  ;;  %v4491_v40 = vpop.permute.xlu0 %1170  ;;  %v1053_v34 = vsel %vm4480_vm8, %v4414_v38, %v1049_v15  ;;  %v1017_v15 = vsub.f32 1.0, %v1016_v37 }
 0x217   : > { %v1584_v19 = vmul.f32 %v4223_v58, %v1564_v53  ;;  %v1587_v60 = vmul.f32 %v4223_v58, %v1552_v24  ;;  %v1179_v58 = vpop.permute.xlu1 %1178  ;;  %v1058_v5 = vsel %vm1055_vm10, %v1057_v25, %v1053_v34  ;;  %v1137_v50 = vmul.f32 %v3877_v2, %v4064_v35 }
 0x218   : > { %v1210_v38 = vsel %vm1200_vm3, %v4491_v40, %v1179_v58  ;;  %v1018_v7 = vmul.f32 %v4493_v27, %v1017_v15  ;;  %v1026_v25 = vand.u32 2147483648, %v4442_v57  ;;  %v1024_v34 = vand.u32 2147483647, %v4442_v57 }
 0x219   : > { %v4507_v33 = vadd.f32 %v1584_v19, %v1483_v16  ;;  %v1603_v55 = vadd.f32 %v1587_v60, %v1486_v20  ;;  %v1043_v16 = vsel %vm1040_vm11, %v1042_v30, %v1038_v46  ;;  %v4524_v20 = vmul.f32 %v1058_v5, %v3808_v26 }
 0x21a   : > { %v1238_v6 = vmul.f32 %v3934_v28, %v1210_v38  ;;  %v4540_v26 = vmul.f32 %v1043_v16, %v3800_v18  ;;  %v1019_v31 = vadd.f32 %v4493_v27, %v1018_v7  ;;  %vm1025_vm5 = vcmp.eq.f32.partialorder %v1024_v34, 8.507059e+37 }
 0x21b   : > { %1648 = vrot.lane.b32.xlu2 %v4375_v61, %s3347_s6 }
 0x21c   : > { %1547 = vrot.lane.b32.xlu0 %v4115_v49, %s3350_s8  ;;  %1190 = vrot.lane.b32.xlu1 %v4524_v20, %s3346_s22  ;;  %v1254_v18 = vadd.f32 %v1238_v6, %v1137_v50  ;;  %v1023_v30 = vsel %vm1022_vm4, %v4493_v27, %v1019_v31  ;;  %v1138_v6 = vmul.f32 %v3877_v2, %v4225_v17 }
 0x21d   : > { %v4521_v42 = vpop.permute.xlu2 %1660 }
 0x21e   : > { %v1669_v29 = vsel %vm1668_vm2, %v1653_v0, %v4521_v42  ;;  %v4533_v36 = vpop.permute.xlu0 %1287 }
 0x21f   : > { %v1704_v49 = vmul.f32 %v4205_v22, %v1669_v29  ;;  %v1296_v0 = vpop.permute.xlu1 %1295 }
 0x220   : > { %v1327_v24 = vsel %vm1317_vm7, %v4533_v36, %v1296_v0 }
 0x221   : > { %v1720_v63 = vadd.f32 %v1704_v49, %v1603_v55  ;;  %v1355_v53 = vmul.f32 %v4035_v54, %v1327_v24  ;;  %v1027_v55 = vor.u32 1.1754944e-38, %v1026_v25  ;;  %v3353_v25 = vmov 6  }
 0x222   : > { %3064 = vset.pattern.permute.xlu1 %v3353_v25 }
 0x223   : > { %v4546_v44 = vadd.f32 %v1821_v39, %v1720_v63  ;;  %1765 = vrot.lane.b32.xlu2 %v4375_v61, %s3352_s27  ;;  %v1371_v19 = vadd.f32 %v1355_v53, %v1254_v18  ;;  %v1028_v38 = vsel %vm1025_vm5, %v1027_v55, %v1023_v30 }
 0x224   : > { %1182 = vrot.lane.b32.xlu0 %v4540_v26, %s3346_s22  ;;  %1307 = vrot.lane.b32.xlu1 %v4524_v20, %s3348_s5  ;;  %v4583_v29 = vmul.f32 %v1028_v38, %v3798_v9 }
 0x225   : > { %v4558_v11 = vpop.permute.xlu2 %1646 }
 0x226   : > { %v4561_v60 = vpop.permute.xlu0 %1404 }
 0x227   : > { %v1413_v37 = vpop.permute.xlu1 %1412 }
 0x228   : > { %v1444_v46 = vsel %vm1434_vm13, %v4561_v60, %v1413_v37 }
 0x229   : > { %v1472_v57 = vmul.f32 %v4172_v12, %v1444_v46  ;;  %v1139_v46 = vmul.f32 %v3877_v2, %v4057_v32 }
 0x22b   : > { %1664 = vrot.lane.b32.xlu2 %v4120_v45, %s3347_s6  ;;  %v1488_v16 = vadd.f32 %v1472_v57, %v1371_v19 }
 0x22c   : > { %1299 = vrot.lane.b32.xlu0 %v4540_v26, %s3348_s5  ;;  %1424 = vrot.lane.b32.xlu1 %v4524_v20, %s3349_s7 }
 0x22d   : > { %v1187_v5 = vpop.permute.xlu2 %1186 }
 0x22e   : > { %v1206_v8 = vsel %vm1200_vm3, %v1179_v58, %v1187_v5  ;;  %v4578_v27 = vpop.permute.xlu0 %1521 }
 0x22f   : > { %v1530_v45 = vpop.permute.xlu1 %1529  ;;  %v1239_v15 = vmul.f32 %v3934_v28, %v1206_v8 }
 0x230   : > { %v1561_v49 = vsel %vm1551_vm15, %v4578_v27, %v1530_v45 }
 0x231   : > { %v1589_v58 = vmul.f32 %v4143_v1, %v1561_v49  ;;  %v1255_v7 = vadd.f32 %v1239_v15, %v1138_v6 }
 0x233   : > { %1174 = vrot.lane.b32.xlu2 %v4583_v29, %s3346_s22  ;;  %v4596_v39 = vadd.f32 %v1589_v58, %v1488_v16 }
 0x234   : > { %1416 = vrot.lane.b32.xlu0 %v4540_v26, %s3349_s7  ;;  %1541 = vrot.lane.b32.xlu1 %v4524_v20, %s3350_s8 }
 0x235   : > { %v1304_v9 = vpop.permute.xlu2 %1303 }
 0x236   : > { %v1323_v63 = vsel %vm1317_vm7, %v1296_v0, %v1304_v9  ;;  %v4600_v50 = vpop.permute.xlu0 %1771 }
 0x237   : > { %v1356_v24 = vmul.f32 %v4035_v54, %v1323_v63  ;;  %v4605_v53 = vpop.permute.xlu1 %1763 }
 0x238   : > { %v1791_v6 = vsel %vm1785_vm1, %v4605_v53, %v4600_v50 }
 0x239   : > { %v1372_v18 = vadd.f32 %v1356_v24, %v1255_v7 }
 0x23b   : > { %1291 = vrot.lane.b32.xlu2 %v4583_v29, %s3348_s5 }
 0x23c   : > { %1533 = vrot.lane.b32.xlu0 %v4540_v26, %s3350_s8  ;;  %1549 = vrot.lane.b32.xlu1 %v4153_v13, %s3350_s8  ;;  %v1136_v13 = vmul.f32 %v3877_v2, %v4037_v14 }
 0x23d   : > { %v1421_v0 = vpop.permute.xlu2 %1420 }
 0x23e   : > { %v1440_v19 = vsel %vm1434_vm13, %v1413_v37, %v1421_v0  ;;  %v1195_v31 = vpop.permute.xlu0 %1194 }
 0x23f   : > { %v1473_v34 = vmul.f32 %v4172_v12, %v1440_v19  ;;  %v1202_v55 = vsel %vm1200_vm3, %v1187_v5, %v1195_v31  ;;  %v1214_v30 = vsel %vm1200_vm3, %v1195_v31, %v4491_v40  ;;  %v4625_v37 = vpop.permute.xlu1 %1654  ;;  %v1824_v19 = vmul.f32 %v4283_v21, %v1791_v6  ;;  %v5917_v6 = vld [vmem:[#allocation19_spill] sm:$0xff] }
 0x240   : > { %v1240_v57 = vmul.f32 %v3934_v28, %v1202_v55  ;;  %v1237_v40 = vmul.f32 %v3934_v28, %v1214_v30  ;;  %v1674_v32 = vsel %vm1668_vm2, %v4558_v11, %v4625_v37 }
 0x241   : > { %v1489_v38 = vadd.f32 %v1473_v34, %v1372_v18  ;;  %v1707_v7 = vmul.f32 %v4256_v62, %v1674_v32 }
 0x242   : > { %v1256_v16 = vadd.f32 %v1240_v57, %v1139_v46  ;;  %v1253_v63 = vadd.f32 %v1237_v40, %v1136_v13  ;;  %v5915_v40 = vld [vmem:[#allocation26_spill] sm:$0xff]  ;;  %v5916_v13 = vld [vmem:[#allocation25_spill] sm:$0xff] }
 0x243   : > { %1408 = vrot.lane.b32.xlu2 %v4583_v29, %s3349_s7 }
 0x244   : > { %1658 = vrot.lane.b32.xlu0 %v4524_v20, %s3347_s6  ;;  %1666 = vrot.lane.b32.xlu1 %v4158_v52, %s3347_s6 }
 0x245   : > { %v1538_v5 = vpop.permute.xlu2 %1537 }
 0x246   : > { %v1557_v8 = vsel %vm1551_vm15, %v1530_v45, %v1538_v5  ;;  %v1312_v15 = vpop.permute.xlu0 %1311 }
 0x247   : > { %v1590_v49 = vmul.f32 %v4143_v1, %v1557_v8  ;;  %v1319_v58 = vsel %vm1317_vm7, %v1304_v9, %v1312_v15  ;;  %v1331_v28 = vsel %vm1317_vm7, %v1312_v15, %v4533_v36  ;;  %v4655_v24 = vpop.permute.xlu1 %1172 }
 0x248   : > { %v1354_v2 = vmul.f32 %v4035_v54, %v1331_v28  ;;  %v1357_v45 = vmul.f32 %v4035_v54, %v1319_v58 }
 0x249   : > { %v1606_v9 = vadd.f32 %v1590_v49, %v1489_v38 }
 0x24a   : > { %v1370_v18 = vadd.f32 %v1354_v2, %v1253_v63  ;;  %v1373_v36 = vadd.f32 %v1357_v45, %v1256_v16  ;;  %v5919_v2 = vld [vmem:[#allocation17_spill] sm:$0xff] }
 0x24b   : > { %v1723_v31 = vadd.f32 %v1707_v7, %v1606_v9  ;;  %1525 = vrot.lane.b32.xlu2 %v4583_v29, %s3350_s8 }
 0x24c   : > { %1880 = vrot.lane.b32.xlu0 %v4064_v35, %s3351_s9  ;;  %1886 = vrot.lane.b32.xlu1 %v3858_v23, %s3351_s9 }
 0x24d   : > { %v4662_v52 = vadd.f32 %v1824_v19, %v1723_v31  ;;  %v4664_v34 = vpop.permute.xlu2 %1779  ;;  %v5920_v19 = vld [vmem:[#allocation21_spill] sm:$0xff] }
 0x24e   : > { %v1429_v54 = vpop.permute.xlu0 %1428 }
 0x24f   : > { %v1436_v55 = vsel %vm1434_vm13, %v1421_v0, %v1429_v54  ;;  %v1448_v30 = vsel %vm1434_vm13, %v1429_v54, %v4561_v60  ;;  %v4675_v57 = vpop.permute.xlu1 %1289 }
 0x250   : > { %v1471_v35 = vmul.f32 %v4172_v12, %v1448_v30  ;;  %v1474_v46 = vmul.f32 %v4172_v12, %v1436_v55  ;;  %v4725_v55 = vld [vmem:[%s5828_s3] sm:$0xff] }
 0x252   : > { %v1487_v38 = vadd.f32 %v1471_v35, %v1370_v18  ;;  %v1490_v16 = vadd.f32 %v1474_v46, %v1373_v36  ;;  %v1787_v18 = vsel %vm1785_vm1, %v4600_v50, %v4664_v34 }
 0x253   : > { %1650 = vrot.lane.b32.xlu2 %v4540_v26, %s3347_s6  ;;  %v1825_v50 = vmul.f32 %v4283_v21, %v1787_v18  ;;  %v5924_v18 = vld [vmem:[#allocation35_spill] sm:$0xff] }
 0x254   : > { %1894 = vrot.lane.b32.xlu0 %v5915_v40, %s3351_s9  ;;  %1896 = vrot.lane.b32.xlu1 %v5916_v13, %s3351_s9 }
 0x255   : > { %v1181_v0 = vpop.permute.xlu2 %1180 }
 0x256   : > { %v1211_v60 = vsel %vm1200_vm3, %v4655_v24, %v1181_v0  ;;  %v1546_v23 = vpop.permute.xlu0 %1545 }
 0x257   : > { %v1553_v32 = vsel %vm1551_vm15, %v1538_v5, %v1546_v23  ;;  %v1565_v12 = vsel %vm1551_vm15, %v1546_v23, %v4578_v27  ;;  %v4693_v49 = vpop.permute.xlu1 %1406  ;;  %v1242_v63 = vmul.f32 %v5917_v6, %v1211_v60  ;;  %v4701_v5 = vld [vmem:[%s5828_s3 + $0x10] sm:$0xff]  ;;  %v5918_v27 = vld [vmem:[#allocation29_spill] sm:$0xff] }
 0x258   : > { %v1588_v8 = vmul.f32 %v4143_v1, %v1565_v12  ;;  %v1591_v15 = vmul.f32 %v4143_v1, %v1553_v32  ;;  %v1141_v1 = vmul.f32 %v5919_v2, %v4375_v61  ;;  %v5922_v32 = vld [vmem:[#allocation23_spill] sm:$0xff] }
 0x25a   : > { %v4695_v58 = vadd.f32 %v1588_v8, %v1487_v38  ;;  %v1607_v28 = vadd.f32 %v1591_v15, %v1490_v16  ;;  %v1258_v36 = vadd.f32 %v1242_v63, %v1141_v1  ;;  %v1142_v1 = vmul.f32 %v5919_v2, %v4352_v4 }
 0x25b   : > { %1198 = vrot.lane.b32.xlu2 %v5918_v27, %s3346_s22 }
 0x25c   : > { %1811 = vperm.xlu0 %3063, %v4701_v5   ;;  %1920 = vperm.xlu1 %3064, %v4725_v55  }
 0x25d   : > { %v1298_v45 = vpop.permute.xlu2 %1297 }
 0x25e   : > { %v1328_v7 = vsel %vm1317_vm7, %v4675_v57, %v1298_v45  ;;  %v4711_v9 = vpop.permute.xlu0 %1662 }
 0x25f   : > { %v1359_v31 = vmul.f32 %v5920_v19, %v1328_v7  ;;  %v1670_v54 = vsel %vm1668_vm2, %v4625_v37, %v4711_v9  ;;  %v4730_v46 = vpop.permute.xlu1 %1523  ;;  %v5921_v37 = vld [vmem:[#allocation30_spill] sm:$0xff] }
 0x260   : > { %v1708_v30 = vmul.f32 %v4256_v62, %v1670_v54 }
 0x261   : > { %v1375_v35 = vadd.f32 %v1359_v31, %v1258_v36 }
 0x262   : > { %v1724_v38 = vadd.f32 %v1708_v30, %v1607_v28  ;;  %v5923_v28 = vld [vmem:[#allocation31_spill] sm:$0xff] }
 0x263   : > { %1315 = vrot.lane.b32.xlu2 %v5921_v37, %s3348_s5 }
 0x264   : > { %1767 = vrot.lane.b32.xlu0 %v4540_v26, %s3352_s27  ;;  %v4736_v16 = vadd.f32 %v1825_v50, %v1724_v38  ;;  %1636 = vrot.lane.b32.xlu1 %v3836_v43, %s3347_s6 }
 0x265   : > { %v1415_v40 = vpop.permute.xlu2 %1414 }
 0x266   : > { %v1445_v60 = vsel %vm1434_vm13, %v4693_v49, %v1415_v40  ;;  %v1189_v23 = vpop.permute.xlu0 %1188 }
 0x267   : > { %v1476_v12 = vmul.f32 %v5922_v32, %v1445_v60  ;;  %v1207_v13 = vsel %vm1200_vm3, %v1181_v0, %v1189_v23  ;;  %v4746_v15 = vpop.permute.xlu1 %1656  ;;  %v5925_v60 = vld [vmem:[#allocation22_spill] sm:$0xff] }
 0x268   : > { %v1243_v63 = vmul.f32 %v5917_v6, %v1207_v13 }
 0x269   : > { %v1492_v8 = vadd.f32 %v1476_v12, %v1375_v35  ;;  %v1143_v12 = vmul.f32 %v5919_v2, %v5925_v60 }
 0x26b   : > { %1432 = vrot.lane.b32.xlu2 %v5923_v28, %s3349_s7 }
 0x26c   : > { %1882 = vrot.lane.b32.xlu0 %v4375_v61, %s3351_s9  ;;  %v1259_v61 = vadd.f32 %v1243_v63, %v1142_v1  ;;  %1775 = vrot.lane.b32.xlu1 %v4524_v20, %s3352_s27 }
 0x26d   : > { %v1532_v27 = vpop.permute.xlu2 %1531 }
 0x26e   : > { %v1562_v0 = vsel %vm1551_vm15, %v4730_v46, %v1532_v27  ;;  %v1306_v7 = vpop.permute.xlu0 %1305 }
 0x26f   : > { %v1593_v36 = vmul.f32 %v5924_v18, %v1562_v0  ;;  %v1324_v31 = vsel %vm1317_vm7, %v1298_v45, %v1306_v7  ;;  %v1197_v35 = vpop.permute.xlu1 %1196  ;;  %v4774_v45 = vld [vmem:[%s5828_s3 + $0x18] sm:$0xff] }
 0x270   : > { %v1360_v54 = vmul.f32 %v5920_v19, %v1324_v31  ;;  %v1203_v38 = vsel %vm1200_vm3, %v1189_v23, %v1197_v35  ;;  %v1215_v37 = vsel %vm1200_vm3, %v1197_v35, %v4655_v24 }
 0x271   : > { %v4764_v30 = vadd.f32 %v1593_v36, %v1492_v8  ;;  %v1244_v13 = vmul.f32 %v5917_v6, %v1203_v38  ;;  %v1241_v63 = vmul.f32 %v5917_v6, %v1215_v37 }
 0x272   : > { %v1376_v50 = vadd.f32 %v1360_v54, %v1259_v61 }
 0x273   : > { %1888 = vrot.lane.b32.xlu2 %v4225_v17, %s3351_s9  ;;  %v1260_v8 = vadd.f32 %v1244_v13, %v1143_v12  ;;  %v1140_v17 = vmul.f32 %v5919_v2, %v4269_v10  ;;  %v3354_v2 = vmov 4  }
 0x274   : > { %1815 = vperm.xlu0 %3063, %v4774_v45   ;;  %1890 = vrot.lane.b32.xlu1 %v4352_v4, %s3351_s9 }
 0x275   : > { %v4782_v23 = vpop.permute.xlu2 %1648  ;;  %v1257_v4 = vadd.f32 %v1241_v63, %v1140_v17  ;;  %v3218_v17 = vld [vmem:[%s5828_s3 + $0x8] sm:$0xff] }
 0x276   : > { %v1423_v28 = vpop.permute.xlu0 %1422 }
 0x277   : > { %v1441_v24 = vsel %vm1434_vm13, %v1415_v40, %v1423_v28  ;;  %v1314_v0 = vpop.permute.xlu1 %1313 }
 0x278   : > { %v1477_v1 = vmul.f32 %v5922_v32, %v1441_v24  ;;  %v1320_v31 = vsel %vm1317_vm7, %v1306_v7, %v1314_v0  ;;  %v1332_v61 = vsel %vm1317_vm7, %v1314_v0, %v4675_v57  ;;  %v1675_v57 = vsel %vm1668_vm2, %v4782_v23, %v4746_v15 }
 0x279   : > { %v1358_v6 = vmul.f32 %v5920_v19, %v1332_v61  ;;  %v1361_v40 = vmul.f32 %v5920_v19, %v1320_v31  ;;  %v5926_v19 = vld [vmem:[#allocation36_spill] sm:$0xff] }
 0x27a   : > { %v1493_v36 = vadd.f32 %v1477_v1, %v1376_v50  ;;  %v1711_v60 = vmul.f32 %v5926_v19, %v1675_v57 }
 0x27b   : > { %1698 = vperm.xlu2 %3062, %v4774_v45   ;;  %v1374_v35 = vadd.f32 %v1358_v6, %v1257_v4  ;;  %v1377_v7 = vadd.f32 %v1361_v40, %v1260_v8 }
 0x27c   : > { %1753 = vrot.lane.b32.xlu0 %v3836_v43, %s3352_s27  ;;  %1928 = vperm.xlu1 %3064, %v4701_v5  }
 0x27d   : > { %3066 = vset.pattern.permute.xlu0 %v3354_v2  ;;  %v4802_v54 = vpop.permute.xlu2 %1765 }
 0x27e   : > { %v1540_v50 = vpop.permute.xlu0 %1539 }
 0x27f   : > { %v1558_v38 = vsel %vm1551_vm15, %v1532_v27, %v1540_v50  ;;  %v1431_v12 = vpop.permute.xlu1 %1430 }
 0x280   : > { %v1594_v37 = vmul.f32 %v5924_v18, %v1558_v38  ;;  %v1437_v8 = vsel %vm1434_vm13, %v1423_v28, %v1431_v12  ;;  %v1449_v24 = vsel %vm1434_vm13, %v1431_v12, %v4693_v49 }
 0x281   : > { %v1475_v27 = vmul.f32 %v5922_v32, %v1449_v24  ;;  %v1478_v63 = vmul.f32 %v5922_v32, %v1437_v8  ;;  %v5930_v24 = vld [vmem:[#allocation28_spill] sm:$0xff] }
 0x282   : > { %v1610_v13 = vadd.f32 %v1594_v37, %v1493_v36 }
 0x283   : > { %3065 = vset.pattern.permute.xlu2 %v3353_v25  ;;  %v1491_v0 = vadd.f32 %v1475_v27, %v1374_v35  ;;  %v1494_v49 = vadd.f32 %v1478_v63, %v1377_v7  ;;  %v5931_v63 = vld [vmem:[#allocation18_spill] sm:$0xff] }
 0x284   : > { %1892 = vrot.lane.b32.xlu0 %v4524_v20, %s3351_s9  ;;  %v4823_v1 = vadd.f32 %v1711_v60, %v1610_v13  ;;  %1924 = vperm.xlu2 %3065, %v3218_v17  }
 0x285   : > { %v4828_v28 = vpop.permute.xlu2 %1664  ;;  %1755 = vrot.lane.b32.xlu1 %v4037_v14, %s3352_s27 }
 0x286   : > { %v4830_v36 = vpop.permute.xlu0 %1773  ;;  %3067 = vset.pattern.permute.xlu1 %v3354_v2  ;;  %v1671_v61 = vsel %vm1668_vm2, %v4746_v15, %v4828_v28 }
 0x287   : > { %v4834_v25 = vpop.permute.xlu1 %1781  ;;  %v1712_v35 = vmul.f32 %v5926_v19, %v1671_v61 }
 0x28c   : > { %1968 = vperm.xlu0 %3066, %v4725_v55   ;;  %1638 = vrot.lane.b32.xlu2 %v4037_v14, %s3347_s6  ;;  %v5927_v55 = vld [vmem:[#allocation32_spill] sm:$0xff] }
 0x28d   : > { %v4839_v32 = vpop.permute.xlu2 %1174  ;;  %1900 = vrot.lane.b32.xlu1 %v5927_v55, %s3351_s9  ;;  %v5932_v55 = vld [vmem:[#allocation24_spill] sm:$0xff] }
 0x28e   : > { %v1548_v31 = vpop.permute.xlu0 %1547 }
 0x28f   : > { %v1554_v4 = vsel %vm1551_vm15, %v1540_v50, %v1548_v31  ;;  %v1566_v6 = vsel %vm1551_vm15, %v1548_v31, %v4730_v46  ;;  %v1191_v7 = vpop.permute.xlu1 %1190  ;;  %v5928_v46 = vld [vmem:[#allocation33_spill] sm:$0xff] }
 0x290   : > { %v1592_v40 = vmul.f32 %v5924_v18, %v1566_v6  ;;  %v1595_v2 = vmul.f32 %v5924_v18, %v1554_v4 }
 0x292   : > { %v4855_v57 = vadd.f32 %v1592_v40, %v1491_v0  ;;  %v1611_v15 = vadd.f32 %v1595_v2, %v1494_v49  ;;  %v1145_v0 = vmul.f32 %v5931_v63, %v4540_v26  ;;  %v1146_v49 = vmul.f32 %v5931_v63, %v4524_v20 }
 0x294   : > { %1872 = vrot.lane.b32.xlu0 %v4037_v14, %s3351_s9  ;;  %v4859_v50 = vadd.f32 %v1712_v35, %v1611_v15  ;;  %1783 = vrot.lane.b32.xlu2 %v5928_v46, %s3352_s27  ;;  %v5929_v14 = vld [vmem:[#allocation20_spill] sm:$0xff] }
 0x295   : > { %v4863_v38 = vpop.permute.xlu2 %1291  ;;  %1972 = vperm.xlu1 %3067, %v3218_v17  }
 0x296   : > { %v1183_v37 = vpop.permute.xlu0 %1182 }
 0x297   : > { %v1208_v18 = vsel %vm1200_vm3, %v1183_v37, %v1191_v7  ;;  %v1212_v60 = vsel %vm1200_vm3, %v4839_v32, %v1183_v37  ;;  %v1308_v12 = vpop.permute.xlu1 %1307 }
 0x298   : > { %v1246_v13 = vmul.f32 %v5929_v14, %v1212_v60  ;;  %v1247_v8 = vmul.f32 %v5929_v14, %v1208_v18 }
 0x29a   : > { %v1262_v4 = vadd.f32 %v1246_v13, %v1145_v0  ;;  %v1263_v6 = vadd.f32 %v1247_v8, %v1146_v49  ;;  %v5933_v13 = vld [vmem:[#allocation34_spill] sm:$0xff] }
 0x29c   : > { %1874 = vrot.lane.b32.xlu0 %v4269_v10, %s3351_s9  ;;  %1898 = vrot.lane.b32.xlu2 %v5930_v24, %s3351_s9 }
 0x29d   : > { %v4876_v27 = vpop.permute.xlu2 %1408  ;;  %1757 = vrot.lane.b32.xlu1 %v4269_v10, %s3352_s27 }
 0x29e   : > { %v1300_v17 = vpop.permute.xlu0 %1299 }
 0x29f   : > { %v1325_v31 = vsel %vm1317_vm7, %v1300_v17, %v1308_v12  ;;  %v1329_v61 = vsel %vm1317_vm7, %v4863_v38, %v1300_v17  ;;  %v1425_v35 = vpop.permute.xlu1 %1424 }
 0x2a0   : > { %v1363_v40 = vmul.f32 %v5932_v55, %v1329_v61  ;;  %v1364_v2 = vmul.f32 %v5932_v55, %v1325_v31 }
 0x2a2   : > { %v1379_v15 = vadd.f32 %v1363_v40, %v1262_v4  ;;  %v1380_v20 = vadd.f32 %v1364_v2, %v1263_v6 }
 0x2a4   : > { %1640 = vrot.lane.b32.xlu2 %v4269_v10, %s3347_s6 }
 0x2a5   : > { %v1526_v46 = vpop.permute.xlu2 %1525  ;;  %1976 = vperm.xlu1 %3067, %v4701_v5   ;;  %v5934_v5 = vld [vmem:[#allocation37_spill] sm:$0xff] }
 0x2a6   : > { %v1417_v37 = vpop.permute.xlu0 %1416 }
 0x2a7   : > { %v1442_v18 = vsel %vm1434_vm13, %v1417_v37, %v1425_v35  ;;  %v1446_v60 = vsel %vm1434_vm13, %v4876_v27, %v1417_v37  ;;  %v1542_v0 = vpop.permute.xlu1 %1541 }
 0x2a8   : > { %v1480_v8 = vmul.f32 %v5933_v13, %v1446_v60  ;;  %v1481_v24 = vmul.f32 %v5933_v13, %v1442_v18 }
 0x2aa   : > { %v1496_v49 = vadd.f32 %v1480_v8, %v1379_v15  ;;  %v1497_v17 = vadd.f32 %v1481_v24, %v1380_v20 }
 0x2ac   : > { %1884 = vrot.lane.b32.xlu2 %v4540_v26, %s3351_s9 }
 0x2ad   : > { %v4903_v10 = vpop.permute.xlu2 %1650  ;;  %1980 = vperm.xlu1 %3067, %v4774_v45  }
 0x2ae   : > { %v1534_v31 = vpop.permute.xlu0 %1533 }
 0x2af   : > { %v1559_v61 = vsel %vm1551_vm15, %v1534_v31, %v1542_v0  ;;  %v1563_v4 = vsel %vm1551_vm15, %v1526_v46, %v1534_v31  ;;  %v1550_v2 = vpop.permute.xlu1 %1549 }
 0x2b0   : > { %v1597_v6 = vmul.f32 %v5934_v5, %v1563_v4  ;;  %v1598_v40 = vmul.f32 %v5934_v5, %v1559_v61  ;;  %v1555_v26 = vsel %vm1551_vm15, %v1542_v0, %v1550_v2  ;;  %v1567_v37 = vsel %vm1551_vm15, %v1550_v2, %v1526_v46 }
 0x2b2   : > { %v4912_v15 = vadd.f32 %v1597_v6, %v1496_v49  ;;  %v1614_v20 = vadd.f32 %v1598_v40, %v1497_v17  ;;  %v5935_v49 = vld [vmem:[#allocation27_spill] sm:$0xff] }
 0x2b3   : > { %v1147_v17 = vmul.f32 %v5931_v63, %v5935_v49 }
 0x2b4   : > { %1932 = vperm.xlu2 %3065, %v4774_v45   ;;  %v1144_v45 = vmul.f32 %v5931_v63, %v4583_v29 }
 0x2b5   : > { %v1199_v18 = vpop.permute.xlu2 %1198 }
 0x2b6   : > { %v1204_v60 = vsel %vm1200_vm3, %v1191_v7, %v1199_v18  ;;  %v1216_v8 = vsel %vm1200_vm3, %v1199_v18, %v4839_v32  ;;  %v1659_v24 = vpop.permute.xlu0 %1658  ;;  %vm1902_vm3 = vcmp.lt.s32.totalorder %v3960_v47, 7 }
 0x2b7   : > { %v1248_v31 = vmul.f32 %v5929_v14, %v1204_v60  ;;  %v4927_v61 = vpop.permute.xlu1 %1666  ;;  %v1245_v46 = vmul.f32 %v5929_v14, %v1216_v8 }
 0x2b9   : > { %v1264_v0 = vadd.f32 %v1248_v31, %v1147_v17  ;;  %v1261_v40 = vadd.f32 %v1245_v46, %v1144_v45  ;;  %v1599_v31 = vmul.f32 %v5934_v5, %v1555_v26 }
 0x2bc   : > { %1642 = vrot.lane.b32.xlu2 %v4583_v29, %s3347_s6  ;;  %s3269_s6 = scalar_lea.hbm %s5829_s4, 256 }
 0x2bd   : > { %v1316_v7 = vpop.permute.xlu2 %1315 }
 0x2be   : > { %v1321_v32 = vsel %vm1317_vm7, %v1308_v12, %v1316_v7  ;;  %v1333_v4 = vsel %vm1317_vm7, %v1316_v7, %v4863_v38  ;;  %v4939_v6 = vpop.permute.xlu0 %1880 }
 0x2bf   : > { %v1362_v2 = vmul.f32 %v5932_v55, %v1333_v4  ;;  %v1365_v14 = vmul.f32 %v5932_v55, %v1321_v32  ;;  %v1887_v8 = vpop.permute.xlu1 %1886 }
 0x2c1   : > { %v1378_v18 = vadd.f32 %v1362_v2, %v1261_v40  ;;  %v1381_v60 = vadd.f32 %v1365_v14, %v1264_v0  ;;  %v1672_v40 = vsel %vm1668_vm2, %v1659_v24, %v4927_v61  ;;  %v1676_v2 = vsel %vm1668_vm2, %v4903_v10, %v1659_v24 }
 0x2c4   : > { %1870 = vrot.lane.b32.xlu2 %v3836_v43, %s3351_s9 }
 0x2c5   : > { %v1433_v63 = vpop.permute.xlu2 %1432 }
 0x2c6   : > { %v1438_v12 = vsel %vm1434_vm13, %v1425_v35, %v1433_v63  ;;  %v1450_v38 = vsel %vm1434_vm13, %v1433_v63, %v4876_v27  ;;  %v4950_v49 = vpop.permute.xlu0 %1894  ;;  %v1792_v27 = vsel %vm1785_vm1, %v4802_v54, %v4830_v36 }
 0x2c7   : > { %v1479_v17 = vmul.f32 %v5933_v13, %v1450_v38  ;;  %v1482_v55 = vmul.f32 %v5933_v13, %v1438_v12  ;;  %v4955_v45 = vpop.permute.xlu1 %1896 }
 0x2c9   : > { %v1495_v0 = vadd.f32 %v1479_v17, %v1378_v18  ;;  %v1498_v46 = vadd.f32 %v1482_v55, %v1381_v60 }
 0x2cb   : > { %v1615_v43 = vadd.f32 %v1599_v31, %v1498_v46 }
 0x2cc   : > { %1759 = vrot.lane.b32.xlu2 %v4583_v29, %s3352_s27 }
 0x2cd   : > { %v4960_v35 = vpop.permute.xlu2 %1888 }
 0x2ce   : > { %v1904_v13 = vsel %vm1902_vm3, %v4960_v35, %v4955_v45  ;;  %v4970_v26 = vpop.permute.xlu0 %1811 }
 0x2cf   : > { %v1828_v7 = vmul.f32 %v4970_v26, %v1792_v27  ;;  %v4976_v4 = vpop.permute.xlu1 %1920  ;;  %v1903_v27 = vsel %vm1902_vm3, %v1887_v8, %v4950_v49 }
 0x2d1   : > { %v4974_v32 = vadd.f32 %v1828_v7, %v4823_v1 }
 0x2d4   : > { %1876 = vrot.lane.b32.xlu2 %v4583_v29, %s3351_s9  ;;  %v1788_v29 = vsel %vm1785_vm1, %v4830_v36, %v4834_v25  ;;  %s5754_s9 = scalar_lea.vmem [#allocation6], %s2856_s26  ;;  %s2944_s26 = sshll.u32 %s3323_s18, 7 }
 0x2d5   : > { %v4986_v14 = vpop.permute.xlu2 %1698  ;;  %v1829_v38 = vmul.f32 %v4970_v26, %v1788_v29  ;;  %s2757_s11 = scalar_lea.hbm %s5829_s4, %s2944_s26  ;;  %s2758_s12 = sshll.u32 %s5754_s9, 4  ;;  %s2759_s12 = int_to_ptr.vmem [resolvable:$true] %s2758_s12 }
 0x2d6   : > { %v1715_v18 = vmul.f32 %v4986_v14, %v1676_v2  ;;  %v1716_v1 = vmul.f32 %v4986_v14, %v1672_v40  ;;  %v4990_v60 = vpop.permute.xlu0 %1767  ;;  %v1938_v2 = vmul.f32 %v4976_v4, %v1903_v27  ;;  %s2760_s13 = sshll.u32 %s2757_s11, 4  ;;  %s2761_s13 = int_to_ptr.hbm [resolvable:$true] %s2760_s13 }
 0x2d7   : > { %v1637_v17 = vpop.permute.xlu1 %1636  ;;  %s3263_s18 = sshra.s32 %s2761_s13, 4  ;;  %s3264_s18 = int_to_ptr.hbm [resolvable:$true] %s3263_s18 }
 0x2d8   : > { %v4992_v63 = vadd.f32 %v1715_v18, %v1614_v20  ;;  %v1732_v12 = vadd.f32 %v1716_v1, %v1615_v43  ;;  %v1677_v24 = vsel %vm1668_vm2, %v1637_v17, %v4304_v56  ;;  %v1681_v55 = vsel %vm1668_vm2, %v4521_v42, %v1637_v17  ;;  %v5936_v43 = vld [vmem:[#allocation38_spill] sm:$0xff]  ;;  %s3265_s21 = scalar_lea.hbm %s3264_s18, 128  ;;  %p3270_p7 = scmp.lt.s32.totalorder %s3264_s18, %s5829_s4 }
 0x2d9   : > { %v1596_v20 = vmul.f32 %v5934_v5, %v1567_v37  ;;  %v1701_v31 = vmul.f32 %v4205_v22, %v1681_v55  ;;  %v1702_v46 = vmul.f32 %v4205_v22, %v1677_v24  ;;  %v1907_v36 = vsel %vm1902_vm3, %v5936_v43, %v1887_v8  ;;  %p3266_p4 = scmp.ne.s32.totalorder %s3264_s18, %s3265_s21  ;;  %p3271_p8 = scmp.lt.s32.totalorder %s3269_s6, %s3265_s21 }
 0x2da   : > { %v5021_v5 = vadd.f32 %v1829_v38, %v4859_v50  ;;  %v1937_v37 = vmul.f32 %v4976_v4, %v1907_v36 }
 0x2db   : > { %v1717_v56 = vadd.f32 %v1701_v31, %v4507_v33  ;;  %v1718_v7 = vadd.f32 %v1702_v46, %v4408_v51  ;;  %v5023_v22 = vadd.f32 %v1596_v20, %v1495_v0  ;;  %v1954_v51 = vadd.f32 %v1938_v2, %v4546_v44  ;;  %p3267_p5 = pnand %p3266_p4, %p3434_p9  ;;  %p3272_p10 = por %p3271_p8, %p3270_p7 }
 0x2dc   : > { %v5030_v8 = vadd.f32 %v1937_v37, %v4476_v3 }
 0x2dd   : > { %p3268_p6 = pneg %p3267_p5 }
 0x2de   : > { %v5016_v40 = vpop.permute.xlu0 %1882  ;;  %v5018_v42 = vpop.permute.xlu2 %1924 }
 0x2df   : > { %v5027_v18 = vpop.permute.xlu1 %1775  ;;  %v1942_v33 = vmul.f32 %v5018_v42, %v1904_v13  ;;  %p3273_p13 = pnand %p3272_p10, %p3268_p6 }
 0x2e1   : > { %v1958_v24 = vadd.f32 %v1942_v33, %v4736_v16 }
 0x2e6   : > { %v5034_v1 = vpop.permute.xlu0 %1815  ;;  %v1639_v29 = vpop.permute.xlu2 %1638 }
 0x2e7   : > { %v1678_v50 = vsel %vm1668_vm2, %v1639_v29, %v4558_v11  ;;  %v1682_v0 = vsel %vm1668_vm2, %v4711_v9, %v1639_v29  ;;  %v5044_v17 = vpop.permute.xlu1 %1890 }
 0x2e8   : > { %v1705_v38 = vmul.f32 %v4256_v62, %v1682_v0  ;;  %v1706_v3 = vmul.f32 %v4256_v62, %v1678_v50 }
 0x2ea   : > { %v1721_v44 = vadd.f32 %v1705_v38, %v4695_v58  ;;  %v1722_v13 = vadd.f32 %v1706_v3, %v4596_v39 }
 0x2ee   : > { %v1754_v55 = vpop.permute.xlu0 %1753  ;;  %v5049_v20 = vpop.permute.xlu2 %1783 }
 0x2ef   : > { %v1794_v11 = vsel %vm1785_vm1, %v1754_v55, %v4423_v59  ;;  %v1798_v9 = vsel %vm1785_vm1, %v4466_v41, %v1754_v55  ;;  %v1789_v62 = vsel %vm1785_vm1, %v5027_v18, %v5049_v20  ;;  %v1929_v31 = vpop.permute.xlu1 %1928 }
 0x2f0   : > { %v1818_v39 = vmul.f32 %v4230_v48, %v1798_v9  ;;  %v1819_v58 = vmul.f32 %v4230_v48, %v1794_v11  ;;  %v1833_v16 = vmul.f32 %v5034_v1, %v1789_v62 }
 0x2f2   : > { %v5064_v46 = vadd.f32 %v1818_v39, %v1717_v56  ;;  %v5066_v36 = vadd.f32 %v1819_v58, %v1718_v7  ;;  %v5068_v59 = vadd.f32 %v1833_v16, %v1732_v12 }
 0x2f6   : > { %v5070_v27 = vpop.permute.xlu0 %1892  ;;  %v1899_v41 = vpop.permute.xlu2 %1898 }
 0x2f7   : > { %v1756_v37 = vpop.permute.xlu1 %1755 }
 0x2f8   : > { %v1795_v2 = vsel %vm1785_vm1, %v1756_v37, %v4605_v53  ;;  %v1799_v48 = vsel %vm1785_vm1, %v4664_v34, %v1756_v37 }
 0x2f9   : > { %v1822_v33 = vmul.f32 %v4283_v21, %v1799_v48  ;;  %v1823_v56 = vmul.f32 %v4283_v21, %v1795_v2 }
 0x2fb   : > { %v1838_v7 = vadd.f32 %v1822_v33, %v1721_v44  ;;  %v1839_v29 = vadd.f32 %v1823_v56, %v1722_v13 }
 0x2fe   : > { %v5080_v12 = vpop.permute.xlu0 %1968  ;;  %v1641_v50 = vpop.permute.xlu2 %1640 }
 0x2ff   : > { %v1679_v0 = vsel %vm1668_vm2, %v1641_v50, %v4782_v23  ;;  %v1683_v53 = vsel %vm1668_vm2, %v4828_v28, %v1641_v50  ;;  %v5090_v3 = vpop.permute.xlu1 %1900  ;;  %v5105_v9 = vadd.f32 %v5080_v12, %v1954_v51 }
 0x300   : > { %v1709_v38 = vmul.f32 %v5926_v19, %v1683_v53  ;;  %v1710_v34 = vmul.f32 %v5926_v19, %v1679_v0  ;;  %v1905_v53 = vsel %vm1902_vm3, %v5044_v17, %v1899_v41 }
 0x301   : > { %v2042_v37 = vmul.f32 %v5105_v9, %v5105_v9 }
 0x302   : > { %v1725_v21 = vadd.f32 %v1709_v38, %v4855_v57  ;;  %v1726_v44 = vadd.f32 %v1710_v34, %v4764_v30 }
 0x306   : > { %v1873_v13 = vpop.permute.xlu0 %1872  ;;  %v5094_v55 = vpop.permute.xlu2 %1884 }
 0x307   : > { %v1912_v23 = vsel %vm1902_vm3, %v1873_v13, %v4939_v6  ;;  %v1916_v28 = vsel %vm1902_vm3, %v4955_v45, %v1873_v13  ;;  %v1973_v57 = vpop.permute.xlu1 %1972 }
 0x308   : > { %v1939_v11 = vmul.f32 %v5018_v42, %v1916_v28  ;;  %v1940_v19 = vmul.f32 %v5018_v42, %v1912_v23  ;;  %v5107_v39 = vadd.f32 %v1973_v57, %v1958_v24  ;;  %v1908_v24 = vsel %vm1902_vm3, %v4939_v6, %v4960_v35 }
 0x309   : > { %v1946_v28 = vmul.f32 %v1929_v31, %v1905_v53 }
 0x30a   : > { %v1955_v30 = vadd.f32 %v1939_v11, %v1838_v7  ;;  %v1956_v62 = vadd.f32 %v1940_v19, %v1839_v29  ;;  %v2030_v45 = vadd.f32 %v5107_v39, %v5105_v9  ;;  %v2046_v2 = vmul.f32 %v5107_v39, %v5107_v39 }
 0x30b   : > { %v1941_v29 = vmul.f32 %v5018_v42, %v1908_v24  ;;  %v1909_v42 = vsel %vm1902_vm3, %v5016_v40, %v5044_v17 }
 0x30c   : > { %v5109_v58 = vadd.f32 %v1973_v57, %v1955_v30  ;;  %v5111_v16 = vadd.f32 %v1973_v57, %v1956_v62  ;;  %v2082_v33 = vadd.f32 %v2046_v2, %v2042_v37  ;;  %v1945_v23 = vmul.f32 %v1929_v31, %v1909_v42 }
 0x30d   : > { %v1957_v34 = vadd.f32 %v1941_v29, %v4662_v52  ;;  %v1793_v52 = vsel %vm1785_vm1, %v4990_v60, %v5027_v18 }
 0x30e   : > { %v1875_v51 = vpop.permute.xlu0 %1874  ;;  %v5119_v48 = vpop.permute.xlu2 %1932  ;;  %v1832_v17 = vmul.f32 %v5034_v1, %v1793_v52 }
 0x30f   : > { %v1913_v56 = vsel %vm1902_vm3, %v1875_v51, %v5016_v40  ;;  %v1917_v7 = vsel %vm1902_vm3, %v1899_v41, %v1875_v51  ;;  %v1758_v38 = vpop.permute.xlu1 %1757  ;;  %v5147_v11 = vadd.f32 %v1973_v57, %v1957_v34  ;;  %v1961_v40 = vadd.f32 %v1945_v23, %v4974_v32 }
 0x310   : > { %v1943_v50 = vmul.f32 %v1929_v31, %v1917_v7  ;;  %v1944_v0 = vmul.f32 %v1929_v31, %v1913_v56  ;;  %v1796_v6 = vsel %vm1785_vm1, %v1758_v38, %v4802_v54  ;;  %v1800_v35 = vsel %vm1785_vm1, %v4834_v25, %v1758_v38 }
 0x311   : > { %v1826_v13 = vmul.f32 %v4970_v26, %v1800_v35  ;;  %v1827_v41 = vmul.f32 %v4970_v26, %v1796_v6  ;;  %v5151_v25 = vadd.f32 %v5080_v12, %v5030_v8  ;;  %v1962_v26 = vadd.f32 %v1946_v28, %v5021_v5 }
 0x312   : > { %v2045_v8 = vmul.f32 %v5147_v11, %v5147_v11  ;;  %v1906_v32 = vsel %vm1902_vm3, %v5070_v27, %v5090_v3  ;;  %v1910_v51 = vsel %vm1902_vm3, %v5094_v55, %v5070_v27  ;;  %v1848_v6 = vadd.f32 %v1832_v17, %v4992_v63 }
 0x313   : > { %v1842_v54 = vadd.f32 %v1826_v13, %v1725_v21  ;;  %v1843_v19 = vadd.f32 %v1827_v41, %v1726_v44  ;;  %v2021_v31 = vadd.f32 %v5147_v11, %v5151_v25  ;;  %v2041_v5 = vmul.f32 %v5151_v25, %v5151_v25 }
 0x314   : > { %v1949_v24 = vmul.f32 %v5119_v48, %v1910_v51  ;;  %v1950_v56 = vmul.f32 %v5119_v48, %v1906_v32 }
 0x315   : > { %v1959_v62 = vadd.f32 %v1943_v50, %v1842_v54  ;;  %v1960_v37 = vadd.f32 %v1944_v0, %v1843_v19  ;;  %v2073_v50 = vadd.f32 %v2045_v8, %v2041_v5 }
 0x316   : > { %v1643_v30 = vpop.permute.xlu2 %1642  ;;  %v1965_v23 = vadd.f32 %v1949_v24, %v1848_v6  ;;  %v1966_v63 = vadd.f32 %v1950_v56, %v5068_v59 }
 0x317   : > { %v1977_v21 = vpop.permute.xlu1 %1976  ;;  %v1684_v41 = vsel %vm1668_vm2, %v4927_v61, %v1643_v30  ;;  %v1680_v59 = vsel %vm1668_vm2, %v1643_v30, %v4903_v10 }
 0x318   : > { %v5164_v44 = vadd.f32 %v1977_v21, %v1959_v62  ;;  %v5166_v57 = vadd.f32 %v1977_v21, %v1960_v37  ;;  %v5168_v2 = vadd.f32 %v1977_v21, %v1961_v40  ;;  %v5170_v18 = vadd.f32 %v1977_v21, %v1962_v26 }
 0x31a   : > { %v2022_v7 = vadd.f32 %v2021_v31, %v5168_v2  ;;  %v2031_v29 = vadd.f32 %v2030_v45, %v5170_v18  ;;  %v2049_v0 = vmul.f32 %v5168_v2, %v5168_v2  ;;  %v2050_v53 = vmul.f32 %v5170_v18, %v5170_v18 }
 0x31c   : > { %v2074_v42 = vadd.f32 %v2073_v50, %v2049_v0  ;;  %v2083_v45 = vadd.f32 %v2082_v33, %v2050_v53  ;;  %v2044_v33 = vmul.f32 %v5111_v16, %v5111_v16  ;;  %v2048_v53 = vmul.f32 %v5166_v57, %v5166_v57 }
 0x31e   : > { %v1871_v38 = vpop.permute.xlu2 %1870 }
 0x31f   : > { %v1911_v27 = vsel %vm1902_vm3, %v1871_v38, %v5936_v43  ;;  %v1915_v35 = vsel %vm1902_vm3, %v4950_v49, %v1871_v38  ;;  %v5203_v28 = vpop.permute.xlu1 %1980  ;;  %v2043_v49 = vmul.f32 %v5109_v58, %v5109_v58 }
 0x320   : > { %v1935_v34 = vmul.f32 %v4976_v4, %v1915_v35  ;;  %v1936_v13 = vmul.f32 %v4976_v4, %v1911_v27  ;;  %v5212_v4 = vadd.f32 %v5203_v28, %v1965_v23  ;;  %v5215_v61 = vadd.f32 %v5203_v28, %v1966_v63 }
 0x322   : > { %v1951_v43 = vadd.f32 %v1935_v34, %v5064_v46  ;;  %v1952_v54 = vadd.f32 %v1936_v13, %v5066_v36  ;;  %v1713_v46 = vmul.f32 %v4986_v14, %v1684_v41  ;;  %v2023_v62 = vadd.f32 %v2022_v7, %v5212_v4 }
 0x323   : > { %v2032_v37 = vadd.f32 %v2031_v29, %v5215_v61  ;;  %v2053_v52 = vmul.f32 %v5212_v4, %v5212_v4  ;;  %v2054_v26 = vmul.f32 %v5215_v61, %v5215_v61  ;;  %v2047_v7 = vmul.f32 %v5164_v44, %v5164_v44 }
 0x324   : > { %v5222_v36 = vadd.f32 %v5080_v12, %v1951_v43  ;;  %v5225_v19 = vadd.f32 %v5080_v12, %v1952_v54  ;;  %v2024_v31 = vrot.slane %v2023_v62, 4  ;;  %v1729_v5 = vadd.f32 %v1713_v46, %v5023_v22 }
 0x325   : > { %v2033_v8 = vrot.slane %v2032_v37, 4  ;;  %v2075_v21 = vadd.f32 %v2074_v42, %v2053_v52  ;;  %v2084_v32 = vadd.f32 %v2083_v45, %v2054_v26  ;;  %v1714_v45 = vmul.f32 %v4986_v14, %v1680_v59 }
 0x326   : > { %v2003_v10 = vadd.f32 %v5109_v58, %v5222_v36  ;;  %v2012_v30 = vadd.f32 %v5111_v16, %v5225_v19  ;;  %v2039_v12 = vmul.f32 %v5222_v36, %v5222_v36  ;;  %v2040_v40 = vmul.f32 %v5225_v19, %v5225_v19  ;;  %v1760_v17 = vpop.permute.xlu2 %1759 }
 0x327   : > { %v1801_v56 = vsel %vm1785_vm1, %v5049_v20, %v1760_v17  ;;  %v2025_v29 = vadd.f32 %v2024_v31, %v2023_v62  ;;  %v2076_v50 = vrot.slane %v2075_v21, 4  ;;  %v2085_v0 = vrot.slane %v2084_v32, 4 }
 0x328   : > { %v2055_v51 = vadd.f32 %v2043_v49, %v2039_v12  ;;  %v2064_v24 = vadd.f32 %v2044_v33, %v2040_v40  ;;  %v1830_v38 = vmul.f32 %v5034_v1, %v1801_v56  ;;  %v2004_v6 = vadd.f32 %v2003_v10, %v5164_v44 }
 0x329   : > { %v2013_v22 = vadd.f32 %v2012_v30, %v5166_v57  ;;  %v2026_v27 = vrot.slane %v2025_v29, 2  ;;  %v2034_v35 = vadd.f32 %v2033_v8, %v2032_v37  ;;  %v2077_v42 = vadd.f32 %v2076_v50, %v2075_v21 }
 0x32a   : > { %v1797_v20 = vsel %vm1785_vm1, %v1760_v17, %v4990_v60  ;;  %v1846_v34 = vadd.f32 %v1830_v38, %v1729_v5  ;;  %v2056_v13 = vadd.f32 %v2055_v51, %v2047_v7  ;;  %v2065_v41 = vadd.f32 %v2064_v24, %v2048_v53 }
 0x32b   : > { %v2027_v23 = vadd.f32 %v2026_v27, %v2025_v29  ;;  %v2078_v63 = vrot.slane %v2077_v42, 2  ;;  %v2086_v43 = vadd.f32 %v2085_v0, %v2084_v32  ;;  %v1831_v54 = vmul.f32 %v5034_v1, %v1797_v20 }
 0x32c   : > { %v2035_v46 = vrot.slane %v2034_v35, 2  ;;  %v1730_v37 = vadd.f32 %v1714_v45, %v4912_v15 }
 0x32d   : > { %v2028_v33 = vrot.slane %v2027_v23, 1  ;;  %v2079_v62 = vadd.f32 %v2078_v63, %v2077_v42  ;;  %v2087_v26 = vrot.slane %v2086_v43, 2 }
 0x32e   : > { %v1877_v49 = vpop.permute.xlu2 %1876  ;;  %v1847_v10 = vadd.f32 %v1831_v54, %v1730_v37  ;;  %v2036_v12 = vadd.f32 %v2035_v46, %v2034_v35 }
 0x32f   : > { %v1914_v60 = vsel %vm1902_vm3, %v1877_v49, %v5094_v55  ;;  %v1918_v14 = vsel %vm1902_vm3, %v5090_v3, %v1877_v49  ;;  %v2029_v59 = vadd.f32 %v2028_v33, %v2027_v23  ;;  %v2080_v52 = vrot.slane %v2079_v62, 1 }
 0x330   : > { %v1947_v1 = vmul.f32 %v5119_v48, %v1918_v14  ;;  %v1948_v30 = vmul.f32 %v5119_v48, %v1914_v60  ;;  %v2088_v8 = vadd.f32 %v2087_v26, %v2086_v43  ;;  %v2037_v48 = vrot.slane %v2036_v12, 1 }
 0x331   : > { %v2081_v40 = vadd.f32 %v2080_v52, %v2079_v62  ;;  %v5266_v17 = vmul.f32 0.03125, %v2029_v59 }
 0x332   : > { %v1963_v15 = vadd.f32 %v1947_v1, %v1846_v34  ;;  %v1964_v31 = vadd.f32 %v1948_v30, %v1847_v10  ;;  %v2089_v29 = vrot.slane %v2088_v8, 1  ;;  %v2038_v53 = vadd.f32 %v2037_v48, %v2036_v12 }
 0x333   : > { %v2097_v55 = vmul.f32 0.03125, %v2081_v40  ;;  %v2101_v47 = vmul.f32 %v5266_v17, %v5266_v17  ;;  %v2125_v3 = vsub.f32 %v5212_v4, %v5266_v17  ;;  %v2121_v54 = vsub.f32 %v5168_v2, %v5266_v17 }
 0x334   : > { %v5273_v21 = vadd.f32 %v5203_v28, %v1963_v15  ;;  %v5276_v32 = vadd.f32 %v5203_v28, %v1964_v31  ;;  %v2090_v27 = vadd.f32 %v2089_v29, %v2088_v8  ;;  %v5284_v20 = vmul.f32 0.03125, %v2038_v53  ;;  %v5937_v29 = vld [vmem:[#allocation11_spill] sm:$0xff] }
 0x335   : > { %v2105_v5 = vsub.f32 %v2097_v55, %v2101_v47  ;;  %v2117_v60 = vsub.f32 %v5147_v11, %v5266_v17 }
 0x336   : > { %v2005_v51 = vadd.f32 %v2004_v6, %v5273_v21  ;;  %v2014_v24 = vadd.f32 %v2013_v22, %v5276_v32  ;;  %v2051_v56 = vmul.f32 %v5273_v21, %v5273_v21  ;;  %v2052_v7 = vmul.f32 %v5276_v32, %v5276_v32 }
 0x337   : > { %v2109_v4 = vmax.f32 %v2105_v5, 0.0  ;;  %v2098_v45 = vmul.f32 0.03125, %v2090_v27  ;;  %v2122_v49 = vsub.f32 %v5170_v18, %v5284_v20  ;;  %v2118_v10 = vsub.f32 %v5107_v39, %v5284_v20 }
 0x338   : > { %v2057_v50 = vadd.f32 %v2056_v13, %v2051_v56  ;;  %v2066_v0 = vadd.f32 %v2065_v41, %v2052_v7  ;;  %v2006_v28 = vrot.slane %v2005_v51, 4  ;;  %v2015_v35 = vrot.slane %v2014_v24, 4 }
 0x339   : > { %v2129_v38 = vadd.f32 1.1920929e-07, %v2109_v4  ;;  %v2102_v13 = vmul.f32 %v5284_v20, %v5284_v20  ;;  %v2126_v41 = vsub.f32 %v5215_v61, %v5284_v20  ;;  %v2114_v1 = vsub.f32 %v5105_v9, %v5284_v20 }
 0x33a   : > { %v2058_v42 = vrot.slane %v2057_v50, 4  ;;  %v2067_v6 = vrot.slane %v2066_v0, 4  ;;  %v2007_v22 = vadd.f32 %v2006_v28, %v2005_v51  ;;  %v2016_v34 = vadd.f32 %v2015_v35, %v2014_v24  ;;  %v5938_v28 = vld [vmem:[#allocation14_spill] sm:$0xff] }
 0x33b   : > { %3143 = vrsqrt.f32 %v2129_v38  ;;  %v2106_v37 = vsub.f32 %v2098_v45, %v2102_v13  ;;  %vm2157_vm13 = vweird.f32 %v2129_v38 }
 0x33c   : > { %v2059_v23 = vadd.f32 %v2058_v42, %v2057_v50  ;;  %v2068_v63 = vadd.f32 %v2067_v6, %v2066_v0  ;;  %v2008_v33 = vrot.slane %v2007_v22, 2  ;;  %v2017_v46 = vrot.slane %v2016_v34, 2 }
 0x33d   : > { %v2110_v26 = vmax.f32 %v2106_v37, 0.0 }
 0x33e   : > { %v2060_v14 = vrot.slane %v2059_v23, 2  ;;  %v2069_v59 = vrot.slane %v2068_v63, 2  ;;  %v2009_v30 = vadd.f32 %v2008_v33, %v2007_v22  ;;  %v2018_v12 = vadd.f32 %v2017_v46, %v2016_v34 }
 0x33f   : > { %v2130_v15 = vadd.f32 1.1920929e-07, %v2110_v26  ;;  %v2113_v26 = vsub.f32 %v5151_v25, %v5266_v17  ;;  %v5941_v17 = vld [vmem:[#allocation10_spill] sm:$0xff] }
 0x340   : > { %v2061_v31 = vadd.f32 %v2060_v14, %v2059_v23  ;;  %v2070_v8 = vadd.f32 %v2069_v59, %v2068_v63  ;;  %v2010_v11 = vrot.slane %v2009_v30, 1  ;;  %v2019_v47 = vrot.slane %v2018_v12, 1 }
 0x341   : > { %v3144_v43 = vpop.eup %3143  ;;  %3145 = vrsqrt.f32 %v2130_v15  ;;  %vm2167_vm1 = vweird.f32 %v2130_v15 }
 0x342   : > { %v2152_v62 = vmul.f32 %v3144_v43, %v2129_v38  ;;  %vm2158_vm7 = vweird.f32 %v3144_v43  ;;  %v2062_v5 = vrot.slane %v2061_v31, 1  ;;  %v2071_v51 = vrot.slane %v2070_v8, 1 }
 0x343   : > { %vm2159_vm15 = vmor %vm2157_vm13, %vm2158_vm7  ;;  %v2011_v9 = vadd.f32 %v2010_v11, %v2009_v30  ;;  %v2020_v7 = vadd.f32 %v2019_v47, %v2018_v12 }
 0x344   : > { %v2153_v52 = vmul.f32 %v3144_v43, %v2152_v62  ;;  %v2063_v0 = vadd.f32 %v2062_v5, %v2061_v31  ;;  %v2072_v53 = vadd.f32 %v2071_v51, %v2070_v8 }
 0x345   : > { %v5304_v42 = vmul.f32 0.03125, %v2011_v9  ;;  %v5306_v38 = vmul.f32 0.03125, %v2020_v7 }
 0x346   : > { %v2154_v40 = vmul.f32 0.5, %v2153_v52  ;;  %v2096_v45 = vmul.f32 0.03125, %v2072_v53 }
 0x347   : > { %v3146_v56 = vpop.eup %3145  ;;  %v2099_v23 = vmul.f32 %v5304_v42, %v5304_v42 }
 0x348   : > { %v2155_v55 = vsub.f32 1.5, %v2154_v40  ;;  %v2162_v50 = vmul.f32 %v3146_v56, %v2130_v15  ;;  %vm2168_vm2 = vweird.f32 %v3146_v56 }
 0x349   : > { %vm2169_vm6 = vmor %vm2167_vm1, %vm2168_vm2 }
 0x34a   : > { %v2156_v48 = vmul.f32 %v3144_v43, %v2155_v55  ;;  %v2163_v35 = vmul.f32 %v3146_v56, %v2162_v50 }
 0x34c   : > { %v2160_v39 = vsel %vm2159_vm15, %v3144_v43, %v2156_v48  ;;  %v2164_v22 = vmul.f32 0.5, %v2163_v35  ;;  %v2100_v43 = vmul.f32 %v5306_v38, %v5306_v38  ;;  %v5939_v48 = vld [vmem:[#allocation9_spill] sm:$0xff] }
 0x34d   : > { %v2185_v24 = vmul.f32 %v2160_v39, %v2125_v3  ;;  %v2095_v3 = vmul.f32 0.03125, %v2063_v0  ;;  %v2181_v12 = vmul.f32 %v2160_v39, %v2121_v54  ;;  %v2177_v15 = vmul.f32 %v2160_v39, %v2117_v60 }
 0x34e   : > { %v2165_v34 = vsub.f32 1.5, %v2164_v22  ;;  %v2104_v59 = vsub.f32 %v2096_v45, %v2100_v43  ;;  %v2173_v55 = vmul.f32 %v2160_v39, %v2113_v26 }
 0x34f   : > { %v2201_v4 = vmul.f32 %v2185_v24, %v5937_v29  ;;  %v2103_v14 = vsub.f32 %v2095_v3, %v2099_v23  ;;  %v2197_v5 = vmul.f32 %v2181_v12, %v5939_v48 }
 0x350   : > { %v2166_v33 = vmul.f32 %v3146_v56, %v2165_v34  ;;  %v2189_v54 = vmul.f32 %v2173_v55, %v5941_v17  ;;  %v2108_v26 = vmax.f32 %v2104_v59, 0.0 }
 0x351   : > { %v5302_v27 = vadd.f32 %v2201_v4, %v5938_v28  ;;  %v5944_v4 = vld [vmem:[#allocation13_spill] sm:$0xff]  ;;  %v2107_v23 = vmax.f32 %v2103_v14, 0.0 }
 0x352   : > { %v2170_v52 = vsel %vm2169_vm6, %v3146_v56, %v2166_v33  ;;  %v5360_v50 = vadd.f32 %v2189_v54, %v5944_v4 }
 0x353   : > { %v2920_v6 = vmul.f32 -1.442695, %v5302_v27  ;;  %v2186_v30 = vmul.f32 %v2170_v52, %v2126_v41  ;;  %v2182_v40 = vmul.f32 %v2170_v52, %v2122_v49  ;;  %v2178_v8 = vmul.f32 %v2170_v52, %v2118_v10  ;;  %v5940_v41 = vld [vmem:[#allocation12_spill] sm:$0xff]  ;;  %v5942_v49 = vld [vmem:[#allocation15_spill] sm:$0xff] }
 0x354   : > { %v2174_v11 = vmul.f32 %v2170_v52, %v2114_v1  ;;  %v2193_v51 = vmul.f32 %v2177_v15, %v5940_v41  ;;  %v5345_v60 = vadd.f32 %v2197_v5, %v5942_v49  ;;  %v5943_v1 = vld [vmem:[#allocation16_spill] sm:$0xff]  ;;  %v2908_v34 = vmul.f32 -1.442695, %v5360_v50 }
 0x355   : > { %3147 = vpow2.f32 %v2920_v6  ;;  %v2202_v25 = vmul.f32 %v2186_v30, %v5937_v29  ;;  %v2198_v61 = vmul.f32 %v2182_v40, %v5939_v48  ;;  %v2194_v2 = vmul.f32 %v2178_v8, %v5940_v41 }
 0x356   : > { %v2190_v18 = vmul.f32 %v2174_v11, %v5941_v17  ;;  %v5351_v39 = vadd.f32 %v2193_v51, %v5943_v1  ;;  %v2916_v9 = vmul.f32 -1.442695, %v5345_v60  ;;  %v5377_v55 = vadd.f32 1.1920929e-07, %v2107_v23 }
 0x357   : > { %v5342_v20 = vadd.f32 %v2202_v25, %v5938_v28  ;;  %v5348_v10 = vadd.f32 %v2198_v61, %v5942_v49  ;;  %v5354_v24 = vadd.f32 %v2194_v2, %v5943_v1  ;;  %v5382_v61 = vadd.f32 1.1920929e-07, %v2108_v26 }
 0x358   : > { %v2912_v0 = vmul.f32 -1.442695, %v5351_v39  ;;  %v5366_v35 = vadd.f32 %v2190_v18, %v5944_v4 }
 0x359   : > { %v2921_v56 = vmul.f32 -1.442695, %v5342_v20  ;;  %v2917_v7 = vmul.f32 -1.442695, %v5348_v10  ;;  %v2913_v22 = vmul.f32 -1.442695, %v5354_v24 }
 0x35a   : > { %v2909_v33 = vmul.f32 -1.442695, %v5366_v35 }
 0x35b   : > { %v3148_v31 = vpop.eup %3147 }
 0x35c   : > { %v2281_v47 = vadd.f32 1.0, %v3148_v31 }
 0x35e   : > { %3149 = vrcp.f32 %v2281_v47  ;;  %v2504_v52 = vand.u32 2147483648, %v2281_v47  ;;  %v2502_v15 = vand.u32 2147483647, %v2281_v47  ;;  %vm2498_vm9 = vweird.f32 %v2281_v47 }
 0x35f   : > { %3151 = vpow2.f32 %v2921_v56 }
 0x360   : > { %3153 = vpow2.f32 %v2916_v9  ;;  %v2505_v5 = vor.u32 1.1754944e-38, %v2504_v52  ;;  %vm2503_vm11 = vcmp.eq.f32.partialorder %v2502_v15, 8.507059e+37 }
 0x361   : > { %3155 = vpow2.f32 %v2917_v7 }
 0x362   : > { %3157 = vpow2.f32 %v2912_v0 }
 0x363   : > { %3159 = vpow2.f32 %v2913_v22 }
 0x364   : > { %v3150_v6 = vpop.eup %3149  ;;  %3161 = vpow2.f32 %v2908_v34 }
 0x365   : > { %v2494_v45 = vmul.f32 %v3150_v6, %v2281_v47  ;;  %v3152_v12 = vpop.eup %3151  ;;  %vm2499_vm8 = vweird.f32 %v3150_v6  ;;  %3163 = vpow2.f32 %v2909_v33 }
 0x366   : > { %v3154_v31 = vpop.eup %3153  ;;  %v5375_v8 = vadd.f32 1.0, %v3152_v12  ;;  %vm2500_vm10 = vmor %vm2498_vm9, %vm2499_vm8 }
 0x367   : > { %v2495_v43 = vsub.f32 1.0, %v2494_v45  ;;  %v3156_v14 = vpop.eup %3155  ;;  %v5379_v25 = vadd.f32 1.0, %v3154_v31 }
 0x368   : > { %v3158_v59 = vpop.eup %3157  ;;  %3165 = vrcp.f32 %v5375_v8  ;;  %v2517_v18 = vand.u32 2147483647, %v5375_v8  ;;  %v2519_v9 = vand.u32 2147483648, %v5375_v8  ;;  %v5389_v7 = vadd.f32 1.0, %v3156_v14 }
 0x369   : > { %v2496_v40 = vmul.f32 %v3150_v6, %v2495_v43  ;;  %3167 = vrcp.f32 %v5379_v25  ;;  %v3160_v2 = vpop.eup %3159  ;;  %v5391_v0 = vadd.f32 1.0, %v3158_v59  ;;  %v2444_v22 = vand.u32 2147483648, %v5379_v25 }
 0x36a   : > { %3169 = vrsqrt.f32 %v5377_v55  ;;  %v3162_v47 = vpop.eup %3161  ;;  %v5397_v34 = vadd.f32 1.0, %v3160_v2  ;;  %vm2513_vm14 = vweird.f32 %v5375_v8  ;;  %vm2438_vm0 = vweird.f32 %v5379_v25 }
 0x36b   : > { %v2497_v11 = vadd.f32 %v3150_v6, %v2496_v40  ;;  %3171 = vrsqrt.f32 %v5382_v61  ;;  %v3164_v45 = vpop.eup %3163  ;;  %vm5405_vm4 = vcmp.eq.f32.partialorder %v2517_v18, 8.507059e+37  ;;  %v2520_v26 = vor.u32 1.1754944e-38, %v2519_v9 }
 0x36c   : > { %3173 = vrcp.f32 %v5389_v7  ;;  %v2459_v12 = vand.u32 2147483648, %v5389_v7  ;;  %v2445_v14 = vor.u32 1.1754944e-38, %v2444_v22  ;;  %vm2453_vm3 = vweird.f32 %v5389_v7 }
 0x36d   : > { %v2501_v51 = vsel %vm2500_vm10, %v3150_v6, %v2497_v11  ;;  %v2442_v6 = vand.u32 2147483647, %v5379_v25  ;;  %3175 = vrcp.f32 %v5391_v0  ;;  %v2457_v11 = vand.u32 2147483647, %v5389_v7 }
 0x36e   : > { %v2506_v54 = vsel %vm2503_vm11, %v2505_v5, %v2501_v51  ;;  %v3166_v23 = vpop.eup %3165  ;;  %v2382_v5 = vand.u32 2147483647, %v5391_v0  ;;  %v2384_v51 = vand.u32 2147483648, %v5391_v0  ;;  %3177 = vrcp.f32 %v5397_v34 }
 0x36f   : > { %v2537_v56 = vmul.f32 %v2506_v54, %v5302_v27  ;;  %v5402_v27 = vadd.f32 1.0, %v3162_v47  ;;  %v3168_v43 = vpop.eup %3167  ;;  %v2509_v33 = vmul.f32 %v3166_v23, %v5375_v8  ;;  %vm5413_vm5 = vcmp.eq.f32.partialorder %v2442_v6, 8.507059e+37 }
 0x370   : > { %v5410_v40 = vpop.eup %3169  ;;  %v2434_v15 = vmul.f32 %v3168_v43, %v5379_v25  ;;  %v5425_v18 = vadd.f32 1.0, %v3164_v45  ;;  %vm2514_vm7 = vweird.f32 %v3166_v23  ;;  %v2460_v9 = vor.u32 1.1754944e-38, %v2459_v12 }
 0x371   : > { %2649 = vmatpush.msrb.mxu2 %v2537_v56  ;;  %v2510_v59 = vsub.f32 1.0, %v2509_v33  ;;  %v5421_v2 = vpop.eup %3171  ;;  %3179 = vrcp.f32 %v5402_v27  ;;  %vm2378_vm13 = vweird.f32 %v5391_v0  ;;  %v2399_v6 = vand.u32 2147483648, %v5397_v34  ;;  %vm2515_vm6 = vmor %vm2513_vm14, %vm2514_vm7 }
 0x372   : > { %v2435_v54 = vsub.f32 1.0, %v2434_v15  ;;  %v3174_v47 = vpop.eup %3173  ;;  %vm2439_vm15 = vweird.f32 %v3168_v43  ;;  %vm5430_vm1 = vcmp.eq.f32.partialorder %v2457_v11, 8.507059e+37  ;;  %v2397_v45 = vand.u32 2147483647, %v5397_v34 }
 0x373   : > { %v2511_v56 = vmul.f32 %v3166_v23, %v2510_v59  ;;  %v3176_v22 = vpop.eup %3175  ;;  %v2449_v30 = vmul.f32 %v3174_v47, %v5389_v7  ;;  %vm5436_vm2 = vcmp.eq.f32.partialorder %v2382_v5, 8.507059e+37  ;;  %v2385_v62 = vor.u32 1.1754944e-38, %v2384_v51  ;;  %vm2440_vm9 = vmor %vm2438_vm0, %vm2439_vm15 }
 0x374   : > { %v2436_v33 = vmul.f32 %v3168_v43, %v2435_v54  ;;  %v2374_v59 = vmul.f32 %v3176_v22, %v5391_v0  ;;  %v2322_v13 = vand.u32 2147483647, %v5402_v27  ;;  %vm2393_vm8 = vweird.f32 %v5397_v34 }
 0x375   : > { %v2512_v53 = vadd.f32 %v3166_v23, %v2511_v56  ;;  %v2450_v54 = vsub.f32 1.0, %v2449_v30  ;;  %v2324_v3 = vand.u32 2147483648, %v5402_v27  ;;  %3181 = vrcp.f32 %v5425_v18  ;;  %v3178_v56 = vpop.eup %3177 }
 0x376   : > { %v2437_v11 = vadd.f32 %v3168_v43, %v2436_v33  ;;  %vm2454_vm10 = vweird.f32 %v3174_v47  ;;  %v2375_v51 = vsub.f32 1.0, %v2374_v59  ;;  %v2400_v37 = vor.u32 1.1754944e-38, %v2399_v6 }
 0x377   : > { %v2516_v5 = vsel %vm2515_vm6, %v3166_v23, %v2512_v53  ;;  %v3180_v46 = vpop.eup %3179  ;;  %v2451_v33 = vmul.f32 %v3174_v47, %v2450_v54  ;;  %v2389_v63 = vmul.f32 %v3178_v56, %v5397_v34  ;;  %vm5453_vm11 = vcmp.eq.f32.partialorder %v2397_v45, 8.507059e+37 }
 0x378   : > { %v2521_v8 = vsel %vm5405_vm4, %v2520_v26, %v2516_v5  ;;  %v2441_v30 = vsel %vm2440_vm9, %v3168_v43, %v2437_v11  ;;  %vm2318_vm14 = vweird.f32 %v5402_v27  ;;  %v2376_v23 = vmul.f32 %v3176_v22, %v2375_v51  ;;  %vm2455_vm4 = vmor %vm2453_vm3, %vm2454_vm10 }
 0x379   : > { %v2538_v53 = vmul.f32 %v2521_v8, %v5342_v20  ;;  %v2446_v25 = vsel %vm5413_vm5, %v2445_v14, %v2441_v30  ;;  %vm2379_vm0 = vweird.f32 %v3176_v22  ;;  %v2452_v26 = vadd.f32 %v3174_v47, %v2451_v33 }
 0x37a   : > { %v2533_v52 = vmul.f32 %v2446_v25, %v5345_v60  ;;  %v2390_v43 = vsub.f32 1.0, %v2389_v63  ;;  %v2314_v6 = vmul.f32 %v3180_v46, %v5402_v27  ;;  %v2377_v45 = vadd.f32 %v3176_v22, %v2376_v23  ;;  %vm2380_vm5 = vmor %vm2378_vm13, %vm2379_vm0 }
 0x37b   : > { %2678 = vmatpush.msrb.mxu3 %v2538_v53  ;;  %vm2394_vm7 = vweird.f32 %v3178_v56  ;;  %vm5466_vm15 = vcmp.eq.f32.partialorder %v2322_v13, 8.507059e+37  ;;  %v2325_v31 = vor.u32 1.1754944e-38, %v2324_v3  ;;  %v3182_v14 = vpop.eup %3181  ;;  %v2456_v59 = vsel %vm2455_vm4, %v3174_v47, %v2452_v26 }
 0x37c   : > { %2650 = vmatpush.msrb.mxu2 %v2533_v52  ;;  %v2391_v63 = vmul.f32 %v3178_v56, %v2390_v43  ;;  %v2315_v60 = vsub.f32 1.0, %v2314_v6  ;;  %v2132_v11 = vmul.f32 %v5410_v40, %v5377_v55  ;;  %v2461_v7 = vsel %vm5430_vm1, %v2460_v9, %v2456_v59  ;;  %vm2395_vm13 = vmor %vm2393_vm8, %vm2394_vm7 }
 0x37d   : > { %v2381_v54 = vsel %vm2380_vm5, %v3176_v22, %v2377_v45  ;;  %vm2319_vm3 = vweird.f32 %v3180_v46  ;;  %v2329_v13 = vmul.f32 %v3182_v14, %v5425_v18  ;;  %v2534_v3 = vmul.f32 %v2461_v7, %v5348_v10 }
 0x37e   : > { %v2386_v47 = vsel %vm5436_vm2, %v2385_v62, %v2381_v54  ;;  %v2392_v5 = vadd.f32 %v3178_v56, %v2391_v63  ;;  %v2316_v0 = vmul.f32 %v3180_v46, %v2315_v60  ;;  %v2337_v9 = vand.u32 2147483647, %v5425_v18  ;;  %vm2320_vm1 = vmor %vm2318_vm14, %vm2319_vm3 }
 0x37f   : > { %v2529_v51 = vmul.f32 %v2386_v47, %v5351_v39  ;;  %v2330_v8 = vsub.f32 1.0, %v2329_v13  ;;  %v2133_v22 = vmul.f32 %v5410_v40, %v2132_v11  ;;  %2679 = vmatpush.msrb.mxu3 %v2534_v3  ;;  %v2339_v10 = vand.u32 2147483648, %v5425_v18 }
 0x380   : > { %v2396_v15 = vsel %vm2395_vm13, %v3178_v56, %v2392_v5  ;;  %v2317_v30 = vadd.f32 %v3180_v46, %v2316_v0  ;;  %v2142_v62 = vmul.f32 %v5421_v2, %v5382_v61  ;;  %vm2334_vm2 = vweird.f32 %v3182_v14 }
 0x381   : > { %2651 = vmatpush.msrb.mxu2 %v2529_v51  ;;  %v2401_v39 = vsel %vm5453_vm11, %v2400_v37, %v2396_v15  ;;  %v2331_v34 = vmul.f32 %v3182_v14, %v2330_v8  ;;  %v2134_v12 = vmul.f32 0.5, %v2133_v22  ;;  %vm2333_vm6 = vweird.f32 %v5425_v18 }
 0x382   : > { %v2530_v33 = vmul.f32 %v2401_v39, %v5354_v24  ;;  %v2321_v56 = vsel %vm2320_vm1, %v3180_v46, %v2317_v30  ;;  %v2143_v53 = vmul.f32 %v5421_v2, %v2142_v62  ;;  %vm2138_vm8 = vweird.f32 %v5410_v40  ;;  %vm2335_vm9 = vmor %vm2333_vm6, %vm2334_vm2 }
 0x383   : > { %v2326_v25 = vsel %vm5466_vm15, %v2325_v31, %v2321_v56  ;;  %v2332_v23 = vadd.f32 %v3182_v14, %v2331_v34  ;;  %v2135_v4 = vsub.f32 1.5, %v2134_v12  ;;  %v2340_v27 = vor.u32 1.1754944e-38, %v2339_v10 }
 0x384   : > { %2680 = vmatpush.msrb.mxu3 %v2530_v33  ;;  %v2525_v37 = vmul.f32 %v2326_v25, %v5360_v50  ;;  %v2144_v52 = vmul.f32 0.5, %v2143_v53  ;;  %vm2338_vm10 = vcmp.eq.f32.partialorder %v2337_v9, 8.507059e+37  ;;  %vm2137_vm11 = vweird.f32 %v5377_v55 }
 0x385   : > { %v2336_v26 = vsel %vm2335_vm9, %v3182_v14, %v2332_v23  ;;  %v2136_v46 = vmul.f32 %v5410_v40, %v2135_v4  ;;  %vm2139_vm14 = vmor %vm2137_vm11, %vm2138_vm8  ;;  %vm2148_vm0 = vweird.f32 %v5421_v2  ;;  %vm2147_vm4 = vweird.f32 %v5382_v61 }
 0x386   : > { %2652 = vmatpush.msrb.mxu2 %v2525_v37  ;;  %v2341_v24 = vsel %vm2338_vm10, %v2340_v27, %v2336_v26  ;;  %v2145_v18 = vsub.f32 1.5, %v2144_v52  ;;  %v5957_v50 = vsub.f32 %v5273_v21, %v5304_v42  ;;  %v5958_v55 = vsub.f32 %v5164_v44, %v5304_v42  ;;  %vm2149_vm7 = vmor %vm2147_vm4, %vm2148_vm0  ;;  %v5592_v26 = vld [vmem:[%s5827_s2] sm:$0xff] }
 0x387   : > { %v2526_v43 = vmul.f32 %v2341_v24, %v5366_v35  ;;  %v2140_v6 = vsel %vm2139_vm14, %v5410_v40, %v2136_v46  ;;  %v5959_v14 = vsub.f32 %v5109_v58, %v5304_v42  ;;  %v5960_v35 = vsub.f32 %v5222_v36, %v5304_v42  ;;  %2930 = vmatmul.msk.f32.vlgmr.msrb.gmra.mxu2 %vm518_vm12, %v5592_v26 }
 0x388   : > { %v2183_v45 = vmul.f32 %v2140_v6, %v5957_v50  ;;  %v2146_v20 = vmul.f32 %v5421_v2, %v2145_v18  ;;  %v2179_v31 = vmul.f32 %v2140_v6, %v5958_v55  ;;  %v5961_v44 = vsub.f32 %v5276_v32, %v5306_v38 }
 0x389   : > { %v2175_v59 = vmul.f32 %v2140_v6, %v5959_v14  ;;  %2681 = vmatpush.msrb.mxu3 %v2526_v43  ;;  %v2171_v61 = vmul.f32 %v2140_v6, %v5960_v35  ;;  %v5962_v58 = vsub.f32 %v5166_v57, %v5306_v38  ;;  %v5963_v36 = vsub.f32 %v5111_v16, %v5306_v38 }
 0x38a   : > { %v2199_v40 = vmul.f32 %v2183_v45, %v5937_v29  ;;  %v2150_v21 = vsel %vm2149_vm7, %v5421_v2, %v2146_v20  ;;  %v2195_v63 = vmul.f32 %v2179_v31, %v5939_v48  ;;  %v5964_v32 = vsub.f32 %v5225_v19, %v5306_v38  ;;  %v5965_v38 = vld [vmem:[#allocation13_spill] sm:$0xff]  ;;  %2934 = vmatmul.msk.f32.vlgmr.msrb.gmra.mxu3 %vm518_vm12, %v5592_v26 }
 0x38b   : > { %v2191_v60 = vmul.f32 %v2175_v59, %v5940_v41  ;;  %v2184_v11 = vmul.f32 %v2150_v21, %v5961_v44  ;;  %v2180_v7 = vmul.f32 %v2150_v21, %v5962_v58  ;;  %v2176_v42 = vmul.f32 %v2150_v21, %v5963_v36 }
 0x38c   : > { %v2187_v54 = vmul.f32 %v2171_v61, %v5941_v17  ;;  %v5535_v2 = vadd.f32 %v2199_v40, %v5938_v28  ;;  %v5538_v13 = vadd.f32 %v2195_v63, %v5942_v49  ;;  %v2172_v3 = vmul.f32 %v2150_v21, %v5964_v32 }
 0x38d   : > { %v2200_v47 = vmul.f32 %v2184_v11, %v5937_v29  ;;  %v2196_v57 = vmul.f32 %v2180_v7, %v5939_v48  ;;  %v5546_v5 = vadd.f32 %v2191_v60, %v5943_v1  ;;  %v2192_v16 = vmul.f32 %v2176_v42, %v5940_v41 }
 0x38e   : > { %v2918_v0 = vmul.f32 -1.442695, %v5535_v2  ;;  %v2914_v51 = vmul.f32 -1.442695, %v5538_v13  ;;  %v2188_v8 = vmul.f32 %v2172_v3, %v5941_v17  ;;  %v5562_v48 = vadd.f32 %v2187_v54, %v5965_v38  ;;  %v5634_v54 = vld [vmem:[%s5827_s2 + $0x8] sm:$0xff] }
 0x38f   : > { %v5553_v9 = vadd.f32 %v2200_v47, %v5938_v28  ;;  %v5556_v19 = vadd.f32 %v2196_v57, %v5942_v49  ;;  %v5559_v29 = vadd.f32 %v2192_v16, %v5943_v1  ;;  %v2910_v28 = vmul.f32 -1.442695, %v5546_v5  ;;  %2931 = vmatmul.msk.f32.gmra.mxu2 %vm518_vm12, %v5634_v54  ;;  %v2543_v47 = vld [vmem:[%s5828_s3] sm:$0xff] }
 0x390   : > { %3183 = vpow2.f32 %v2918_v0  ;;  %v5565_v41 = vadd.f32 %v2188_v8, %v5965_v38  ;;  %v2906_v1 = vmul.f32 -1.442695, %v5562_v48 }
 0x391   : > { %v2919_v22 = vmul.f32 -1.442695, %v5553_v9  ;;  %3185 = vpow2.f32 %v2914_v51  ;;  %v2915_v17 = vmul.f32 -1.442695, %v5556_v19  ;;  %v2911_v49 = vmul.f32 -1.442695, %v5559_v29 }
 0x392   : > { %v2907_v15 = vmul.f32 -1.442695, %v5565_v41  ;;  %2935 = vmatmul.msk.f32.gmra.mxu3 %vm518_vm12, %v5634_v54 }
 0x393   : > { %3187 = vpow2.f32 %v2919_v22 }
 0x394   : > { %3189 = vpow2.f32 %v2915_v17 }
 0x395   : > { %3191 = vpow2.f32 %v2910_v28 }
 0x396   : > { %v3184_v30 = vpop.eup %3183  ;;  %3193 = vpow2.f32 %v2911_v49 }
 0x397   : > { %v3186_v10 = vpop.eup %3185  ;;  %v5573_v62 = vadd.f32 1.0, %v3184_v30  ;;  %3195 = vpow2.f32 %v2906_v1 }
 0x398   : > { %v5575_v39 = vadd.f32 1.0, %v3186_v10  ;;  %3197 = vpow2.f32 %v2907_v15 }
 0x399   : > { %v3188_v34 = vpop.eup %3187  ;;  %3199 = vrcp.f32 %v5573_v62  ;;  %v2472_v23 = vand.u32 2147483647, %v5573_v62  ;;  %v2474_v4 = vand.u32 2147483648, %v5573_v62  ;;  %vm2468_vm15 = vweird.f32 %v5573_v62 }
 0x39a   : > { %v3190_v12 = vpop.eup %3189  ;;  %v5578_v33 = vadd.f32 1.0, %v3188_v34  ;;  %3201 = vrcp.f32 %v5575_v39  ;;  %v2412_v27 = vand.u32 2147483647, %v5575_v39  ;;  %v2414_v52 = vand.u32 2147483648, %v5575_v39 }
 0x39b   : > { %v3192_v56 = vpop.eup %3191  ;;  %v5581_v53 = vadd.f32 1.0, %v3190_v12  ;;  %vm2408_vm5 = vweird.f32 %v5575_v39  ;;  %vm5607_vm3 = vcmp.eq.f32.partialorder %v2472_v23, 8.507059e+37  ;;  %v2475_v31 = vor.u32 1.1754944e-38, %v2474_v4 }
 0x39c   : > { %v3194_v25 = vpop.eup %3193  ;;  %3203 = vrcp.f32 %v5578_v33  ;;  %v2489_v24 = vand.u32 2147483648, %v5578_v33  ;;  %v2487_v43 = vand.u32 2147483647, %v5578_v33  ;;  %v5602_v6 = vadd.f32 1.0, %v3192_v56 }
 0x39d   : > { %v3196_v37 = vpop.eup %3195  ;;  %3205 = vrcp.f32 %v5581_v53  ;;  %v5604_v50 = vadd.f32 1.0, %v3194_v25  ;;  %v2427_v14 = vand.u32 2147483647, %v5581_v53  ;;  %v2429_v59 = vand.u32 2147483648, %v5581_v53 }
 0x39e   : > { %v3198_v46 = vpop.eup %3197  ;;  %vm2483_vm13 = vweird.f32 %v5578_v33  ;;  %vm5615_vm1 = vcmp.eq.f32.partialorder %v2412_v27, 8.507059e+37  ;;  %v2415_v40 = vor.u32 1.1754944e-38, %v2414_v52  ;;  %3207 = vrcp.f32 %v5602_v6 }
 0x39f   : > { %v3200_v18 = vpop.eup %3199  ;;  %v2490_v60 = vor.u32 1.1754944e-38, %v2489_v24  ;;  %vm2423_vm2 = vweird.f32 %v5581_v53  ;;  %3209 = vrcp.f32 %v5604_v50  ;;  %v5622_v44 = vadd.f32 1.0, %v3196_v37 }
 0x3a0   : > { %v3202_v45 = vpop.eup %3201  ;;  %v2464_v20 = vmul.f32 %v3200_v18, %v5573_v62  ;;  %vm2469_vm6 = vweird.f32 %v3200_v18  ;;  %vm5625_vm8 = vcmp.eq.f32.partialorder %v2487_v43, 8.507059e+37  ;;  %v5629_v42 = vadd.f32 1.0, %v3198_v46 }
 0x3a1   : > { %v2404_v35 = vmul.f32 %v3202_v45, %v5575_v39  ;;  %vm2409_vm9 = vweird.f32 %v3202_v45  ;;  %vm5637_vm10 = vcmp.eq.f32.partialorder %v2427_v14, 8.507059e+37  ;;  %v2430_v57 = vor.u32 1.1754944e-38, %v2429_v59  ;;  %vm2470_vm0 = vmor %vm2468_vm15, %vm2469_vm6 }
 0x3a2   : > { %v3204_v21 = vpop.eup %3203  ;;  %v2465_v63 = vsub.f32 1.0, %v2464_v20  ;;  %v2352_v51 = vand.u32 2147483647, %v5602_v6  ;;  %v2354_v8 = vand.u32 2147483648, %v5602_v6  ;;  %3211 = vrcp.f32 %v5622_v44  ;;  %vm2410_vm14 = vmor %vm2408_vm5, %vm2409_vm9 }
 0x3a3   : > { %v3206_v11 = vpop.eup %3205  ;;  %v2479_v58 = vmul.f32 %v3204_v21, %v5578_v33  ;;  %v2405_v36 = vsub.f32 1.0, %v2404_v35  ;;  %vm2484_vm11 = vweird.f32 %v3204_v21  ;;  %vm2363_vm7 = vweird.f32 %v5604_v50  ;;  %v2695_v35 = vld [vmem:[%s3463_s25] sm:$0xff] }
 0x3a4   : > { %v2466_v32 = vmul.f32 %v3200_v18, %v2465_v63  ;;  %v2419_v3 = vmul.f32 %v3206_v11, %v5581_v53  ;;  %v3208_v17 = vpop.eup %3207  ;;  %vm2424_vm4 = vweird.f32 %v3206_v11  ;;  %v2367_v1 = vand.u32 2147483647, %v5604_v50  ;;  %vm2485_vm15 = vmor %vm2483_vm13, %vm2484_vm11 }
 0x3a5   : > { %v2480_v16 = vsub.f32 1.0, %v2479_v58  ;;  %v2406_v0 = vmul.f32 %v3202_v45, %v2405_v36  ;;  %v3210_v15 = vpop.eup %3209  ;;  %v2344_v34 = vmul.f32 %v3208_v17, %v5602_v6  ;;  %v2369_v12 = vand.u32 2147483648, %v5604_v50  ;;  %vm2425_vm5 = vmor %vm2423_vm2, %vm2424_vm4 }
 0x3a6   : > { %v2467_v38 = vadd.f32 %v3200_v18, %v2466_v32  ;;  %v2420_v22 = vsub.f32 1.0, %v2419_v3  ;;  %v2359_v23 = vmul.f32 %v3210_v15, %v5604_v50  ;;  %vm2364_vm13 = vweird.f32 %v3210_v15  ;;  %v2542_v3 = vld [vmem:[%s5827_s2 + $0x18] sm:$0xff] }
 0x3a7   : > { %v2481_v28 = vmul.f32 %v3204_v21, %v2480_v16  ;;  %v2407_v49 = vadd.f32 %v3202_v45, %v2406_v0  ;;  %v2345_v27 = vsub.f32 1.0, %v2344_v34  ;;  %v2355_v59 = vor.u32 1.1754944e-38, %v2354_v8  ;;  %vm2365_vm9 = vmor %vm2363_vm7, %vm2364_vm13  ;;  %v2546_v34 = vld [vmem:[%s5828_s3 + $0x18] sm:$0xff] }
 0x3a8   : > { %v2471_v30 = vsel %vm2470_vm0, %v3200_v18, %v2467_v38  ;;  %v2421_v10 = vmul.f32 %v3206_v11, %v2420_v22  ;;  %v2360_v24 = vsub.f32 1.0, %v2359_v23  ;;  %v3212_v33 = vpop.eup %3211  ;;  %vm5687_vm2 = vcmp.eq.f32.partialorder %v2367_v1, 8.507059e+37 }
 0x3a9   : > { %v2476_v62 = vsel %vm5607_vm3, %v2475_v31, %v2471_v30  ;;  %v2482_v56 = vadd.f32 %v3204_v21, %v2481_v28  ;;  %v2411_v25 = vsel %vm2410_vm14, %v3202_v45, %v2407_v49  ;;  %vm2349_vm3 = vweird.f32 %v3208_v17  ;;  %v2544_v28 = vld [vmem:[%s5828_s3 + $0x8] sm:$0xff] }
 0x3aa   : > { %v2535_v4 = vmul.f32 %v2476_v62, %v5535_v2  ;;  %v2416_v39 = vsel %vm5615_vm1, %v2415_v40, %v2411_v25  ;;  %v2422_v37 = vadd.f32 %v3206_v11, %v2421_v10  ;;  %v5675_v2 = vld [vmem:[%s5827_s2 + $0x10] sm:$0xff]  ;;  %v2346_v45 = vmul.f32 %v3208_v17, %v2345_v27  ;;  %v2698_v25 = vld [vmem:[%s3463_s25 + $0x18] sm:$0xff] }
 0x3ab   : > { %v2486_v52 = vsel %vm2485_vm15, %v3204_v21, %v2482_v56  ;;  %v2531_v46 = vmul.f32 %v2416_v39, %v5538_v13  ;;  %v2361_v20 = vmul.f32 %v3210_v15, %v2360_v24  ;;  %v2284_v55 = vmul.f32 %v3212_v33, %v5622_v44  ;;  %2932 = vmatmul.msk.f32.gmra.mxu2 %vm518_vm12, %v5675_v2  ;;  %v2702_v27 = vld [vmem:[%s3463_s25 + $0x38] sm:$0xff] }
 0x3ac   : > { %2591 = vmatpush.msrb.mxu0 %v2535_v4  ;;  %v2491_v18 = vsel %vm5625_vm8, %v2490_v60, %v2486_v52  ;;  %v2426_v43 = vsel %vm2425_vm5, %v3206_v11, %v2422_v37  ;;  %v2347_v31 = vadd.f32 %v3208_v17, %v2346_v45  ;;  %vm5683_vm1 = vcmp.eq.f32.partialorder %v2352_v51, 8.507059e+37  ;;  %2936 = vmatmul.msk.f32.gmra.mxu3 %vm518_vm12, %v5675_v2  ;;  %v2701_v37 = vld [vmem:[%s3463_s25 + $0x30] sm:$0xff] }
 0x3ad   : > { %v2536_v13 = vmul.f32 %v2491_v18, %v5553_v9  ;;  %v2431_v53 = vsel %vm5637_vm10, %v2430_v57, %v2426_v43  ;;  %vm5978_vm6 = vweird.f32 %v5602_v6  ;;  %v2362_v61 = vadd.f32 %v3210_v15, %v2361_v20  ;;  %v2705_v45 = vld [vmem:[%s3463_s25 + $0x50] sm:$0xff] }
 0x3ae   : > { %2592 = vmatpush.msrb.mxu0 %v2531_v46  ;;  %v2532_v9 = vmul.f32 %v2431_v53, %v5556_v19  ;;  %vm2350_vm8 = vmor %vm5978_vm6, %vm2349_vm3  ;;  %v2285_v40 = vsub.f32 1.0, %v2284_v55  ;;  %3213 = vrcp.f32 %v5629_v42  ;;  %v2370_v63 = vor.u32 1.1754944e-38, %v2369_v12  ;;  %v2706_v53 = vld [vmem:[%s3463_s25 + $0x58] sm:$0xff] }
 0x3af   : > { %2620 = vmatpush.msrb.mxu1 %v2536_v13  ;;  %v2351_v21 = vsel %vm2350_vm8, %v3208_v17, %v2347_v31  ;;  %vm2289_vm10 = vweird.f32 %v3212_v33  ;;  %v2294_v19 = vand.u32 2147483648, %v5622_v44  ;;  %v2366_v60 = vsel %vm2365_vm9, %v3210_v15, %v2362_v61 }
 0x3b0   : > { %v2356_v6 = vsel %vm5683_vm1, %v2355_v59, %v2351_v21  ;;  %v2286_v11 = vmul.f32 %v3212_v33, %v2285_v40  ;;  %v2292_v58 = vand.u32 2147483647, %v5622_v44  ;;  %v2371_v36 = vsel %vm5687_vm2, %v2370_v63, %v2366_v60 }
 0x3b1   : > { %2621 = vmatpush.msrb.mxu1 %v2532_v9  ;;  %v2527_v7 = vmul.f32 %v2356_v6, %v5546_v5  ;;  %v2528_v50 = vmul.f32 %v2371_v36, %v5559_v29  ;;  %vm2288_vm11 = vweird.f32 %v5622_v44  ;;  %v2295_v5 = vor.u32 1.1754944e-38, %v2294_v19  ;;  %v2709_v6 = vld [vmem:[%s3463_s25 + $0x70] sm:$0xff] }
 0x3b2   : > { %v2287_v32 = vadd.f32 %v3212_v33, %v2286_v11  ;;  %vm2290_vm14 = vmor %vm2288_vm11, %vm2289_vm10  ;;  %v3355_v57 = vmov 5   ;;  %vm2293_vm0 = vcmp.eq.f32.partialorder %v2292_v58, 8.507059e+37  ;;  %v2309_v38 = vand.u32 2147483648, %v5629_v42  ;;  %v2710_v11 = vld [vmem:[%s3463_s25 + $0x78] sm:$0xff] }
 0x3b3   : > { %2593 = vmatpush.msrb.mxu0 %v2527_v7  ;;  %3068 = vset.pattern.permute.xlu0 %v3355_v57  ;;  %v2307_v17 = vand.u32 2147483647, %v5629_v42  ;;  %vm2303_vm7 = vweird.f32 %v5629_v42 }
 0x3b4   : > { %v3214_v16 = vpop.eup %3213  ;;  %2622 = vmatpush.msrb.mxu1 %v2528_v50  ;;  %v2291_v29 = vsel %vm2290_vm14, %v3212_v33, %v2287_v32  ;;  %2549 = vperm.xlu0 %3068, %v2543_v47   ;;  %v2310_v1 = vor.u32 1.1754944e-38, %v2309_v38  ;;  %v2699_v50 = vld [vmem:[%s3463_s25 + $0x20] sm:$0xff] }
 0x3b5   : > { %v2296_v44 = vsel %vm2293_vm0, %v2295_v5, %v2291_v29  ;;  %v2299_v0 = vmul.f32 %v3214_v16, %v5629_v42  ;;  %2933 = vmatmul.msk.f32.gmra.mxu2 %vm518_vm12, %v2542_v3  ;;  %3069 = vset.pattern.permute.xlu1 %v3355_v57  ;;  %vm2304_vm4 = vweird.f32 %v3214_v16  ;;  %vm2308_vm5 = vcmp.eq.f32.partialorder %v2307_v17, 8.507059e+37 }
 0x3b6   : > { %v2523_v51 = vmul.f32 %v2296_v44, %v5562_v48  ;;  %2937 = vmatmul.msk.f32.gmra.mxu3 %vm518_vm12, %v2542_v3  ;;  %3070 = vset.pattern.permute.xlu2 %v3355_v57  ;;  %v2545_v48 = vld [vmem:[%s5828_s3 + $0x10] sm:$0xff]  ;;  %vm2305_vm15 = vmor %vm2303_vm7, %vm2304_vm4  ;;  %v2703_v44 = vld [vmem:[%s3463_s25 + $0x40] sm:$0xff] }
 0x3b7   : > { %v2300_v8 = vsub.f32 1.0, %v2299_v0  ;;  %2554 = vperm.xlu1 %3069, %v2544_v28   ;;  %2559 = vperm.xlu2 %3070, %v2545_v48   ;;  %v2707_v48 = vld [vmem:[%s3463_s25 + $0x60] sm:$0xff] }
 0x3b8   : > { %2594 = vmatpush.msrb.mxu0 %v2523_v51  ;;  %v2700_v51 = vld [vmem:[%s3463_s25 + $0x28] sm:$0xff] }
 0x3b9   : > { %v2301_v22 = vmul.f32 %v3214_v16, %v2300_v8  ;;  %2922 = vmatmul.msk.f32.vlgmr.msrb.gmra.mxu0 %vm518_vm12, %v5592_v26 }
 0x3bb   : > { %v2302_v49 = vadd.f32 %v3214_v16, %v2301_v22 }
 0x3bd   : > { %v2306_v15 = vsel %vm2305_vm15, %v3214_v16, %v2302_v49 }
 0x3be   : > { %v2311_v30 = vsel %vm2308_vm5, %v2310_v1, %v2306_v15  ;;  %v2704_v1 = vld [vmem:[%s3463_s25 + $0x48] sm:$0xff] }
 0x3bf   : > { %v2524_v10 = vmul.f32 %v2311_v30, %v5565_v41  ;;  %2564 = vperm.xlu1 %3069, %v2546_v34  }
 0x3c1   : > { %2623 = vmatpush.msrb.mxu1 %v2524_v10  ;;  %2923 = vmatmul.msk.f32.gmra.mxu0 %vm518_vm12, %v5634_v54 }
 0x3c2   : > { %2926 = vmatmul.msk.f32.vlgmr.msrb.gmra.mxu1 %vm518_vm12, %v5592_v26  ;;  %v2697_v26 = vld [vmem:[%s3463_s25 + $0x10] sm:$0xff] }
 0x3c9   : > { %2924 = vmatmul.msk.f32.gmra.mxu0 %vm518_vm12, %v5675_v2 }
 0x3ca   : > { %2927 = vmatmul.msk.f32.gmra.mxu1 %vm518_vm12, %v5634_v54 }
 0x3d1   : > { %2925 = vmatmul.msk.f32.gmra.mxu0 %vm518_vm12, %v2542_v3 }
 0x3d2   : > { %2928 = vmatmul.msk.f32.gmra.mxu1 %vm518_vm12, %v5675_v2 }
 0x3da   : > { %2929 = vmatmul.msk.f32.gmra.mxu1 %vm518_vm12, %v2542_v3  ;;  %v2696_v3 = vld [vmem:[%s3463_s25 + $0x8] sm:$0xff] }
 0x40a   : > { %v2654_v41 = vpop.f32.mrf.mxu2 }
 0x40d   : > { %v2683_v42 = vpop.f32.mrf.mxu3 }
 0x411   : > { %v2560_v2 = vpop.permute.xlu2 %2559 }
 0x412   : > { %v2657_v62 = vpop.f32.mrf.mxu2 }
 0x415   : > { %v2686_v56 = vpop.f32.mrf.mxu3 }
 0x426   : > { %v2550_v12 = vpop.permute.xlu0 %2549 }
 0x427   : > { %v2655_v23 = vadd.f32 %v2654_v41, %v2550_v12  ;;  %v2684_v4 = vadd.f32 %v2683_v42, %v2550_v12  ;;  %v2708_v42 = vld [vmem:[%s3463_s25 + $0x68] sm:$0xff] }
 0x429   : > { %v2713_v54 = vadd.f32 %v2697_v26, %v2655_v23  ;;  %v2714_v39 = vadd.f32 %v2698_v25, %v2684_v4  ;;  %v2555_v52 = vpop.permute.xlu1 %2554 }
 0x42a   : > { %v2658_v46 = vadd.f32 %v2657_v62, %v2555_v52  ;;  %v2687_v24 = vadd.f32 %v2686_v56, %v2555_v52 }
 0x42b   : > { %2729 = vst [vmem:[%s5754_s9 + $0x10] sm:$0xff] %v2713_v54 }
 0x42c   : > { %2730 = vst [vmem:[%s5754_s9 + $0x18] sm:$0xff] %v2714_v39  ;;  %v2717_v33 = vadd.f32 %v2701_v37, %v2658_v46  ;;  %v2718_v18 = vadd.f32 %v2702_v27, %v2687_v24 }
 0x42e   : > { %v2660_v43 = vpop.f32.mrf.mxu2  ;;  %2733 = vst [vmem:[%s5754_s9 + $0x30] sm:$0xff] %v2717_v33 }
 0x42f   : > { %v2689_v13 = vpop.f32.mrf.mxu3  ;;  %v2661_v20 = vadd.f32 %v2660_v43, %v2560_v2  ;;  %2734 = vst [vmem:[%s5754_s9 + $0x38] sm:$0xff] %v2718_v18 }
 0x430   : > { %v2690_v55 = vadd.f32 %v2689_v13, %v2560_v2 }
 0x431   : > { %v2721_v31 = vadd.f32 %v2705_v45, %v2661_v20  ;;  %v2565_v9 = vpop.permute.xlu1 %2564 }
 0x432   : > { %v2722_v14 = vadd.f32 %v2706_v53, %v2690_v55 }
 0x433   : > { %2737 = vst [vmem:[%s5754_s9 + $0x50] sm:$0xff] %v2721_v31 }
 0x434   : > { %2738 = vst [vmem:[%s5754_s9 + $0x58] sm:$0xff] %v2722_v14 }
 0x436   : > { %v2596_v59 = vpop.f32.mrf.mxu0 }
 0x437   : > { %v2597_v61 = vadd.f32 %v2596_v59, %v2550_v12 }
 0x438   : > { %v2663_v40 = vpop.f32.mrf.mxu2 }
 0x439   : > { %v2711_v21 = vadd.f32 %v2695_v35, %v2597_v61  ;;  %v2664_v63 = vadd.f32 %v2663_v40, %v2565_v9  ;;  %v2692_v19 = vpop.f32.mrf.mxu3 }
 0x43a   : > { %v2693_v60 = vadd.f32 %v2692_v19, %v2565_v9 }
 0x43b   : > { %2727 = vst [vmem:[%s5754_s9] sm:$0xff] %v2711_v21  ;;  %v2725_v58 = vadd.f32 %v2709_v6, %v2664_v63 }
 0x43c   : > { %v2726_v7 = vadd.f32 %v2710_v11, %v2693_v60 }
 0x43d   : > { %2741 = vst [vmem:[%s5754_s9 + $0x70] sm:$0xff] %v2725_v58 }
 0x43e   : > { %v2599_v36 = vpop.f32.mrf.mxu0  ;;  %2742 = vst [vmem:[%s5754_s9 + $0x78] sm:$0xff] %v2726_v7 }
 0x43f   : > { %v2625_v32 = vpop.f32.mrf.mxu1  ;;  %v2600_v47 = vadd.f32 %v2599_v36, %v2555_v52 }
 0x440   : > { %v2626_v5 = vadd.f32 %v2625_v32, %v2550_v12 }
 0x441   : > { %v2715_v57 = vadd.f32 %v2699_v50, %v2600_v47 }
 0x442   : > { %v2712_v16 = vadd.f32 %v2696_v3, %v2626_v5 }
 0x443   : > { %2731 = vst [vmem:[%s5754_s9 + $0x20] sm:$0xff] %v2715_v57 }
 0x444   : > { %2728 = vst [vmem:[%s5754_s9 + $0x8] sm:$0xff] %v2712_v16 }
 0x446   : > { %v2602_v29 = vpop.f32.mrf.mxu0 }
 0x447   : > { %v2628_v0 = vpop.f32.mrf.mxu1  ;;  %v2603_v8 = vadd.f32 %v2602_v29, %v2560_v2 }
 0x448   : > { %v2629_v38 = vadd.f32 %v2628_v0, %v2555_v52 }
 0x449   : > { %v2719_v22 = vadd.f32 %v2703_v44, %v2603_v8 }
 0x44a   : > { %v2716_v17 = vadd.f32 %v2700_v51, %v2629_v38 }
 0x44b   : > { %2735 = vst [vmem:[%s5754_s9 + $0x40] sm:$0xff] %v2719_v22 }
 0x44c   : > { %2732 = vst [vmem:[%s5754_s9 + $0x28] sm:$0xff] %v2716_v17 }
 0x44e   : > { %v2605_v28 = vpop.f32.mrf.mxu0 }
 0x44f   : > { %v2631_v49 = vpop.f32.mrf.mxu1  ;;  %v2606_v15 = vadd.f32 %v2605_v28, %v2565_v9 }
 0x450   : > { %v2632_v30 = vadd.f32 %v2631_v49, %v2560_v2 }
 0x451   : > { %v2723_v10 = vadd.f32 %v2707_v48, %v2606_v15 }
 0x452   : > { %v2720_v34 = vadd.f32 %v2704_v1, %v2632_v30 }
 0x453   : > { %2739 = vst [vmem:[%s5754_s9 + $0x60] sm:$0xff] %v2723_v10 }
 0x454   : > { %2736 = vst [vmem:[%s5754_s9 + $0x48] sm:$0xff] %v2720_v34 }
 0x457   : > { %v2634_v41 = vpop.f32.mrf.mxu1 }
 0x458   : > { %v2635_v26 = vadd.f32 %v2634_v41, %v2565_v9 }
 0x45a   : > { %v2724_v12 = vadd.f32 %v2708_v42, %v2635_v26 }
 0x45c   : > { %2740 = vst [vmem:[%s5754_s9 + $0x68] sm:$0xff] %v2724_v12 }
 0x45d   : > { %3276 = shalt.err (!%p3273_p13)
}
 0x45e   : > { %s3356_s24 = smov 512   ;;  %s3357_s25 = smov 32  }
 0x45f   : > { %2947 = dma.vmem_to_hbm [thread:$0]  (%p3434_p9), %s2759_s12, 2048, %s2761_s13, %s2744_s14, %s3356_s24, %s3356_s24, %s3357_s25  }
 0x460 PF: > { %s2775_s9 = sand.u32 1, %s3311_s15   ;;  %p2954_p0 = pnand %p2851_p12, %p3441_p11 }
 0x461   : > { %s2776_s26 = scalar_lea.sflag [#allocation5], %s2775_s9 }
 0x462   : > { %p2955_p1 = pneg %p2954_p0 }
 0x464   : > { %3306 = dma.done.wait (%p2955_p1), %s2776_s26, 2048  }
 0x465   : > { %3308 = vsyncadd (%p2955_p1), %s2776_s26, 4294965248  ;;  %s20_s20 = sadd.s32 1, %s3331_s20   ;;  %s5979_s15 = smov %s3315_s16 }
 0x466   : > { %p17_p2 = scmp.ge.s32.totalorder %s20_s20, 4   ;;  %s5980_s16 = smov %s3319_s17 }
 0x467   : > { %s5981_s17 = smov %s3439_s29  ;;  %s5982_s18 = smov %s3327_s19 }
 0x468   : > { %s5983_s19 = smov %s5985_s23  ;;  %19 = sbr.rel (!%p17_p2) target bundleno = 6 (0x6), region = 85 }
 0x46d   :  { %2782 = vsyncpa [#allocation4], 1 }
 0x46e   :  { %2784 = vsyncpa [#allocation4 + $0x1], 1 }
 0x46f   :  { %2785 = vsyncpa [#allocation5], 1 }
 0x470   :  { %2787 = vsyncpa [#allocation5 + $0x1], 1 }

</bundles_post_ra>
